<compile_context>
chip_gen: v7x
topology: tpu7x:2x2x1
jax: 0.10.0
libtpu: 0.0.40
codegen_flags: <defaults>
</compile_context>

<pallas_src>
import jax
import jax.numpy as jnp
from jax.experimental import pallas as pl
from jax.experimental.pallas import tpu as pltpu

_EPS = 1e-5
_VMEM_LIMIT = 48 * 1024 * 1024
_WPAD = 8   # sublane-aligned offset of the conv interior inside the W-halo scratch


# ----------------------------------------------------------------------------
# in-kernel helpers
# ----------------------------------------------------------------------------
def _bn_relu(x, scale_ref, bias_ref):
    """Eval-mode BatchNorm folded into scale/bias, followed by ReLU (VPU)."""
    return jnp.maximum(x * scale_ref[...] + bias_ref[...], 0.0)


def _conv3x3_same(a, w_ref, b_ref, pad_ref):
    """3x3 SAME convolution of one image on the MXU (bf16 operands, f32 acc).

    a:       (H, W, Cin)        float32 activation (already BN+ReLU'd)
    w_ref:   (9, Cin, Cout)     bfloat16 taps, tap index = kh*3 + kw
    b_ref:   (1, Cout)          float32 conv bias
    pad_ref: (H+2, W+2*_WPAD, Cin) float32 VMEM scratch (W halo only)
    returns  (H*W, Cout)        float32
    """
    H, W, Cin = a.shape
    Cout = w_ref.shape[-1]

    # H halo: two zero rows concatenated on the cheap outer axis -- no buffer fill.
    zrow = jnp.zeros((1, W, Cin), a.dtype)
    apad = jnp.concatenate([zrow, a, zrow], axis=0)               # (H+2, W, Cin)

    # W halo: sublane-aligned interior store + zero only the two border columns
    # that are actually read (no full-scratch zero fill, no unaligned big store).
    zcol = jnp.zeros((H + 2, 1, Cin), jnp.float32)
    pad_ref[:, _WPAD:_WPAD + W, :] = apad
    pad_ref[:, _WPAD - 1:_WPAD, :] = zcol
    pad_ref[:, _WPAD + W:_WPAD + W + 1, :] = zcol

    # Accumulator seeded with the broadcast bias (no separate epilogue add).
    acc = jnp.broadcast_to(b_ref[...], (H * W, Cout)).astype(jnp.float32)
    for kw in range(3):
        # one contiguous (H+2, W, Cin) window per kw; the kh shifts below are
        # free outer-dim slices of this value (no strided per-tap copies)
        off = _WPAD - 1 + kw
        slab = pad_ref[:, off:off + W, :].astype(jnp.bfloat16)
        for kh in range(3):
            acc = acc + jnp.dot(slab[kh:kh + H].reshape(H * W, Cin),
                                w_ref[kh * 3 + kw],
                                preferred_element_type=jnp.float32)
    return acc


# ----------------------------------------------------------------------------
# kernels
# ----------------------------------------------------------------------------
def _g_branch_kernel(g_ref, sg_ref, bg_ref, wg_ref, bwg_ref, o_ref, pad_ref):
    """g branch: BN + ReLU + Conv3x3 + max over row pairs (H half of MaxPool)."""
    hg, wg, _ = g_ref.shape
    cout = o_ref.shape[-1]
    a = _bn_relu(g_ref[...], sg_ref, bg_ref)
    conv = _conv3x3_same(a, wg_ref, bwg_ref, pad_ref)             # (Hg*Wg, Cout)
    conv = conv.reshape(hg // 2, 2, wg, cout)                     # free outer split
    o_ref[...] = jnp.maximum(conv[:, 0], conv[:, 1]).astype(o_ref.dtype)


def _tail_kernel(gp_ref, x_ref, sx_ref, bx_ref, wx_ref, bwx_ref,
                 sgc_ref, bgc_ref, wgc_ref, bwgc_ref, o_ref, pad_ref):
    """x-branch conv + add pooled g + BN + ReLU + conv + multiply by x (fused)."""
    hx, wx, cx = x_ref.shape
    x = x_ref[...]
    ax = _bn_relu(x, sx_ref, bx_ref)
    x_conv = _conv3x3_same(ax, wx_ref, bwx_ref, pad_ref).reshape(hx, wx, cx)
    s = gp_ref[...].astype(jnp.float32) + x_conv                  # g_pool + x_conv
    ag = _bn_relu(s, sgc_ref, bgc_ref)
    gc = _conv3x3_same(ag, wgc_ref, bwgc_ref, pad_ref).reshape(hx, wx, cx)
    o_ref[...] = (gc * x).astype(o_ref.dtype)


# ----------------------------------------------------------------------------
# pallas_call wrappers
# ----------------------------------------------------------------------------
def _const_spec(shape):
    return pl.BlockSpec(shape, lambda n: (0,) * len(shape))


def _batch_spec(shape):
    # one image per grid step; the batch dim is squeezed out of the kernel ref
    return pl.BlockSpec((None,) + tuple(shape), lambda n: (n,) + (0,) * len(shape))


def _g_branch(g, scale, bias, w_taps, b_conv):
    n, hg, wg, cg = g.shape
    cout = w_taps.shape[-1]
    return pl.pallas_call(
        _g_branch_kernel,
        out_shape=jax.ShapeDtypeStruct((n, hg // 2, wg, cout), jnp.bfloat16),
        grid=(n,),
        in_specs=[
            _batch_spec((hg, wg, cg)),
            _const_spec(scale.shape), _const_spec(bias.shape),
            _const_spec(w_taps.shape), _const_spec(b_conv.shape),
        ],
        out_specs=_batch_spec((hg // 2, wg, cout)),
        scratch_shapes=[pltpu.VMEM((hg + 2, wg + 2 * _WPAD, cg), jnp.float32)],
        compiler_params=pltpu.CompilerParams(
            dimension_semantics=("parallel",),
            vmem_limit_bytes=_VMEM_LIMIT),
    )(g, scale, bias, w_taps, b_conv)


def _tail(g_pool, x, sx, bx, wx_taps, bx_conv, sgc, bgc, wgc_taps, bgc_conv):
    n, hx, wx, cx = x.shape
    cout = wgc_taps.shape[-1]
    return pl.pallas_call(
        _tail_kernel,
        out_shape=jax.ShapeDtypeStruct((n, hx, wx, cx), jnp.float32),
        grid=(n,),
        in_specs=[
            _batch_spec((hx, wx, cout)),        # pooled g
            _batch_spec((hx, wx, cx)),          # x
            _const_spec(sx.shape), _const_spec(bx.shape),
            _const_spec(wx_taps.shape), _const_spec(bx_conv.shape),
            _const_spec(sgc.shape), _const_spec(bgc.shape),
            _const_spec(wgc_taps.shape), _const_spec(bgc_conv.shape),
        ],
        out_specs=_batch_spec((hx, wx, cx)),
        scratch_shapes=[pltpu.VMEM((hx + 2, wx + 2 * _WPAD, cx), jnp.float32)],
        compiler_params=pltpu.CompilerParams(
            dimension_semantics=("parallel",),
            vmem_limit_bytes=_VMEM_LIMIT),
    )(g_pool, x, sx, bx, wx_taps, bx_conv, sgc, bgc, wgc_taps, bgc_conv)


# ----------------------------------------------------------------------------
# Module-level forward (glue: layout transposes, BN folding, weight repack,
# and the free W-phase half of the 2x2 max pool).  All heavy compute runs
# inside the two kernels.
# ----------------------------------------------------------------------------
def _fold_bn(bn):
    scale = bn["gamma"] * jax.lax.rsqrt(bn["var"] + _EPS)
    bias = bn["beta"] - bn["mean"] * scale
    return scale.astype(jnp.float32), bias.astype(jnp.float32)


def _pack_conv(cp):
    # PyTorch (Cout, Cin, 3, 3) -> (3, 3, Cin, Cout) -> (9, Cin, Cout), bf16 taps
    w = cp["w"]
    cout, cin = w.shape[0], w.shape[1]
    taps = jnp.transpose(w, (2, 3, 1, 0)).reshape(9, cin, cout).astype(jnp.bfloat16)
    bias = cp["b"].reshape(1, cout).astype(jnp.float32)
    return taps, bias


def attention_block(g_nchw, x_nchw, params):
    g = jnp.transpose(g_nchw, (0, 2, 3, 1)).astype(jnp.float32)   # NCHW -> NHWC
    x = jnp.transpose(x_nchw, (0, 2, 3, 1)).astype(jnp.float32)
    n, hg, wg, cg = g.shape
    _, hx, wx, cx = x.shape
    assert hg == 2 * hx and wg == 2 * wx, "g must be at 2x the resolution of x"
    assert hg % 2 == 0 and wg % 2 == 0, "MaxPool2d((2,2)) requires even H and W"

    sg, bg = _fold_bn(params["bn_g"])
    sx, bx = _fold_bn(params["bn_x"])
    sgc, bgc = _fold_bn(params["bn_gc"])
    w_g, b_g = _pack_conv(params["conv_g"])
    w_x, b_x = _pack_conv(params["conv_x"])
    w_gc, b_gc = _pack_conv(params["conv_gc"])
    cout = w_g.shape[-1]

    # kernel 1: g branch (BN+ReLU+Conv3x3 + row half of the 2x2 max pool)
    g_hpool = _g_branch(g, sg.reshape(1, 1, cg), bg.reshape(1, 1, cg), w_g, b_g)

    # column half of the 2x2 max pool: free row-major reshape + max over the
    # contiguous column pairs (no strided gathers).
    g_pool = g_hpool.reshape(n, hx, wx, 2, cout).max(axis=3)

    # kernel 2: fused x-branch conv + combine + gc conv + gating multiply
    y = _tail(g_pool, x,
              sx.reshape(1, 1, cx), bx.reshape(1, 1, cx), w_x, b_x,
              sgc.reshape(1, 1, cout), bgc.reshape(1, 1, cout), w_gc, b_gc)
    return jnp.transpose(y, (0, 3, 1, 2))                         # NHWC -> NCHW


# ----------------------------------------------------------------------------
# Deterministic synthetic parameters (shapes from Attention_Block.__init__)
# ----------------------------------------------------------------------------
def init_params(key, in_c):
    cg, cx = in_c
    out_c = cx

    def bn(k, c):
        k1, k2, k3, k4 = jax.random.split(k, 4)
        return dict(gamma=1.0 + 0.1 * jax.random.normal(k1, (c,), jnp.float32),
                    beta=0.1 * jax.random.normal(k2, (c,), jnp.float32),
                    mean=0.1 * jax.random.normal(k3, (c,), jnp.float32),
                    var=jax.random.uniform(k4, (c,), jnp.float32, 0.5, 1.5))

    def conv(k, cin, cout):
        k1, k2 = jax.random.split(k, 2)
        return dict(w=0.2 * jax.random.normal(k1, (cout, cin, 3, 3), jnp.float32),
                    b=0.1 * jax.random.normal(k2, (cout,), jnp.float32))

    ks = jax.random.split(key, 6)
    return dict(bn_g=bn(ks[0], cg),     conv_g=conv(ks[1], cg, out_c),
                bn_x=bn(ks[2], cx),     conv_x=conv(ks[3], cx, out_c),
                bn_gc=bn(ks[4], out_c), conv_gc=conv(ks[5], out_c, out_c))


# ----------------------------------------------------------------------------
# Pure-JAX reference (same eval-mode BN semantics) for self-validation
# ----------------------------------------------------------------------------
def reference(g_nchw, x_nchw, params):
    def bn_relu(x, bn):
        inv = jax.lax.rsqrt(bn["var"] + _EPS)
        xn = (x - bn["mean"][None, :, None, None]) * inv[None, :, None, None]
        return jnp.maximum(xn * bn["gamma"][None, :, None, None]
                           + bn["beta"][None, :, None, None], 0.0)

    def conv(x, cp):
        y = jax.lax.conv_general_dilated(
            x, cp["w"], window_strides=(1, 1), padding=((1, 1), (1, 1)),
            dimension_numbers=("NCHW", "OIHW", "NCHW"),
            precision=jax.lax.Precision.HIGHEST)
        return y + cp["b"][None, :, None, None]

    gp = conv(bn_relu(g_nchw, params["bn_g"]), params["conv_g"])
    n, c, h, w = gp.shape
    gp = gp.reshape(n, c, h // 2, 2, w // 2, 2).max(axis=(3, 5))   # MaxPool2d((2,2))
    xc = conv(bn_relu(x_nchw, params["bn_x"]), params["conv_x"])
    gc = conv(bn_relu(gp + xc, params["bn_gc"]), params["conv_gc"])
    return gc * x_nchw


# ----------------------------------------------------------------------------
if __name__ == "__main__":
    key = jax.random.PRNGKey(0)
    kg, kx, kp = jax.random.split(key, 3)

    N, Cg, Cx = 2, 4, 8
    Hg = Wg = 16          # g lives at 2x the spatial resolution of x
    Hx = Wx = 8           # (MaxPool(g_conv) must match x_conv spatially)

    g = jax.random.normal(kg, (N, Cg, Hg, Wg), jnp.float32)
    x = jax.random.normal(kx, (N, Cx, Hx, Wx), jnp.float32)
    params = init_params(kp, (Cg, Cx))

    y = jax.jit(attention_block)(g, x, params)
    jax.block_until_ready(y)
    assert y.shape == (N, Cx, Hx, Wx), y.shape

    y_ref = reference(g, x, params)
    # kernel uses bf16 MXU operands / bf16 pooled-g intermediate, the reference
    # runs f32 at HIGHEST precision -> compare with a bf16-appropriate tolerance
    num = float(jnp.linalg.norm((y - y_ref).ravel()))
    den = float(jnp.linalg.norm(y_ref.ravel())) + 1e-6
    rel = num / den
    if rel > 5e-2:
        raise SystemExit(f"mismatch vs JAX reference: rel Frobenius err = {rel}")
    print("KERNEL_OK")
</pallas_src>

<mosaic_0001>
module attributes {stable_mosaic.version = 11 : i64} {
  func.func @_g_branch_kernel(%arg0: i32, %arg1: memref<1x16x16x4xf32, #tpu.memory_space<vmem>>, %arg2: memref<1x1x4xf32, #tpu.memory_space<vmem>>, %arg3: memref<1x1x4xf32, #tpu.memory_space<vmem>>, %arg4: memref<9x4x8xbf16, #tpu.memory_space<vmem>>, %arg5: memref<1x8xf32, #tpu.memory_space<vmem>>, %arg6: memref<1x8x16x8xbf16, #tpu.memory_space<vmem>>, %arg7: memref<18x32x4xf32, #tpu.memory_space<vmem>>) attributes {dimension_semantics = [#tpu.dimension_semantics<parallel>], iteration_bounds = array<i64: 2>, scalar_prefetch = 0 : i64, scratch_operands = 1 : i64, tpu.core_type = #tpu.core_type<tc>, window_params = [{transform_indices = @transform_0, window_bounds = array<i64: 1, 16, 16, 4>}, {pipeline_mode = #tpu.pipeline_mode<synchronous>, transform_indices = @transform_1, window_bounds = array<i64: 1, 1, 4>}, {pipeline_mode = #tpu.pipeline_mode<synchronous>, transform_indices = @transform_2, window_bounds = array<i64: 1, 1, 4>}, {pipeline_mode = #tpu.pipeline_mode<synchronous>, transform_indices = @transform_3, window_bounds = array<i64: 9, 4, 8>}, {pipeline_mode = #tpu.pipeline_mode<synchronous>, transform_indices = @transform_4, window_bounds = array<i64: 1, 8>}, {transform_indices = @transform_5, window_bounds = array<i64: 1, 8, 16, 8>}]} {
    %c0 = arith.constant 0 : index
    %c0_0 = arith.constant 0 : index
    %c0_1 = arith.constant 0 : index
    %c0_2 = arith.constant 0 : index
    %0 = vector.load %arg1[%c0, %c0_0, %c0_1, %c0_2] : memref<1x16x16x4xf32, #tpu.memory_space<vmem>>, vector<1x16x16x4xf32>
    %1 = vector.shape_cast %0 : vector<1x16x16x4xf32> to vector<16x16x4xf32>
    %c0_3 = arith.constant 0 : index
    %c0_4 = arith.constant 0 : index
    %c0_5 = arith.constant 0 : index
    %2 = vector.load %arg2[%c0_3, %c0_4, %c0_5] : memref<1x1x4xf32, #tpu.memory_space<vmem>>, vector<1x1x4xf32>
    %3 = vector.broadcast %2 : vector<1x1x4xf32> to vector<16x16x4xf32>
    %4 = arith.mulf %1, %3 : vector<16x16x4xf32>
    %c0_6 = arith.constant 0 : index
    %c0_7 = arith.constant 0 : index
    %c0_8 = arith.constant 0 : index
    %5 = vector.load %arg3[%c0_6, %c0_7, %c0_8] : memref<1x1x4xf32, #tpu.memory_space<vmem>>, vector<1x1x4xf32>
    %6 = vector.broadcast %5 : vector<1x1x4xf32> to vector<16x16x4xf32>
    %7 = arith.addf %4, %6 : vector<16x16x4xf32>
    %cst = arith.constant 0.000000e+00 : f32
    %8 = vector.broadcast %cst : f32 to vector<16x16x4xf32>
    %9 = arith.maximumf %7, %8 : vector<16x16x4xf32>
    %cst_9 = arith.constant 0.000000e+00 : f32
    %10 = vector.broadcast %cst_9 : f32 to vector<1x16x4xf32>
    %11 = tpu.concatenate %10, %9, %10 in 0 : vector<1x16x4xf32>, vector<16x16x4xf32>, vector<1x16x4xf32> -> vector<18x16x4xf32>
    %cst_10 = arith.constant 0.000000e+00 : f32
    %12 = vector.broadcast %cst_10 : f32 to vector<18x1x4xf32>
    %c0_11 = arith.constant 0 : index
    %c8 = arith.constant 8 : index
    %c0_12 = arith.constant 0 : index
    %13 = vector.load %arg7[%c0_11, %c8, %c0_12] : memref<18x32x4xf32, #tpu.memory_space<vmem>>, vector<18x16x4xf32>
    tpu.vector_store %arg7[%c0_11, %c8, %c0_12], %11 {strides = array<i32>} : memref<18x32x4xf32, #tpu.memory_space<vmem>>, vector<18x16x4xf32>,
    %c0_13 = arith.constant 0 : index
    %c7 = arith.constant 7 : index
    %c0_14 = arith.constant 0 : index
    %14 = vector.load %arg7[%c0_13, %c7, %c0_14] : memref<18x32x4xf32, #tpu.memory_space<vmem>>, vector<18x1x4xf32>
    tpu.vector_store %arg7[%c0_13, %c7, %c0_14], %12 {strides = array<i32>} : memref<18x32x4xf32, #tpu.memory_space<vmem>>, vector<18x1x4xf32>,
    %c0_15 = arith.constant 0 : index
    %c24 = arith.constant 24 : index
    %c0_16 = arith.constant 0 : index
    %15 = vector.load %arg7[%c0_15, %c24, %c0_16] : memref<18x32x4xf32, #tpu.memory_space<vmem>>, vector<18x1x4xf32>
    tpu.vector_store %arg7[%c0_15, %c24, %c0_16], %12 {strides = array<i32>} : memref<18x32x4xf32, #tpu.memory_space<vmem>>, vector<18x1x4xf32>,
    %c0_17 = arith.constant 0 : index
    %c0_18 = arith.constant 0 : index
    %16 = vector.load %arg5[%c0_17, %c0_18] : memref<1x8xf32, #tpu.memory_space<vmem>>, vector<1x8xf32>
    %17 = vector.shape_cast %16 : vector<1x8xf32> to vector<1x8xf32>
    %18 = vector.broadcast %17 : vector<1x8xf32> to vector<256x8xf32>
    %c0_19 = arith.constant 0 : index
    %c7_20 = arith.constant 7 : index
    %c0_21 = arith.constant 0 : index
    %19 = vector.load %arg7[%c0_19, %c7_20, %c0_21] : memref<18x32x4xf32, #tpu.memory_space<vmem>>, vector<18x16x4xf32>
    %20 = arith.truncf %19 : vector<18x16x4xf32> to vector<18x16x4xbf16>
    %21 = vector.extract_strided_slice %20 {offsets = [0, 0, 0], sizes = [16, 16, 4], strides = [1, 1, 1]} : vector<18x16x4xbf16> to vector<16x16x4xbf16>
    %22 = vector.shape_cast %21 : vector<16x16x4xbf16> to vector<256x4xbf16>
    %c0_22 = arith.constant 0 : index
    %c0_23 = arith.constant 0 : index
    %c0_24 = arith.constant 0 : index
    %23 = vector.load %arg4[%c0_22, %c0_23, %c0_24] : memref<9x4x8xbf16, #tpu.memory_space<vmem>>, vector<1x4x8xbf16>
    %24 = vector.shape_cast %23 : vector<1x4x8xbf16> to vector<4x8xbf16>
    %cst_25 = arith.constant dense<0.000000e+00> : vector<256x8xf32>
    %25 = tpu.matmul %22, %24, %cst_25 {dimension_numbers = #tpu.dot_dimension_numbers<[1], [0], [0], [1], [0, 0, 1, 1], [], []>} : vector<256x4xbf16>, vector<4x8xbf16>, vector<256x8xf32> -> vector<256x8xf32>
    %26 = arith.addf %18, %25 : vector<256x8xf32>
    %27 = vector.extract_strided_slice %20 {offsets = [1, 0, 0], sizes = [16, 16, 4], strides = [1, 1, 1]} : vector<18x16x4xbf16> to vector<16x16x4xbf16>
    %28 = vector.shape_cast %27 : vector<16x16x4xbf16> to vector<256x4xbf16>
    %c3 = arith.constant 3 : index
    %c0_26 = arith.constant 0 : index
    %c0_27 = arith.constant 0 : index
    %29 = vector.load %arg4[%c3, %c0_26, %c0_27] : memref<9x4x8xbf16, #tpu.memory_space<vmem>>, vector<1x4x8xbf16>
    %30 = vector.shape_cast %29 : vector<1x4x8xbf16> to vector<4x8xbf16>
    %cst_28 = arith.constant dense<0.000000e+00> : vector<256x8xf32>
    %31 = tpu.matmul %28, %30, %cst_28 {dimension_numbers = #tpu.dot_dimension_numbers<[1], [0], [0], [1], [0, 0, 1, 1], [], []>} : vector<256x4xbf16>, vector<4x8xbf16>, vector<256x8xf32> -> vector<256x8xf32>
    %32 = arith.addf %26, %31 : vector<256x8xf32>
    %33 = vector.extract_strided_slice %20 {offsets = [2, 0, 0], sizes = [16, 16, 4], strides = [1, 1, 1]} : vector<18x16x4xbf16> to vector<16x16x4xbf16>
    %34 = vector.shape_cast %33 : vector<16x16x4xbf16> to vector<256x4xbf16>
    %c6 = arith.constant 6 : index
    %c0_29 = arith.constant 0 : index
    %c0_30 = arith.constant 0 : index
    %35 = vector.load %arg4[%c6, %c0_29, %c0_30] : memref<9x4x8xbf16, #tpu.memory_space<vmem>>, vector<1x4x8xbf16>
    %36 = vector.shape_cast %35 : vector<1x4x8xbf16> to vector<4x8xbf16>
    %cst_31 = arith.constant dense<0.000000e+00> : vector<256x8xf32>
    %37 = tpu.matmul %34, %36, %cst_31 {dimension_numbers = #tpu.dot_dimension_numbers<[1], [0], [0], [1], [0, 0, 1, 1], [], []>} : vector<256x4xbf16>, vector<4x8xbf16>, vector<256x8xf32> -> vector<256x8xf32>
    %38 = arith.addf %32, %37 : vector<256x8xf32>
    %c0_32 = arith.constant 0 : index
    %c8_33 = arith.constant 8 : index
    %c0_34 = arith.constant 0 : index
    %39 = vector.load %arg7[%c0_32, %c8_33, %c0_34] : memref<18x32x4xf32, #tpu.memory_space<vmem>>, vector<18x16x4xf32>
    %40 = arith.truncf %39 : vector<18x16x4xf32> to vector<18x16x4xbf16>
    %41 = vector.extract_strided_slice %40 {offsets = [0, 0, 0], sizes = [16, 16, 4], strides = [1, 1, 1]} : vector<18x16x4xbf16> to vector<16x16x4xbf16>
    %42 = vector.shape_cast %41 : vector<16x16x4xbf16> to vector<256x4xbf16>
    %c1 = arith.constant 1 : index
    %c0_35 = arith.constant 0 : index
    %c0_36 = arith.constant 0 : index
    %43 = vector.load %arg4[%c1, %c0_35, %c0_36] : memref<9x4x8xbf16, #tpu.memory_space<vmem>>, vector<1x4x8xbf16>
    %44 = vector.shape_cast %43 : vector<1x4x8xbf16> to vector<4x8xbf16>
    %cst_37 = arith.constant dense<0.000000e+00> : vector<256x8xf32>
    %45 = tpu.matmul %42, %44, %cst_37 {dimension_numbers = #tpu.dot_dimension_numbers<[1], [0], [0], [1], [0, 0, 1, 1], [], []>} : vector<256x4xbf16>, vector<4x8xbf16>, vector<256x8xf32> -> vector<256x8xf32>
    %46 = arith.addf %38, %45 : vector<256x8xf32>
    %47 = vector.extract_strided_slice %40 {offsets = [1, 0, 0], sizes = [16, 16, 4], strides = [1, 1, 1]} : vector<18x16x4xbf16> to vector<16x16x4xbf16>
    %48 = vector.shape_cast %47 : vector<16x16x4xbf16> to vector<256x4xbf16>
    %c4 = arith.constant 4 : index
    %c0_38 = arith.constant 0 : index
    %c0_39 = arith.constant 0 : index
    %49 = vector.load %arg4[%c4, %c0_38, %c0_39] : memref<9x4x8xbf16, #tpu.memory_space<vmem>>, vector<1x4x8xbf16>
    %50 = vector.shape_cast %49 : vector<1x4x8xbf16> to vector<4x8xbf16>
    %cst_40 = arith.constant dense<0.000000e+00> : vector<256x8xf32>
    %51 = tpu.matmul %48, %50, %cst_40 {dimension_numbers = #tpu.dot_dimension_numbers<[1], [0], [0], [1], [0, 0, 1, 1], [], []>} : vector<256x4xbf16>, vector<4x8xbf16>, vector<256x8xf32> -> vector<256x8xf32>
    %52 = arith.addf %46, %51 : vector<256x8xf32>
    %53 = vector.extract_strided_slice %40 {offsets = [2, 0, 0], sizes = [16, 16, 4], strides = [1, 1, 1]} : vector<18x16x4xbf16> to vector<16x16x4xbf16>
    %54 = vector.shape_cast %53 : vector<16x16x4xbf16> to vector<256x4xbf16>
    %c7_41 = arith.constant 7 : index
    %c0_42 = arith.constant 0 : index
    %c0_43 = arith.constant 0 : index
    %55 = vector.load %arg4[%c7_41, %c0_42, %c0_43] : memref<9x4x8xbf16, #tpu.memory_space<vmem>>, vector<1x4x8xbf16>
    %56 = vector.shape_cast %55 : vector<1x4x8xbf16> to vector<4x8xbf16>
    %cst_44 = arith.constant dense<0.000000e+00> : vector<256x8xf32>
    %57 = tpu.matmul %54, %56, %cst_44 {dimension_numbers = #tpu.dot_dimension_numbers<[1], [0], [0], [1], [0, 0, 1, 1], [], []>} : vector<256x4xbf16>, vector<4x8xbf16>, vector<256x8xf32> -> vector<256x8xf32>
    %58 = arith.addf %52, %57 : vector<256x8xf32>
    %c0_45 = arith.constant 0 : index
    %c9 = arith.constant 9 : index
    %c0_46 = arith.constant 0 : index
    %59 = vector.load %arg7[%c0_45, %c9, %c0_46] : memref<18x32x4xf32, #tpu.memory_space<vmem>>, vector<18x16x4xf32>
    %60 = arith.truncf %59 : vector<18x16x4xf32> to vector<18x16x4xbf16>
    %61 = vector.extract_strided_slice %60 {offsets = [0, 0, 0], sizes = [16, 16, 4], strides = [1, 1, 1]} : vector<18x16x4xbf16> to vector<16x16x4xbf16>
    %62 = vector.shape_cast %61 : vector<16x16x4xbf16> to vector<256x4xbf16>
    %c2 = arith.constant 2 : index
    %c0_47 = arith.constant 0 : index
    %c0_48 = arith.constant 0 : index
    %63 = vector.load %arg4[%c2, %c0_47, %c0_48] : memref<9x4x8xbf16, #tpu.memory_space<vmem>>, vector<1x4x8xbf16>
    %64 = vector.shape_cast %63 : vector<1x4x8xbf16> to vector<4x8xbf16>
    %cst_49 = arith.constant dense<0.000000e+00> : vector<256x8xf32>
    %65 = tpu.matmul %62, %64, %cst_49 {dimension_numbers = #tpu.dot_dimension_numbers<[1], [0], [0], [1], [0, 0, 1, 1], [], []>} : vector<256x4xbf16>, vector<4x8xbf16>, vector<256x8xf32> -> vector<256x8xf32>
    %66 = arith.addf %58, %65 : vector<256x8xf32>
    %67 = vector.extract_strided_slice %60 {offsets = [1, 0, 0], sizes = [16, 16, 4], strides = [1, 1, 1]} : vector<18x16x4xbf16> to vector<16x16x4xbf16>
    %68 = vector.shape_cast %67 : vector<16x16x4xbf16> to vector<256x4xbf16>
    %c5 = arith.constant 5 : index
    %c0_50 = arith.constant 0 : index
    %c0_51 = arith.constant 0 : index
    %69 = vector.load %arg4[%c5, %c0_50, %c0_51] : memref<9x4x8xbf16, #tpu.memory_space<vmem>>, vector<1x4x8xbf16>
    %70 = vector.shape_cast %69 : vector<1x4x8xbf16> to vector<4x8xbf16>
    %cst_52 = arith.constant dense<0.000000e+00> : vector<256x8xf32>
    %71 = tpu.matmul %68, %70, %cst_52 {dimension_numbers = #tpu.dot_dimension_numbers<[1], [0], [0], [1], [0, 0, 1, 1], [], []>} : vector<256x4xbf16>, vector<4x8xbf16>, vector<256x8xf32> -> vector<256x8xf32>
    %72 = arith.addf %66, %71 : vector<256x8xf32>
    %73 = vector.extract_strided_slice %60 {offsets = [2, 0, 0], sizes = [16, 16, 4], strides = [1, 1, 1]} : vector<18x16x4xbf16> to vector<16x16x4xbf16>
    %74 = vector.shape_cast %73 : vector<16x16x4xbf16> to vector<256x4xbf16>
    %c8_53 = arith.constant 8 : index
    %c0_54 = arith.constant 0 : index
    %c0_55 = arith.constant 0 : index
    %75 = vector.load %arg4[%c8_53, %c0_54, %c0_55] : memref<9x4x8xbf16, #tpu.memory_space<vmem>>, vector<1x4x8xbf16>
    %76 = vector.shape_cast %75 : vector<1x4x8xbf16> to vector<4x8xbf16>
    %cst_56 = arith.constant dense<0.000000e+00> : vector<256x8xf32>
    %77 = tpu.matmul %74, %76, %cst_56 {dimension_numbers = #tpu.dot_dimension_numbers<[1], [0], [0], [1], [0, 0, 1, 1], [], []>} : vector<256x4xbf16>, vector<4x8xbf16>, vector<256x8xf32> -> vector<256x8xf32>
    %78 = arith.addf %72, %77 : vector<256x8xf32>
    %79 = vector.shape_cast %78 : vector<256x8xf32> to vector<8x2x16x8xf32>
    %80 = vector.extract_strided_slice %79 {offsets = [0, 0, 0, 0], sizes = [8, 1, 16, 8], strides = [1, 1, 1, 1]} : vector<8x2x16x8xf32> to vector<8x1x16x8xf32>
    %81 = vector.shape_cast %80 : vector<8x1x16x8xf32> to vector<8x16x8xf32>
    %82 = vector.extract_strided_slice %79 {offsets = [0, 1, 0, 0], sizes = [8, 1, 16, 8], strides = [1, 1, 1, 1]} : vector<8x2x16x8xf32> to vector<8x1x16x8xf32>
    %83 = vector.shape_cast %82 : vector<8x1x16x8xf32> to vector<8x16x8xf32>
    %84 = arith.maximumf %81, %83 : vector<8x16x8xf32>
    %85 = arith.truncf %84 : vector<8x16x8xf32> to vector<8x16x8xbf16>
    %c0_57 = arith.constant 0 : index
    %c0_58 = arith.constant 0 : index
    %c0_59 = arith.constant 0 : index
    %c0_60 = arith.constant 0 : index
    %86 = vector.load %arg6[%c0_57, %c0_58, %c0_59, %c0_60] : memref<1x8x16x8xbf16, #tpu.memory_space<vmem>>, vector<1x8x16x8xbf16>
    %87 = vector.shape_cast %86 : vector<1x8x16x8xbf16> to vector<8x16x8xbf16>
    %88 = vector.shape_cast %85 : vector<8x16x8xbf16> to vector<1x8x16x8xbf16>
    tpu.vector_store %arg6[%c0_57, %c0_58, %c0_59, %c0_60], %88 {strides = array<i32>} : memref<1x8x16x8xbf16, #tpu.memory_space<vmem>>, vector<1x8x16x8xbf16>,
    return
  }
  func.func @transform_0(%arg0: i32) -> (i32, i32, i32, i32) {
    %c0_i32 = arith.constant 0 : i32
    %c0_i32_0 = arith.constant 0 : i32
    %c0_i32_1 = arith.constant 0 : i32
    %c0_i32_2 = arith.constant 0 : i32
    return %arg0, %c0_i32, %c0_i32_0, %c0_i32_1 : i32, i32, i32, i32
  }
  func.func @transform_1(%arg0: i32) -> (i32, i32, i32) {
    %c0_i32 = arith.constant 0 : i32
    %c0_i32_0 = arith.constant 0 : i32
    %c0_i32_1 = arith.constant 0 : i32
    %c0_i32_2 = arith.constant 0 : i32
    return %c0_i32, %c0_i32_0, %c0_i32_1 : i32, i32, i32
  }
  func.func @transform_2(%arg0: i32) -> (i32, i32, i32) {
    %c0_i32 = arith.constant 0 : i32
    %c0_i32_0 = arith.constant 0 : i32
    %c0_i32_1 = arith.constant 0 : i32
    %c0_i32_2 = arith.constant 0 : i32
    return %c0_i32, %c0_i32_0, %c0_i32_1 : i32, i32, i32
  }
  func.func @transform_3(%arg0: i32) -> (i32, i32, i32) {
    %c0_i32 = arith.constant 0 : i32
    %c0_i32_0 = arith.constant 0 : i32
    %c0_i32_1 = arith.constant 0 : i32
    %c0_i32_2 = arith.constant 0 : i32
    return %c0_i32, %c0_i32_0, %c0_i32_1 : i32, i32, i32
  }
  func.func @transform_4(%arg0: i32) -> (i32, i32) {
    %c0_i32 = arith.constant 0 : i32
    %c0_i32_0 = arith.constant 0 : i32
    %c0_i32_1 = arith.constant 0 : i32
    return %c0_i32, %c0_i32_0 : i32, i32
  }
  func.func @transform_5(%arg0: i32) -> (i32, i32, i32, i32) {
    %c0_i32 = arith.constant 0 : i32
    %c0_i32_0 = arith.constant 0 : i32
    %c0_i32_1 = arith.constant 0 : i32
    %c0_i32_2 = arith.constant 0 : i32
    return %arg0, %c0_i32, %c0_i32_0, %c0_i32_1 : i32, i32, i32, i32
  }
}

module attributes {stable_mosaic.version = 11 : i64} {
  func.func @_tail_kernel(%arg0: i32, %arg1: memref<1x8x8x8xbf16, #tpu.memory_space<vmem>>, %arg2: memref<1x8x8x8xf32, #tpu.memory_space<vmem>>, %arg3: memref<1x1x8xf32, #tpu.memory_space<vmem>>, %arg4: memref<1x1x8xf32, #tpu.memory_space<vmem>>, %arg5: memref<9x8x8xbf16, #tpu.memory_space<vmem>>, %arg6: memref<1x8xf32, #tpu.memory_space<vmem>>, %arg7: memref<1x1x8xf32, #tpu.memory_space<vmem>>, %arg8: memref<1x1x8xf32, #tpu.memory_space<vmem>>, %arg9: memref<9x8x8xbf16, #tpu.memory_space<vmem>>, %arg10: memref<1x8xf32, #tpu.memory_space<vmem>>, %arg11: memref<1x8x8x8xf32, #tpu.memory_space<vmem>>, %arg12: memref<10x24x8xf32, #tpu.memory_space<vmem>>) attributes {dimension_semantics = [#tpu.dimension_semantics<parallel>], iteration_bounds = array<i64: 2>, scalar_prefetch = 0 : i64, scratch_operands = 1 : i64, tpu.core_type = #tpu.core_type<tc>, window_params = [{transform_indices = @transform_0, window_bounds = array<i64: 1, 8, 8, 8>}, {transform_indices = @transform_1, window_bounds = array<i64: 1, 8, 8, 8>}, {pipeline_mode = #tpu.pipeline_mode<synchronous>, transform_indices = @transform_2, window_bounds = array<i64: 1, 1, 8>}, {pipeline_mode = #tpu.pipeline_mode<synchronous>, transform_indices = @transform_3, window_bounds = array<i64: 1, 1, 8>}, {pipeline_mode = #tpu.pipeline_mode<synchronous>, transform_indices = @transform_4, window_bounds = array<i64: 9, 8, 8>}, {pipeline_mode = #tpu.pipeline_mode<synchronous>, transform_indices = @transform_5, window_bounds = array<i64: 1, 8>}, {pipeline_mode = #tpu.pipeline_mode<synchronous>, transform_indices = @transform_6, window_bounds = array<i64: 1, 1, 8>}, {pipeline_mode = #tpu.pipeline_mode<synchronous>, transform_indices = @transform_7, window_bounds = array<i64: 1, 1, 8>}, {pipeline_mode = #tpu.pipeline_mode<synchronous>, transform_indices = @transform_8, window_bounds = array<i64: 9, 8, 8>}, {pipeline_mode = #tpu.pipeline_mode<synchronous>, transform_indices = @transform_9, window_bounds = array<i64: 1, 8>}, {transform_indices = @transform_10, window_bounds = array<i64: 1, 8, 8, 8>}]} {
    %c0 = arith.constant 0 : index
    %c0_0 = arith.constant 0 : index
    %c0_1 = arith.constant 0 : index
    %c0_2 = arith.constant 0 : index
    %0 = vector.load %arg2[%c0, %c0_0, %c0_1, %c0_2] : memref<1x8x8x8xf32, #tpu.memory_space<vmem>>, vector<1x8x8x8xf32>
    %1 = vector.shape_cast %0 : vector<1x8x8x8xf32> to vector<8x8x8xf32>
    %c0_3 = arith.constant 0 : index
    %c0_4 = arith.constant 0 : index
    %c0_5 = arith.constant 0 : index
    %2 = vector.load %arg3[%c0_3, %c0_4, %c0_5] : memref<1x1x8xf32, #tpu.memory_space<vmem>>, vector<1x1x8xf32>
    %3 = vector.broadcast %2 : vector<1x1x8xf32> to vector<8x8x8xf32>
    %4 = arith.mulf %1, %3 : vector<8x8x8xf32>
    %c0_6 = arith.constant 0 : index
    %c0_7 = arith.constant 0 : index
    %c0_8 = arith.constant 0 : index
    %5 = vector.load %arg4[%c0_6, %c0_7, %c0_8] : memref<1x1x8xf32, #tpu.memory_space<vmem>>, vector<1x1x8xf32>
    %6 = vector.broadcast %5 : vector<1x1x8xf32> to vector<8x8x8xf32>
    %7 = arith.addf %4, %6 : vector<8x8x8xf32>
    %cst = arith.constant 0.000000e+00 : f32
    %8 = vector.broadcast %cst : f32 to vector<8x8x8xf32>
    %9 = arith.maximumf %7, %8 : vector<8x8x8xf32>
    %cst_9 = arith.constant 0.000000e+00 : f32
    %10 = vector.broadcast %cst_9 : f32 to vector<1x8x8xf32>
    %11 = tpu.concatenate %10, %9, %10 in 0 : vector<1x8x8xf32>, vector<8x8x8xf32>, vector<1x8x8xf32> -> vector<10x8x8xf32>
    %cst_10 = arith.constant 0.000000e+00 : f32
    %12 = vector.broadcast %cst_10 : f32 to vector<10x1x8xf32>
    %c0_11 = arith.constant 0 : index
    %c8 = arith.constant 8 : index
    %c0_12 = arith.constant 0 : index
    %13 = vector.load %arg12[%c0_11, %c8, %c0_12] : memref<10x24x8xf32, #tpu.memory_space<vmem>>, vector<10x8x8xf32>
    tpu.vector_store %arg12[%c0_11, %c8, %c0_12], %11 {strides = array<i32>} : memref<10x24x8xf32, #tpu.memory_space<vmem>>, vector<10x8x8xf32>,
    %c0_13 = arith.constant 0 : index
    %c7 = arith.constant 7 : index
    %c0_14 = arith.constant 0 : index
    %14 = vector.load %arg12[%c0_13, %c7, %c0_14] : memref<10x24x8xf32, #tpu.memory_space<vmem>>, vector<10x1x8xf32>
    tpu.vector_store %arg12[%c0_13, %c7, %c0_14], %12 {strides = array<i32>} : memref<10x24x8xf32, #tpu.memory_space<vmem>>, vector<10x1x8xf32>,
    %c0_15 = arith.constant 0 : index
    %c16 = arith.constant 16 : index
    %c0_16 = arith.constant 0 : index
    %15 = vector.load %arg12[%c0_15, %c16, %c0_16] : memref<10x24x8xf32, #tpu.memory_space<vmem>>, vector<10x1x8xf32>
    tpu.vector_store %arg12[%c0_15, %c16, %c0_16], %12 {strides = array<i32>} : memref<10x24x8xf32, #tpu.memory_space<vmem>>, vector<10x1x8xf32>,
    %c0_17 = arith.constant 0 : index
    %c0_18 = arith.constant 0 : index
    %16 = vector.load %arg6[%c0_17, %c0_18] : memref<1x8xf32, #tpu.memory_space<vmem>>, vector<1x8xf32>
    %17 = vector.shape_cast %16 : vector<1x8xf32> to vector<1x8xf32>
    %18 = vector.broadcast %17 : vector<1x8xf32> to vector<64x8xf32>
    %c0_19 = arith.constant 0 : index
    %c7_20 = arith.constant 7 : index
    %c0_21 = arith.constant 0 : index
    %19 = vector.load %arg12[%c0_19, %c7_20, %c0_21] : memref<10x24x8xf32, #tpu.memory_space<vmem>>, vector<10x8x8xf32>
    %20 = arith.truncf %19 : vector<10x8x8xf32> to vector<10x8x8xbf16>
    %21 = vector.extract_strided_slice %20 {offsets = [0, 0, 0], sizes = [8, 8, 8], strides = [1, 1, 1]} : vector<10x8x8xbf16> to vector<8x8x8xbf16>
    %22 = vector.shape_cast %21 : vector<8x8x8xbf16> to vector<64x8xbf16>
    %c0_22 = arith.constant 0 : index
    %c0_23 = arith.constant 0 : index
    %c0_24 = arith.constant 0 : index
    %23 = vector.load %arg5[%c0_22, %c0_23, %c0_24] : memref<9x8x8xbf16, #tpu.memory_space<vmem>>, vector<1x8x8xbf16>
    %24 = vector.shape_cast %23 : vector<1x8x8xbf16> to vector<8x8xbf16>
    %cst_25 = arith.constant dense<0.000000e+00> : vector<64x8xf32>
    %25 = tpu.matmul %22, %24, %cst_25 {dimension_numbers = #tpu.dot_dimension_numbers<[1], [0], [0], [1], [0, 0, 1, 1], [], []>} : vector<64x8xbf16>, vector<8x8xbf16>, vector<64x8xf32> -> vector<64x8xf32>
    %26 = arith.addf %18, %25 : vector<64x8xf32>
    %27 = vector.extract_strided_slice %20 {offsets = [1, 0, 0], sizes = [8, 8, 8], strides = [1, 1, 1]} : vector<10x8x8xbf16> to vector<8x8x8xbf16>
    %28 = vector.shape_cast %27 : vector<8x8x8xbf16> to vector<64x8xbf16>
    %c3 = arith.constant 3 : index
    %c0_26 = arith.constant 0 : index
    %c0_27 = arith.constant 0 : index
    %29 = vector.load %arg5[%c3, %c0_26, %c0_27] : memref<9x8x8xbf16, #tpu.memory_space<vmem>>, vector<1x8x8xbf16>
    %30 = vector.shape_cast %29 : vector<1x8x8xbf16> to vector<8x8xbf16>
    %cst_28 = arith.constant dense<0.000000e+00> : vector<64x8xf32>
    %31 = tpu.matmul %28, %30, %cst_28 {dimension_numbers = #tpu.dot_dimension_numbers<[1], [0], [0], [1], [0, 0, 1, 1], [], []>} : vector<64x8xbf16>, vector<8x8xbf16>, vector<64x8xf32> -> vector<64x8xf32>
    %32 = arith.addf %26, %31 : vector<64x8xf32>
    %33 = vector.extract_strided_slice %20 {offsets = [2, 0, 0], sizes = [8, 8, 8], strides = [1, 1, 1]} : vector<10x8x8xbf16> to vector<8x8x8xbf16>
    %34 = vector.shape_cast %33 : vector<8x8x8xbf16> to vector<64x8xbf16>
    %c6 = arith.constant 6 : index
    %c0_29 = arith.constant 0 : index
    %c0_30 = arith.constant 0 : index
    %35 = vector.load %arg5[%c6, %c0_29, %c0_30] : memref<9x8x8xbf16, #tpu.memory_space<vmem>>, vector<1x8x8xbf16>
    %36 = vector.shape_cast %35 : vector<1x8x8xbf16> to vector<8x8xbf16>
    %cst_31 = arith.constant dense<0.000000e+00> : vector<64x8xf32>
    %37 = tpu.matmul %34, %36, %cst_31 {dimension_numbers = #tpu.dot_dimension_numbers<[1], [0], [0], [1], [0, 0, 1, 1], [], []>} : vector<64x8xbf16>, vector<8x8xbf16>, vector<64x8xf32> -> vector<64x8xf32>
    %38 = arith.addf %32, %37 : vector<64x8xf32>
    %c0_32 = arith.constant 0 : index
    %c8_33 = arith.constant 8 : index
    %c0_34 = arith.constant 0 : index
    %39 = vector.load %arg12[%c0_32, %c8_33, %c0_34] : memref<10x24x8xf32, #tpu.memory_space<vmem>>, vector<10x8x8xf32>
    %40 = arith.truncf %39 : vector<10x8x8xf32> to vector<10x8x8xbf16>
    %41 = vector.extract_strided_slice %40 {offsets = [0, 0, 0], sizes = [8, 8, 8], strides = [1, 1, 1]} : vector<10x8x8xbf16> to vector<8x8x8xbf16>
    %42 = vector.shape_cast %41 : vector<8x8x8xbf16> to vector<64x8xbf16>
    %c1 = arith.constant 1 : index
    %c0_35 = arith.constant 0 : index
    %c0_36 = arith.constant 0 : index
    %43 = vector.load %arg5[%c1, %c0_35, %c0_36] : memref<9x8x8xbf16, #tpu.memory_space<vmem>>, vector<1x8x8xbf16>
    %44 = vector.shape_cast %43 : vector<1x8x8xbf16> to vector<8x8xbf16>
    %cst_37 = arith.constant dense<0.000000e+00> : vector<64x8xf32>
    %45 = tpu.matmul %42, %44, %cst_37 {dimension_numbers = #tpu.dot_dimension_numbers<[1], [0], [0], [1], [0, 0, 1, 1], [], []>} : vector<64x8xbf16>, vector<8x8xbf16>, vector<64x8xf32> -> vector<64x8xf32>
    %46 = arith.addf %38, %45 : vector<64x8xf32>
    %47 = vector.extract_strided_slice %40 {offsets = [1, 0, 0], sizes = [8, 8, 8], strides = [1, 1, 1]} : vector<10x8x8xbf16> to vector<8x8x8xbf16>
    %48 = vector.shape_cast %47 : vector<8x8x8xbf16> to vector<64x8xbf16>
    %c4 = arith.constant 4 : index
    %c0_38 = arith.constant 0 : index
    %c0_39 = arith.constant 0 : index
    %49 = vector.load %arg5[%c4, %c0_38, %c0_39] : memref<9x8x8xbf16, #tpu.memory_space<vmem>>, vector<1x8x8xbf16>
    %50 = vector.shape_cast %49 : vector<1x8x8xbf16> to vector<8x8xbf16>
    %cst_40 = arith.constant dense<0.000000e+00> : vector<64x8xf32>
    %51 = tpu.matmul %48, %50, %cst_40 {dimension_numbers = #tpu.dot_dimension_numbers<[1], [0], [0], [1], [0, 0, 1, 1], [], []>} : vector<64x8xbf16>, vector<8x8xbf16>, vector<64x8xf32> -> vector<64x8xf32>
    %52 = arith.addf %46, %51 : vector<64x8xf32>
    %53 = vector.extract_strided_slice %40 {offsets = [2, 0, 0], sizes = [8, 8, 8], strides = [1, 1, 1]} : vector<10x8x8xbf16> to vector<8x8x8xbf16>
    %54 = vector.shape_cast %53 : vector<8x8x8xbf16> to vector<64x8xbf16>
    %c7_41 = arith.constant 7 : index
    %c0_42 = arith.constant 0 : index
    %c0_43 = arith.constant 0 : index
    %55 = vector.load %arg5[%c7_41, %c0_42, %c0_43] : memref<9x8x8xbf16, #tpu.memory_space<vmem>>, vector<1x8x8xbf16>
    %56 = vector.shape_cast %55 : vector<1x8x8xbf16> to vector<8x8xbf16>
    %cst_44 = arith.constant dense<0.000000e+00> : vector<64x8xf32>
    %57 = tpu.matmul %54, %56, %cst_44 {dimension_numbers = #tpu.dot_dimension_numbers<[1], [0], [0], [1], [0, 0, 1, 1], [], []>} : vector<64x8xbf16>, vector<8x8xbf16>, vector<64x8xf32> -> vector<64x8xf32>
    %58 = arith.addf %52, %57 : vector<64x8xf32>
    %c0_45 = arith.constant 0 : index
    %c9 = arith.constant 9 : index
    %c0_46 = arith.constant 0 : index
    %59 = vector.load %arg12[%c0_45, %c9, %c0_46] : memref<10x24x8xf32, #tpu.memory_space<vmem>>, vector<10x8x8xf32>
    %60 = arith.truncf %59 : vector<10x8x8xf32> to vector<10x8x8xbf16>
    %61 = vector.extract_strided_slice %60 {offsets = [0, 0, 0], sizes = [8, 8, 8], strides = [1, 1, 1]} : vector<10x8x8xbf16> to vector<8x8x8xbf16>
    %62 = vector.shape_cast %61 : vector<8x8x8xbf16> to vector<64x8xbf16>
    %c2 = arith.constant 2 : index
    %c0_47 = arith.constant 0 : index
    %c0_48 = arith.constant 0 : index
    %63 = vector.load %arg5[%c2, %c0_47, %c0_48] : memref<9x8x8xbf16, #tpu.memory_space<vmem>>, vector<1x8x8xbf16>
    %64 = vector.shape_cast %63 : vector<1x8x8xbf16> to vector<8x8xbf16>
    %cst_49 = arith.constant dense<0.000000e+00> : vector<64x8xf32>
    %65 = tpu.matmul %62, %64, %cst_49 {dimension_numbers = #tpu.dot_dimension_numbers<[1], [0], [0], [1], [0, 0, 1, 1], [], []>} : vector<64x8xbf16>, vector<8x8xbf16>, vector<64x8xf32> -> vector<64x8xf32>
    %66 = arith.addf %58, %65 : vector<64x8xf32>
    %67 = vector.extract_strided_slice %60 {offsets = [1, 0, 0], sizes = [8, 8, 8], strides = [1, 1, 1]} : vector<10x8x8xbf16> to vector<8x8x8xbf16>
    %68 = vector.shape_cast %67 : vector<8x8x8xbf16> to vector<64x8xbf16>
    %c5 = arith.constant 5 : index
    %c0_50 = arith.constant 0 : index
    %c0_51 = arith.constant 0 : index
    %69 = vector.load %arg5[%c5, %c0_50, %c0_51] : memref<9x8x8xbf16, #tpu.memory_space<vmem>>, vector<1x8x8xbf16>
    %70 = vector.shape_cast %69 : vector<1x8x8xbf16> to vector<8x8xbf16>
    %cst_52 = arith.constant dense<0.000000e+00> : vector<64x8xf32>
    %71 = tpu.matmul %68, %70, %cst_52 {dimension_numbers = #tpu.dot_dimension_numbers<[1], [0], [0], [1], [0, 0, 1, 1], [], []>} : vector<64x8xbf16>, vector<8x8xbf16>, vector<64x8xf32> -> vector<64x8xf32>
    %72 = arith.addf %66, %71 : vector<64x8xf32>
    %73 = vector.extract_strided_slice %60 {offsets = [2, 0, 0], sizes = [8, 8, 8], strides = [1, 1, 1]} : vector<10x8x8xbf16> to vector<8x8x8xbf16>
    %74 = vector.shape_cast %73 : vector<8x8x8xbf16> to vector<64x8xbf16>
    %c8_53 = arith.constant 8 : index
    %c0_54 = arith.constant 0 : index
    %c0_55 = arith.constant 0 : index
    %75 = vector.load %arg5[%c8_53, %c0_54, %c0_55] : memref<9x8x8xbf16, #tpu.memory_space<vmem>>, vector<1x8x8xbf16>
    %76 = vector.shape_cast %75 : vector<1x8x8xbf16> to vector<8x8xbf16>
    %cst_56 = arith.constant dense<0.000000e+00> : vector<64x8xf32>
    %77 = tpu.matmul %74, %76, %cst_56 {dimension_numbers = #tpu.dot_dimension_numbers<[1], [0], [0], [1], [0, 0, 1, 1], [], []>} : vector<64x8xbf16>, vector<8x8xbf16>, vector<64x8xf32> -> vector<64x8xf32>
    %78 = arith.addf %72, %77 : vector<64x8xf32>
    %79 = vector.shape_cast %78 : vector<64x8xf32> to vector<8x8x8xf32>
    %c0_57 = arith.constant 0 : index
    %c0_58 = arith.constant 0 : index
    %c0_59 = arith.constant 0 : index
    %c0_60 = arith.constant 0 : index
    %80 = vector.load %arg1[%c0_57, %c0_58, %c0_59, %c0_60] : memref<1x8x8x8xbf16, #tpu.memory_space<vmem>>, vector<1x8x8x8xbf16>
    %81 = vector.shape_cast %80 : vector<1x8x8x8xbf16> to vector<8x8x8xbf16>
    %82 = arith.extf %81 : vector<8x8x8xbf16> to vector<8x8x8xf32>
    %83 = arith.addf %82, %79 : vector<8x8x8xf32>
    %c0_61 = arith.constant 0 : index
    %c0_62 = arith.constant 0 : index
    %c0_63 = arith.constant 0 : index
    %84 = vector.load %arg7[%c0_61, %c0_62, %c0_63] : memref<1x1x8xf32, #tpu.memory_space<vmem>>, vector<1x1x8xf32>
    %85 = vector.broadcast %84 : vector<1x1x8xf32> to vector<8x8x8xf32>
    %86 = arith.mulf %83, %85 : vector<8x8x8xf32>
    %c0_64 = arith.constant 0 : index
    %c0_65 = arith.constant 0 : index
    %c0_66 = arith.constant 0 : index
    %87 = vector.load %arg8[%c0_64, %c0_65, %c0_66] : memref<1x1x8xf32, #tpu.memory_space<vmem>>, vector<1x1x8xf32>
    %88 = vector.broadcast %87 : vector<1x1x8xf32> to vector<8x8x8xf32>
    %89 = arith.addf %86, %88 : vector<8x8x8xf32>
    %cst_67 = arith.constant 0.000000e+00 : f32
    %90 = vector.broadcast %cst_67 : f32 to vector<8x8x8xf32>
    %91 = arith.maximumf %89, %90 : vector<8x8x8xf32>
    %cst_68 = arith.constant 0.000000e+00 : f32
    %92 = vector.broadcast %cst_68 : f32 to vector<1x8x8xf32>
    %93 = tpu.concatenate %92, %91, %92 in 0 : vector<1x8x8xf32>, vector<8x8x8xf32>, vector<1x8x8xf32> -> vector<10x8x8xf32>
    %cst_69 = arith.constant 0.000000e+00 : f32
    %94 = vector.broadcast %cst_69 : f32 to vector<10x1x8xf32>
    %c0_70 = arith.constant 0 : index
    %c8_71 = arith.constant 8 : index
    %c0_72 = arith.constant 0 : index
    %95 = vector.load %arg12[%c0_70, %c8_71, %c0_72] : memref<10x24x8xf32, #tpu.memory_space<vmem>>, vector<10x8x8xf32>
    tpu.vector_store %arg12[%c0_70, %c8_71, %c0_72], %93 {strides = array<i32>} : memref<10x24x8xf32, #tpu.memory_space<vmem>>, vector<10x8x8xf32>,
    %c0_73 = arith.constant 0 : index
    %c7_74 = arith.constant 7 : index
    %c0_75 = arith.constant 0 : index
    %96 = vector.load %arg12[%c0_73, %c7_74, %c0_75] : memref<10x24x8xf32, #tpu.memory_space<vmem>>, vector<10x1x8xf32>
    tpu.vector_store %arg12[%c0_73, %c7_74, %c0_75], %94 {strides = array<i32>} : memref<10x24x8xf32, #tpu.memory_space<vmem>>, vector<10x1x8xf32>,
    %c0_76 = arith.constant 0 : index
    %c16_77 = arith.constant 16 : index
    %c0_78 = arith.constant 0 : index
    %97 = vector.load %arg12[%c0_76, %c16_77, %c0_78] : memref<10x24x8xf32, #tpu.memory_space<vmem>>, vector<10x1x8xf32>
    tpu.vector_store %arg12[%c0_76, %c16_77, %c0_78], %94 {strides = array<i32>} : memref<10x24x8xf32, #tpu.memory_space<vmem>>, vector<10x1x8xf32>,
    %c0_79 = arith.constant 0 : index
    %c0_80 = arith.constant 0 : index
    %98 = vector.load %arg10[%c0_79, %c0_80] : memref<1x8xf32, #tpu.memory_space<vmem>>, vector<1x8xf32>
    %99 = vector.shape_cast %98 : vector<1x8xf32> to vector<1x8xf32>
    %100 = vector.broadcast %99 : vector<1x8xf32> to vector<64x8xf32>
    %c0_81 = arith.constant 0 : index
    %c7_82 = arith.constant 7 : index
    %c0_83 = arith.constant 0 : index
    %101 = vector.load %arg12[%c0_81, %c7_82, %c0_83] : memref<10x24x8xf32, #tpu.memory_space<vmem>>, vector<10x8x8xf32>
    %102 = arith.truncf %101 : vector<10x8x8xf32> to vector<10x8x8xbf16>
    %103 = vector.extract_strided_slice %102 {offsets = [0, 0, 0], sizes = [8, 8, 8], strides = [1, 1, 1]} : vector<10x8x8xbf16> to vector<8x8x8xbf16>
    %104 = vector.shape_cast %103 : vector<8x8x8xbf16> to vector<64x8xbf16>
    %c0_84 = arith.constant 0 : index
    %c0_85 = arith.constant 0 : index
    %c0_86 = arith.constant 0 : index
    %105 = vector.load %arg9[%c0_84, %c0_85, %c0_86] : memref<9x8x8xbf16, #tpu.memory_space<vmem>>, vector<1x8x8xbf16>
    %106 = vector.shape_cast %105 : vector<1x8x8xbf16> to vector<8x8xbf16>
    %cst_87 = arith.constant dense<0.000000e+00> : vector<64x8xf32>
    %107 = tpu.matmul %104, %106, %cst_87 {dimension_numbers = #tpu.dot_dimension_numbers<[1], [0], [0], [1], [0, 0, 1, 1], [], []>} : vector<64x8xbf16>, vector<8x8xbf16>, vector<64x8xf32> -> vector<64x8xf32>
    %108 = arith.addf %100, %107 : vector<64x8xf32>
    %109 = vector.extract_strided_slice %102 {offsets = [1, 0, 0], sizes = [8, 8, 8], strides = [1, 1, 1]} : vector<10x8x8xbf16> to vector<8x8x8xbf16>
    %110 = vector.shape_cast %109 : vector<8x8x8xbf16> to vector<64x8xbf16>
    %c3_88 = arith.constant 3 : index
    %c0_89 = arith.constant 0 : index
    %c0_90 = arith.constant 0 : index
    %111 = vector.load %arg9[%c3_88, %c0_89, %c0_90] : memref<9x8x8xbf16, #tpu.memory_space<vmem>>, vector<1x8x8xbf16>
    %112 = vector.shape_cast %111 : vector<1x8x8xbf16> to vector<8x8xbf16>
    %cst_91 = arith.constant dense<0.000000e+00> : vector<64x8xf32>
    %113 = tpu.matmul %110, %112, %cst_91 {dimension_numbers = #tpu.dot_dimension_numbers<[1], [0], [0], [1], [0, 0, 1, 1], [], []>} : vector<64x8xbf16>, vector<8x8xbf16>, vector<64x8xf32> -> vector<64x8xf32>
    %114 = arith.addf %108, %113 : vector<64x8xf32>
    %115 = vector.extract_strided_slice %102 {offsets = [2, 0, 0], sizes = [8, 8, 8], strides = [1, 1, 1]} : vector<10x8x8xbf16> to vector<8x8x8xbf16>
    %116 = vector.shape_cast %115 : vector<8x8x8xbf16> to vector<64x8xbf16>
    %c6_92 = arith.constant 6 : index
    %c0_93 = arith.constant 0 : index
    %c0_94 = arith.constant 0 : index
    %117 = vector.load %arg9[%c6_92, %c0_93, %c0_94] : memref<9x8x8xbf16, #tpu.memory_space<vmem>>, vector<1x8x8xbf16>
    %118 = vector.shape_cast %117 : vector<1x8x8xbf16> to vector<8x8xbf16>
    %cst_95 = arith.constant dense<0.000000e+00> : vector<64x8xf32>
    %119 = tpu.matmul %116, %118, %cst_95 {dimension_numbers = #tpu.dot_dimension_numbers<[1], [0], [0], [1], [0, 0, 1, 1], [], []>} : vector<64x8xbf16>, vector<8x8xbf16>, vector<64x8xf32> -> vector<64x8xf32>
    %120 = arith.addf %114, %119 : vector<64x8xf32>
    %c0_96 = arith.constant 0 : index
    %c8_97 = arith.constant 8 : index
    %c0_98 = arith.constant 0 : index
    %121 = vector.load %arg12[%c0_96, %c8_97, %c0_98] : memref<10x24x8xf32, #tpu.memory_space<vmem>>, vector<10x8x8xf32>
    %122 = arith.truncf %121 : vector<10x8x8xf32> to vector<10x8x8xbf16>
    %123 = vector.extract_strided_slice %122 {offsets = [0, 0, 0], sizes = [8, 8, 8], strides = [1, 1, 1]} : vector<10x8x8xbf16> to vector<8x8x8xbf16>
    %124 = vector.shape_cast %123 : vector<8x8x8xbf16> to vector<64x8xbf16>
    %c1_99 = arith.constant 1 : index
    %c0_100 = arith.constant 0 : index
    %c0_101 = arith.constant 0 : index
    %125 = vector.load %arg9[%c1_99, %c0_100, %c0_101] : memref<9x8x8xbf16, #tpu.memory_space<vmem>>, vector<1x8x8xbf16>
    %126 = vector.shape_cast %125 : vector<1x8x8xbf16> to vector<8x8xbf16>
    %cst_102 = arith.constant dense<0.000000e+00> : vector<64x8xf32>
    %127 = tpu.matmul %124, %126, %cst_102 {dimension_numbers = #tpu.dot_dimension_numbers<[1], [0], [0], [1], [0, 0, 1, 1], [], []>} : vector<64x8xbf16>, vector<8x8xbf16>, vector<64x8xf32> -> vector<64x8xf32>
    %128 = arith.addf %120, %127 : vector<64x8xf32>
    %129 = vector.extract_strided_slice %122 {offsets = [1, 0, 0], sizes = [8, 8, 8], strides = [1, 1, 1]} : vector<10x8x8xbf16> to vector<8x8x8xbf16>
    %130 = vector.shape_cast %129 : vector<8x8x8xbf16> to vector<64x8xbf16>
    %c4_103 = arith.constant 4 : index
    %c0_104 = arith.constant 0 : index
    %c0_105 = arith.constant 0 : index
    %131 = vector.load %arg9[%c4_103, %c0_104, %c0_105] : memref<9x8x8xbf16, #tpu.memory_space<vmem>>, vector<1x8x8xbf16>
    %132 = vector.shape_cast %131 : vector<1x8x8xbf16> to vector<8x8xbf16>
    %cst_106 = arith.constant dense<0.000000e+00> : vector<64x8xf32>
    %133 = tpu.matmul %130, %132, %cst_106 {dimension_numbers = #tpu.dot_dimension_numbers<[1], [0], [0], [1], [0, 0, 1, 1], [], []>} : vector<64x8xbf16>, vector<8x8xbf16>, vector<64x8xf32> -> vector<64x8xf32>
    %134 = arith.addf %128, %133 : vector<64x8xf32>
    %135 = vector.extract_strided_slice %122 {offsets = [2, 0, 0], sizes = [8, 8, 8], strides = [1, 1, 1]} : vector<10x8x8xbf16> to vector<8x8x8xbf16>
    %136 = vector.shape_cast %135 : vector<8x8x8xbf16> to vector<64x8xbf16>
    %c7_107 = arith.constant 7 : index
    %c0_108 = arith.constant 0 : index
    %c0_109 = arith.constant 0 : index
    %137 = vector.load %arg9[%c7_107, %c0_108, %c0_109] : memref<9x8x8xbf16, #tpu.memory_space<vmem>>, vector<1x8x8xbf16>
    %138 = vector.shape_cast %137 : vector<1x8x8xbf16> to vector<8x8xbf16>
    %cst_110 = arith.constant dense<0.000000e+00> : vector<64x8xf32>
    %139 = tpu.matmul %136, %138, %cst_110 {dimension_numbers = #tpu.dot_dimension_numbers<[1], [0], [0], [1], [0, 0, 1, 1], [], []>} : vector<64x8xbf16>, vector<8x8xbf16>, vector<64x8xf32> -> vector<64x8xf32>
    %140 = arith.addf %134, %139 : vector<64x8xf32>
    %c0_111 = arith.constant 0 : index
    %c9_112 = arith.constant 9 : index
    %c0_113 = arith.constant 0 : index
    %141 = vector.load %arg12[%c0_111, %c9_112, %c0_113] : memref<10x24x8xf32, #tpu.memory_space<vmem>>, vector<10x8x8xf32>
    %142 = arith.truncf %141 : vector<10x8x8xf32> to vector<10x8x8xbf16>
    %143 = vector.extract_strided_slice %142 {offsets = [0, 0, 0], sizes = [8, 8, 8], strides = [1, 1, 1]} : vector<10x8x8xbf16> to vector<8x8x8xbf16>
    %144 = vector.shape_cast %143 : vector<8x8x8xbf16> to vector<64x8xbf16>
    %c2_114 = arith.constant 2 : index
    %c0_115 = arith.constant 0 : index
    %c0_116 = arith.constant 0 : index
    %145 = vector.load %arg9[%c2_114, %c0_115, %c0_116] : memref<9x8x8xbf16, #tpu.memory_space<vmem>>, vector<1x8x8xbf16>
    %146 = vector.shape_cast %145 : vector<1x8x8xbf16> to vector<8x8xbf16>
    %cst_117 = arith.constant dense<0.000000e+00> : vector<64x8xf32>
    %147 = tpu.matmul %144, %146, %cst_117 {dimension_numbers = #tpu.dot_dimension_numbers<[1], [0], [0], [1], [0, 0, 1, 1], [], []>} : vector<64x8xbf16>, vector<8x8xbf16>, vector<64x8xf32> -> vector<64x8xf32>
    %148 = arith.addf %140, %147 : vector<64x8xf32>
    %149 = vector.extract_strided_slice %142 {offsets = [1, 0, 0], sizes = [8, 8, 8], strides = [1, 1, 1]} : vector<10x8x8xbf16> to vector<8x8x8xbf16>
    %150 = vector.shape_cast %149 : vector<8x8x8xbf16> to vector<64x8xbf16>
    %c5_118 = arith.constant 5 : index
    %c0_119 = arith.constant 0 : index
    %c0_120 = arith.constant 0 : index
    %151 = vector.load %arg9[%c5_118, %c0_119, %c0_120] : memref<9x8x8xbf16, #tpu.memory_space<vmem>>, vector<1x8x8xbf16>
    %152 = vector.shape_cast %151 : vector<1x8x8xbf16> to vector<8x8xbf16>
    %cst_121 = arith.constant dense<0.000000e+00> : vector<64x8xf32>
    %153 = tpu.matmul %150, %152, %cst_121 {dimension_numbers = #tpu.dot_dimension_numbers<[1], [0], [0], [1], [0, 0, 1, 1], [], []>} : vector<64x8xbf16>, vector<8x8xbf16>, vector<64x8xf32> -> vector<64x8xf32>
    %154 = arith.addf %148, %153 : vector<64x8xf32>
    %155 = vector.extract_strided_slice %142 {offsets = [2, 0, 0], sizes = [8, 8, 8], strides = [1, 1, 1]} : vector<10x8x8xbf16> to vector<8x8x8xbf16>
    %156 = vector.shape_cast %155 : vector<8x8x8xbf16> to vector<64x8xbf16>
    %c8_122 = arith.constant 8 : index
    %c0_123 = arith.constant 0 : index
    %c0_124 = arith.constant 0 : index
    %157 = vector.load %arg9[%c8_122, %c0_123, %c0_124] : memref<9x8x8xbf16, #tpu.memory_space<vmem>>, vector<1x8x8xbf16>
    %158 = vector.shape_cast %157 : vector<1x8x8xbf16> to vector<8x8xbf16>
    %cst_125 = arith.constant dense<0.000000e+00> : vector<64x8xf32>
    %159 = tpu.matmul %156, %158, %cst_125 {dimension_numbers = #tpu.dot_dimension_numbers<[1], [0], [0], [1], [0, 0, 1, 1], [], []>} : vector<64x8xbf16>, vector<8x8xbf16>, vector<64x8xf32> -> vector<64x8xf32>
    %160 = arith.addf %154, %159 : vector<64x8xf32>
    %161 = vector.shape_cast %160 : vector<64x8xf32> to vector<8x8x8xf32>
    %162 = arith.mulf %161, %1 : vector<8x8x8xf32>
    %c0_126 = arith.constant 0 : index
    %c0_127 = arith.constant 0 : index
    %c0_128 = arith.constant 0 : index
    %c0_129 = arith.constant 0 : index
    %163 = vector.load %arg11[%c0_126, %c0_127, %c0_128, %c0_129] : memref<1x8x8x8xf32, #tpu.memory_space<vmem>>, vector<1x8x8x8xf32>
    %164 = vector.shape_cast %163 : vector<1x8x8x8xf32> to vector<8x8x8xf32>
    %165 = vector.shape_cast %162 : vector<8x8x8xf32> to vector<1x8x8x8xf32>
    tpu.vector_store %arg11[%c0_126, %c0_127, %c0_128, %c0_129], %165 {strides = array<i32>} : memref<1x8x8x8xf32, #tpu.memory_space<vmem>>, vector<1x8x8x8xf32>,
    return
  }
  func.func @transform_0(%arg0: i32) -> (i32, i32, i32, i32) {
    %c0_i32 = arith.constant 0 : i32
    %c0_i32_0 = arith.constant 0 : i32
    %c0_i32_1 = arith.constant 0 : i32
    %c0_i32_2 = arith.constant 0 : i32
    return %arg0, %c0_i32, %c0_i32_0, %c0_i32_1 : i32, i32, i32, i32
  }
  func.func @transform_1(%arg0: i32) -> (i32, i32, i32, i32) {
    %c0_i32 = arith.constant 0 : i32
    %c0_i32_0 = arith.constant 0 : i32
    %c0_i32_1 = arith.constant 0 : i32
    %c0_i32_2 = arith.constant 0 : i32
    return %arg0, %c0_i32, %c0_i32_0, %c0_i32_1 : i32, i32, i32, i32
  }
  func.func @transform_2(%arg0: i32) -> (i32, i32, i32) {
    %c0_i32 = arith.constant 0 : i32
    %c0_i32_0 = arith.constant 0 : i32
    %c0_i32_1 = arith.constant 0 : i32
    %c0_i32_2 = arith.constant 0 : i32
    return %c0_i32, %c0_i32_0, %c0_i32_1 : i32, i32, i32
  }
  func.func @transform_3(%arg0: i32) -> (i32, i32, i32) {
    %c0_i32 = arith.constant 0 : i32
    %c0_i32_0 = arith.constant 0 : i32
    %c0_i32_1 = arith.constant 0 : i32
    %c0_i32_2 = arith.constant 0 : i32
    return %c0_i32, %c0_i32_0, %c0_i32_1 : i32, i32, i32
  }
  func.func @transform_4(%arg0: i32) -> (i32, i32, i32) {
    %c0_i32 = arith.constant 0 : i32
    %c0_i32_0 = arith.constant 0 : i32
    %c0_i32_1 = arith.constant 0 : i32
    %c0_i32_2 = arith.constant 0 : i32
    return %c0_i32, %c0_i32_0, %c0_i32_1 : i32, i32, i32
  }
  func.func @transform_5(%arg0: i32) -> (i32, i32) {
    %c0_i32 = arith.constant 0 : i32
    %c0_i32_0 = arith.constant 0 : i32
    %c0_i32_1 = arith.constant 0 : i32
    return %c0_i32, %c0_i32_0 : i32, i32
  }
  func.func @transform_6(%arg0: i32) -> (i32, i32, i32) {
    %c0_i32 = arith.constant 0 : i32
    %c0_i32_0 = arith.constant 0 : i32
    %c0_i32_1 = arith.constant 0 : i32
    %c0_i32_2 = arith.constant 0 : i32
    return %c0_i32, %c0_i32_0, %c0_i32_1 : i32, i32, i32
  }
  func.func @transform_7(%arg0: i32) -> (i32, i32, i32) {
    %c0_i32 = arith.constant 0 : i32
    %c0_i32_0 = arith.constant 0 : i32
    %c0_i32_1 = arith.constant 0 : i32
    %c0_i32_2 = arith.constant 0 : i32
    return %c0_i32, %c0_i32_0, %c0_i32_1 : i32, i32, i32
  }
  func.func @transform_8(%arg0: i32) -> (i32, i32, i32) {
    %c0_i32 = arith.constant 0 : i32
    %c0_i32_0 = arith.constant 0 : i32
    %c0_i32_1 = arith.constant 0 : i32
    %c0_i32_2 = arith.constant 0 : i32
    return %c0_i32, %c0_i32_0, %c0_i32_1 : i32, i32, i32
  }
  func.func @transform_9(%arg0: i32) -> (i32, i32) {
    %c0_i32 = arith.constant 0 : i32
    %c0_i32_0 = arith.constant 0 : i32
    %c0_i32_1 = arith.constant 0 : i32
    return %c0_i32, %c0_i32_0 : i32, i32
  }
  func.func @transform_10(%arg0: i32) -> (i32, i32, i32, i32) {
    %c0_i32 = arith.constant 0 : i32
    %c0_i32_0 = arith.constant 0 : i32
    %c0_i32_1 = arith.constant 0 : i32
    %c0_i32_2 = arith.constant 0 : i32
    return %arg0, %c0_i32, %c0_i32_0, %c0_i32_1 : i32, i32, i32, i32
  }
}

</mosaic_0001>

<bundles_post_ra>
// kernel: attention_block.2
= control target key start
LH: loop header
LB: loop body
LE: loop exit
PB: predicated region body
PF: predicated region fallthrough
CT: control target
= control target key end

     0   :  { %s3714_s18 = smov 0   ;;  %s4448_s0 = inlined_call_operand.vmem [shape: f32[2,16,16,4], index: 0, kind: input, shape index: {}]   ;;  %s4449_s1 = inlined_call_operand.vmem [shape: f32[1,1,4], index: 1, kind: input, shape index: {}]   ;;  %s4450_s2 = inlined_call_operand.vmem [shape: f32[1,1,4], index: 2, kind: input, shape index: {}]   ;;  %s4451_s3 = inlined_call_operand.vmem [shape: bf16[9,4,8], index: 3, kind: input, shape index: {}]   ;;  %s4452_s4 = inlined_call_operand.vmem [shape: f32[1,8], index: 4, kind: input, shape index: {}]   ;;  %s4453_s5 = inlined_call_operand.vmem [shape: bf16[2,8,16,8], index: 5, kind: output, shape index: {}]  }
   0x1 LB: > { %s2707_s19 = sadd.s32 4294967295, %s3681_s18   ;;  %p2711_p0 = scmp.ge.s32.totalorder %s3681_s18, 1  ;;  %s3681_s18 = sphi %s3714_s18, %s15_s18  }
   0x2   : > { %p187_p1 = scmp.lt.s32.totalorder %s3681_s18, 3 }
   0x4   : > { %p188_p2 = pnand %p2711_p0, %p187_p1 }
   0x5   : > { %v503_v0 = vld [vmem:[%s4451_s3] sm:$0x3] (!%p188_p2)  ;;  %vm552_vm0 = vcmask (!%p188_p2), 1041408   ;;  %v3728_v1 = vld [vmem:[%s4451_s3 + $0x8] sm:$0x3] (!%p188_p2)  ;;  %vm368_vm1 = vcmask (!%p188_p2), 31744  }
   0x6   : > { %191 = sbr.rel (%p188_p2) target bundleno = 542 (0x21e), region = 40  ;;  %3656 = vmatprep.subr.msk.bf16.mxu1 (!%p188_p2), %vm552_vm0, %v503_v0  ;;  %v554_v2 = vsel (!%p188_p2), %vm552_vm0, %v503_v0, 0  ;;  %3660 = vmatprep.subr.msk.bf16.mxu0 (!%p188_p2), %vm552_vm0, %v3728_v1  ;;  %v3736_v3 = vsel (!%p188_p2), %vm552_vm0, %v3728_v1, 0  ;;  %vm405_vm2 = vcmask (!%p188_p2), 24576   ;;  %v3741_v4 = vld [vmem:[%s4451_s3 + $0x6] sm:$0x3] (!%p188_p2) }
   0x7   : > { %3061 = vmatpush3.bf16.msra.mxu1 (!%p188_p2), %v554_v2  ;;  %3197 = vmatpush3.bf16.msra.mxu0 (!%p188_p2), %v3736_v3  ;;  %v3683_v5 = vmov (!%p188_p2), 0.0   ;;  %p215_p3 = scmp.lt.s32.totalorder (!%p188_p2), %s2707_s19, 1  ;;  %v2803_v6 = vld [vmem:[%s4451_s3 + $0xe] sm:$0x3] (!%p188_p2)  ;;  %v3800_v7 = vld [vmem:[%s4449_s1] ss:$0 sm:$0xff] (!%p188_p2) }
   0x8   : > { %369 = vst.msk [vmem:[#allocation2 + $0x8] sm:$0xff] (!%p188_p2), %vm368_vm1, %v3683_v5  ;;  %370 = vst.msk [vmem:[#allocation2 + $0x10] sm:$0xff] (!%p188_p2), %vm368_vm1, %v3683_v5  ;;  %3657 = vmatprep.subr.msk.bf16.mxu1 (!%p188_p2), %vm552_vm0, %v3741_v4  ;;  %3662 = vmatprep.subr.msk.bf16.mxu0 (!%p188_p2), %vm552_vm0, %v2803_v6  ;;  %v3810_v8 = vld [vmem:[%s4450_s2] ss:$0 sm:$0xff] (!%p188_p2)  ;;  %v3821_v19 = vsel (!%p188_p2), %vm552_vm0, %v3741_v4, 0  ;;  %v3825_v21 = vsel (!%p188_p2), %vm552_vm0, %v2803_v6, 0 }
   0x9   : > { %406 = vst.msk [vmem:[#allocation2 + $0x7] sm:$0x1] (!%p188_p2), %vm405_vm2, %v3683_v5  ;;  %407 = vst.msk [vmem:[#allocation2 + $0x27] sm:$0x1] (!%p188_p2), %vm405_vm2, %v3683_v5  ;;  %vm2635_vm3 = vcmask (!%p188_p2), 60416  }
   0xa   : > { %403 = vst.msk [vmem:[#allocation2 + $0x228] sm:$0xff] (!%p188_p2), %vm368_vm1, %v3683_v5  ;;  %404 = vst.msk [vmem:[#allocation2 + $0x230] sm:$0xff] (!%p188_p2), %vm368_vm1, %v3683_v5 }
   0xb   : > { %408 = vst.msk [vmem:[#allocation2 + $0x47] sm:$0x1] (!%p188_p2), %vm405_vm2, %v3683_v5  ;;  %409 = vst.msk [vmem:[#allocation2 + $0x67] sm:$0x1] (!%p188_p2), %vm405_vm2, %v3683_v5 }
   0xc   : > { %410 = vst.msk [vmem:[#allocation2 + $0x87] sm:$0x1] (!%p188_p2), %vm405_vm2, %v3683_v5  ;;  %411 = vst.msk [vmem:[#allocation2 + $0xa7] sm:$0x1] (!%p188_p2), %vm405_vm2, %v3683_v5 }
   0xd   : > { %412 = vst.msk [vmem:[#allocation2 + $0xc7] sm:$0x1] %vm405_vm2, %v3683_v5  ;;  %413 = vst.msk [vmem:[#allocation2 + $0xe7] sm:$0x1] %vm405_vm2, %v3683_v5  ;;  %s4455_s19 = smov (!%p215_p3, %s2707_s19), 1 }
   0xe   : > { %414 = vst.msk [vmem:[#allocation2 + $0x107] sm:$0x1] %vm405_vm2, %v3683_v5  ;;  %415 = vst.msk [vmem:[#allocation2 + $0x127] sm:$0x1] %vm405_vm2, %v3683_v5  ;;  %s2889_s28 = sshll.u32 %s4455_s19, 8  ;;  %s2890_s25 = sshll.u32 %s4455_s19, 6 }
   0xf   : > { %416 = vst.msk [vmem:[#allocation2 + $0x147] sm:$0x1] %vm405_vm2, %v3683_v5  ;;  %417 = vst.msk [vmem:[#allocation2 + $0x167] sm:$0x1] %vm405_vm2, %v3683_v5  ;;  %s3805_s8 = scalar_lea.vmem %s4448_s0, %s2889_s28  ;;  %v450_v13 = vld [vmem:[#allocation2 + $0xf] sm:$0xff]  ;;  %s4382_s28 = scalar_lea.vmem %s4453_s5, %s2890_s25 }
  0x10   : > { %418 = vst.msk [vmem:[#allocation2 + $0x187] sm:$0x1] %vm405_vm2, %v3683_v5  ;;  %419 = vst.msk [vmem:[#allocation2 + $0x1a7] sm:$0x1] %vm405_vm2, %v3683_v5  ;;  %v226_v9 = vld [vmem:[%s3805_s8] sm:$0xff]  ;;  %v227_v10 = vld [vmem:[%s3805_s8 + $0x8] sm:$0xff] }
  0x11   : > { %420 = vst.msk [vmem:[#allocation2 + $0x1c7] sm:$0x1] %vm405_vm2, %v3683_v5  ;;  %421 = vst.msk [vmem:[#allocation2 + $0x1e7] sm:$0x1] %vm405_vm2, %v3683_v5  ;;  %v228_v11 = vld [vmem:[%s3805_s8 + $0x10] sm:$0xff]  ;;  %v449_v12 = vld [vmem:[#allocation2 + $0x7] sm:$0xff]  ;;  %v265_v14 = vmul.f32 %v3800_v7, %v226_v9  ;;  %v266_v15 = vmul.f32 %v3800_v7, %v227_v10 }
  0x12   : > { %422 = vst.msk [vmem:[#allocation2 + $0x207] sm:$0x1] %vm405_vm2, %v3683_v5  ;;  %423 = vst.msk [vmem:[#allocation2 + $0x227] sm:$0x1] %vm405_vm2, %v3683_v5  ;;  %v229_v16 = vld [vmem:[%s3805_s8 + $0x18] sm:$0xff]  ;;  %v267_v17 = vmul.f32 %v3800_v7, %v228_v11  ;;  %v485_v18 = vpack.c.bf16 %v450_v13, %v449_v12  ;;  %v230_v22 = vld [vmem:[%s3805_s8 + $0x20] sm:$0xff] }
  0x13   : > { %424 = vst.msk [vmem:[#allocation2 + $0x18] sm:$0x1] %vm405_vm2, %v3683_v5  ;;  %425 = vst.msk [vmem:[#allocation2 + $0x38] sm:$0x1] %vm405_vm2, %v3683_v5  ;;  %v268_v20 = vmul.f32 %v3800_v7, %v229_v16  ;;  %v231_v23 = vld [vmem:[%s3805_s8 + $0x28] sm:$0xff]  ;;  %v232_v24 = vld [vmem:[%s3805_s8 + $0x30] sm:$0xff]  ;;  %v304_v25 = vadd.f32 %v3810_v8, %v265_v14  ;;  %v305_v26 = vadd.f32 %v3810_v8, %v266_v15 }
  0x14   : > { %426 = vst.msk [vmem:[#allocation2 + $0x58] sm:$0x1] %vm405_vm2, %v3683_v5  ;;  %427 = vst.msk [vmem:[#allocation2 + $0x78] sm:$0x1] %vm405_vm2, %v3683_v5  ;;  %v306_v27 = vadd.f32 %v3810_v8, %v267_v17  ;;  %v269_v28 = vmul.f32 %v3800_v7, %v230_v22  ;;  %v233_v29 = vld [vmem:[%s3805_s8 + $0x38] sm:$0xff]  ;;  %3062 = vmatprep.mubr.msk.bf16.mxu1 %vm368_vm1, %v485_v18  ;;  %v270_v31 = vmul.f32 %v3800_v7, %v231_v23  ;;  %v234_v34 = vld [vmem:[%s3805_s8 + $0x40] sm:$0xff] }
  0x15   : > { %428 = vst.msk [vmem:[#allocation2 + $0x98] sm:$0x1] %vm405_vm2, %v3683_v5  ;;  %429 = vst.msk [vmem:[#allocation2 + $0xb8] sm:$0x1] %vm405_vm2, %v3683_v5  ;;  %v307_v30 = vadd.f32 %v3810_v8, %v268_v20  ;;  %v271_v32 = vmul.f32 %v3800_v7, %v232_v24  ;;  %v272_v33 = vmul.f32 %v3800_v7, %v233_v29  ;;  %v235_v35 = vld [vmem:[%s3805_s8 + $0x48] sm:$0xff]  ;;  %v236_v36 = vld [vmem:[%s3805_s8 + $0x50] sm:$0xff] }
  0x16   : > { %430 = vst.msk [vmem:[#allocation2 + $0xd8] sm:$0x1] %vm405_vm2, %v3683_v5  ;;  %431 = vst.msk [vmem:[#allocation2 + $0xf8] sm:$0x1] %vm405_vm2, %v3683_v5  ;;  %v336_v37 = vmax.f32 %v304_v25, 0.0  ;;  %v337_v38 = vmax.f32 %v305_v26, 0.0  ;;  %v308_v40 = vadd.f32 %v3810_v8, %v269_v28  ;;  %v309_v43 = vadd.f32 %v3810_v8, %v270_v31 }
  0x17   : > { %432 = vst.msk [vmem:[#allocation2 + $0x118] sm:$0x1] %vm405_vm2, %v3683_v5  ;;  %433 = vst.msk [vmem:[#allocation2 + $0x138] sm:$0x1] %vm405_vm2, %v3683_v5  ;;  %v338_v39 = vmax.f32 %v306_v27, 0.0  ;;  %v237_v41 = vld [vmem:[%s3805_s8 + $0x58] sm:$0xff]  ;;  %v310_v44 = vadd.f32 %v3810_v8, %v271_v32  ;;  %v311_v45 = vadd.f32 %v3810_v8, %v272_v33  ;;  %v273_v48 = vmul.f32 %v3800_v7, %v234_v34 }
  0x18   : > { %434 = vst.msk [vmem:[#allocation2 + $0x158] sm:$0x1] %vm405_vm2, %v3683_v5  ;;  %435 = vst.msk [vmem:[#allocation2 + $0x178] sm:$0x1] %vm405_vm2, %v3683_v5  ;;  %v339_v42 = vmax.f32 %v307_v30, 0.0  ;;  %v238_v46 = vld [vmem:[%s3805_s8 + $0x60] sm:$0xff]  ;;  %v274_v49 = vmul.f32 %v3800_v7, %v235_v35  ;;  %v275_v50 = vmul.f32 %v3800_v7, %v236_v36  ;;  %v276_v57 = vmul.f32 %v3800_v7, %v237_v41 }
  0x19   : > { %436 = vst.msk [vmem:[#allocation2 + $0x198] sm:$0x1] %vm405_vm2, %v3683_v5  ;;  %437 = vst.msk [vmem:[#allocation2 + $0x1b8] sm:$0x1] %vm405_vm2, %v3683_v5  ;;  %v340_v47 = vmax.f32 %v308_v40, 0.0  ;;  %v239_v51 = vld [vmem:[%s3805_s8 + $0x68] sm:$0xff]  ;;  %v312_v58 = vadd.f32 %v3810_v8, %v273_v48  ;;  %v277_v61 = vmul.f32 %v3800_v7, %v238_v46 }
  0x1a   : > { %438 = vst.msk [vmem:[#allocation2 + $0x1d8] sm:$0x1] %vm405_vm2, %v3683_v5  ;;  %439 = vst.msk [vmem:[#allocation2 + $0x1f8] sm:$0x1] %vm405_vm2, %v3683_v5  ;;  %v240_v52 = vld [vmem:[%s3805_s8 + $0x70] sm:$0xff]  ;;  %v241_v53 = vld [vmem:[%s3805_s8 + $0x78] sm:$0xff]  ;;  %v313_v59 = vadd.f32 %v3810_v8, %v274_v49  ;;  %v314_v60 = vadd.f32 %v3810_v8, %v275_v50  ;;  %v315_v62 = vadd.f32 %v3810_v8, %v276_v57 }
  0x1b   : > { %440 = vst.msk [vmem:[#allocation2 + $0x218] sm:$0x1] %vm405_vm2, %v3683_v5  ;;  %441 = vst.msk [vmem:[#allocation2 + $0x238] sm:$0x1] %vm405_vm2, %v3683_v5  ;;  %v341_v54 = vmax.f32 %v309_v43, 0.0  ;;  %v342_v55 = vmax.f32 %v310_v44, 0.0  ;;  %v278_v63 = vmul.f32 %v3800_v7, %v239_v51  ;;  %v279_v0 = vmul.f32 %v3800_v7, %v240_v52 }
  0x1c   : > { %371 = vst.msk [vmem:[#allocation2 + $0x28] sm:$0xff] %vm368_vm1, %v336_v37  ;;  %372 = vst.msk [vmem:[#allocation2 + $0x30] sm:$0xff] %vm368_vm1, %v337_v38  ;;  %v343_v56 = vmax.f32 %v311_v45, 0.0  ;;  %v280_v2 = vmul.f32 %v3800_v7, %v241_v53  ;;  %v242_v4 = vld [vmem:[%s3805_s8 + $0x80] sm:$0xff]  ;;  %v243_v5 = vld [vmem:[%s3805_s8 + $0x88] sm:$0xff]  ;;  %v344_v9 = vmax.f32 %v312_v58, 0.0  ;;  %v316_v12 = vadd.f32 %v3810_v8, %v277_v61 }
  0x1d   : > { %373 = vst.msk [vmem:[#allocation2 + $0x48] sm:$0xff] %vm368_vm1, %v338_v39  ;;  %374 = vst.msk [vmem:[#allocation2 + $0x50] sm:$0xff] %vm368_vm1, %v339_v42  ;;  %v244_v6 = vld [vmem:[%s3805_s8 + $0x90] sm:$0xff]  ;;  %v345_v10 = vmax.f32 %v313_v59, 0.0  ;;  %v346_v11 = vmax.f32 %v314_v60, 0.0  ;;  %v245_v13 = vld [vmem:[%s3805_s8 + $0x98] sm:$0xff]  ;;  %v317_v15 = vadd.f32 %v3810_v8, %v278_v63  ;;  %v318_v16 = vadd.f32 %v3810_v8, %v279_v0 }
  0x1e   : > { %375 = vst.msk [vmem:[#allocation2 + $0x68] sm:$0xff] %vm368_vm1, %v340_v47  ;;  %376 = vst.msk [vmem:[#allocation2 + $0x70] sm:$0xff] %vm368_vm1, %v341_v54  ;;  %v347_v14 = vmax.f32 %v315_v62, 0.0  ;;  %v319_v17 = vadd.f32 %v3810_v8, %v280_v2  ;;  %v348_v18 = vmax.f32 %v316_v12, 0.0  ;;  %v281_v20 = vmul.f32 %v3800_v7, %v242_v4  ;;  %v246_v24 = vld [vmem:[%s3805_s8 + $0xa0] sm:$0xff]  ;;  %v247_v25 = vld [vmem:[%s3805_s8 + $0xa8] sm:$0xff] }
  0x1f   : > { %377 = vst.msk [vmem:[#allocation2 + $0x88] sm:$0xff] %vm368_vm1, %v342_v55  ;;  %378 = vst.msk [vmem:[#allocation2 + $0x90] sm:$0xff] %vm368_vm1, %v343_v56  ;;  %v282_v22 = vmul.f32 %v3800_v7, %v243_v5  ;;  %v283_v23 = vmul.f32 %v3800_v7, %v244_v6  ;;  %v349_v29 = vmax.f32 %v317_v15, 0.0  ;;  %v350_v30 = vmax.f32 %v318_v16, 0.0  ;;  %v3906_v44 = vld [vmem:[%s4451_s3 + $0x4] sm:$0x3] }
  0x20   : > { %379 = vst.msk [vmem:[#allocation2 + $0xa8] sm:$0xff] %vm368_vm1, %v344_v9  ;;  %380 = vst.msk [vmem:[#allocation2 + $0xb0] sm:$0xff] %vm368_vm1, %v345_v10  ;;  %v351_v31 = vmax.f32 %v319_v17, 0.0  ;;  %v284_v32 = vmul.f32 %v3800_v7, %v245_v13  ;;  %v320_v37 = vadd.f32 %v3810_v8, %v281_v20  ;;  %v285_v46 = vmul.f32 %v3800_v7, %v246_v24  ;;  %v248_v47 = vld [vmem:[%s3805_s8 + $0xb0] sm:$0xff]  ;;  %v3914_v48 = vld [vmem:[%s4451_s3 + $0xc] sm:$0x3] }
  0x21   : > { %381 = vst.msk [vmem:[#allocation2 + $0xc8] sm:$0xff] %vm368_vm1, %v346_v11  ;;  %382 = vst.msk [vmem:[#allocation2 + $0xd0] sm:$0xff] %vm368_vm1, %v347_v14  ;;  %v321_v38 = vadd.f32 %v3810_v8, %v282_v22  ;;  %v322_v39 = vadd.f32 %v3810_v8, %v283_v23  ;;  %v249_v55 = vld [vmem:[%s3805_s8 + $0xb8] sm:$0xff]  ;;  %v286_v60 = vmul.f32 %v3800_v7, %v247_v25  ;;  %v250_v61 = vld [vmem:[%s3805_s8 + $0xc0] sm:$0xff] }
  0x22   : > { %383 = vst.msk [vmem:[#allocation2 + $0xe8] sm:$0xff] %vm368_vm1, %v348_v18  ;;  %384 = vst.msk [vmem:[#allocation2 + $0xf0] sm:$0xff] %vm368_vm1, %v349_v29  ;;  %v323_v45 = vadd.f32 %v3810_v8, %v284_v32  ;;  %v352_v52 = vmax.f32 %v320_v37, 0.0  ;;  %v324_v63 = vadd.f32 %v3810_v8, %v285_v46  ;;  %v287_v0 = vmul.f32 %v3800_v7, %v248_v47  ;;  %v251_v9 = vld [vmem:[%s3805_s8 + $0xc8] sm:$0xff]  ;;  %v252_v15 = vld [vmem:[%s3805_s8 + $0xd0] sm:$0xff] }
  0x23   : > { %v451_v26 = vld [vmem:[#allocation2 + $0x27] sm:$0xff]  ;;  %v452_v27 = vld [vmem:[#allocation2 + $0x2f] sm:$0xff]  ;;  %385 = vst.msk [vmem:[#allocation2 + $0x108] sm:$0xff] %vm368_vm1, %v350_v30  ;;  %386 = vst.msk [vmem:[#allocation2 + $0x110] sm:$0xff] %vm368_vm1, %v351_v31  ;;  %v353_v53 = vmax.f32 %v321_v38, 0.0  ;;  %v354_v54 = vmax.f32 %v322_v39, 0.0  ;;  %v325_v5 = vadd.f32 %v3810_v8, %v286_v60  ;;  %v288_v6 = vmul.f32 %v3800_v7, %v249_v55 }
  0x24   : > { %v1153_v28 = vld [vmem:[#allocation2 + $0x28] sm:$0xff]  ;;  %v3890_v33 = vpack.c.bf16 %v452_v27, %v451_v26  ;;  %v1154_v34 = vld [vmem:[#allocation2 + $0x30] sm:$0xff]  ;;  %v355_v59 = vmax.f32 %v323_v45, 0.0  ;;  %387 = vst.msk [vmem:[#allocation2 + $0x128] sm:$0xff] %vm368_vm1, %v352_v52  ;;  %v326_v13 = vadd.f32 %v3810_v8, %v287_v0  ;;  %v289_v14 = vmul.f32 %v3800_v7, %v250_v61  ;;  %v253_v20 = vld [vmem:[%s3805_s8 + $0xd8] sm:$0xff] }
  0x25   : > { %v1155_v35 = vld [vmem:[#allocation2 + $0x48] sm:$0xff]  ;;  %v1156_v36 = vld [vmem:[#allocation2 + $0x50] sm:$0xff]  ;;  %v3896_v40 = vpack.c.bf16 %v1154_v34, %v1153_v28  ;;  %388 = vst.msk [vmem:[#allocation2 + $0x130] sm:$0xff] %vm368_vm1, %v353_v53  ;;  %389 = vst.msk [vmem:[#allocation2 + $0x148] sm:$0xff] %vm368_vm1, %v354_v54  ;;  %v357_v17 = vmax.f32 %v325_v5, 0.0  ;;  %v327_v18 = vadd.f32 %v3810_v8, %v288_v6  ;;  %v290_v24 = vmul.f32 %v3800_v7, %v251_v9 }
  0x26   : > { %v3898_v41 = vpack.c.bf16 %v1156_v36, %v1155_v35  ;;  %v453_v42 = vld [vmem:[#allocation2 + $0x47] sm:$0xff]  ;;  %v454_v43 = vld [vmem:[#allocation2 + $0x4f] sm:$0xff]  ;;  %3063 = vmatmul.mubr.msk.bf16.vlgmr.msra.gmra.mrb[0].mxu1 %vm368_vm1, %v3890_v33  ;;  %390 = vst.msk [vmem:[#allocation2 + $0x150] sm:$0xff] %vm368_vm1, %v355_v59  ;;  %v358_v23 = vmax.f32 %v326_v13, 0.0  ;;  %v328_v25 = vadd.f32 %v3810_v8, %v289_v14  ;;  %v291_v30 = vmul.f32 %v3800_v7, %v252_v15 }
  0x27   : > { %v3918_v49 = vpack.c.bf16 %v454_v43, %v453_v42  ;;  %v1157_v50 = vld [vmem:[#allocation2 + $0x68] sm:$0xff]  ;;  %v1158_v51 = vld [vmem:[#allocation2 + $0x70] sm:$0xff]  ;;  %3095 = vmatpush3.bf16.msra.mxu1 %v3821_v19  ;;  %3198 = vmatprep.mubr.msk.bf16.mxu0 %vm368_vm1, %v3896_v40  ;;  %v254_v26 = vld [vmem:[%s3805_s8 + $0xe0] sm:$0xff]  ;;  %392 = vst.msk [vmem:[#allocation2 + $0x170] sm:$0xff] %vm368_vm1, %v357_v17  ;;  %v359_v29 = vmax.f32 %v327_v18, 0.0  ;;  %v329_v32 = vadd.f32 %v3810_v8, %v290_v24 }
  0x28   : > { %v455_v56 = vld [vmem:[#allocation2 + $0x67] sm:$0xff]  ;;  %v456_v57 = vld [vmem:[#allocation2 + $0x6f] sm:$0xff]  ;;  %v3924_v58 = vpack.c.bf16 %v1158_v51, %v1157_v50  ;;  %3199 = vmatmul.mubr.msk.bf16.vlgmr.msra.gmra.mrb[0].mxu0 %vm368_vm1, %v3898_v41  ;;  %3658 = vmatprep.subr.msk.bf16.mxu1 %vm552_vm0, %v3914_v48  ;;  %393 = vst.msk [vmem:[#allocation2 + $0x188] sm:$0xff] %vm368_vm1, %v358_v23  ;;  %v360_v34 = vmax.f32 %v328_v25, 0.0  ;;  %v292_v35 = vmul.f32 %v3800_v7, %v253_v20  ;;  %v257_v43 = vld [vmem:[%s3805_s8 + $0xf8] sm:$0xff] }
  0x29   : > { %3066 = vmatprep.mubr.msk.bf16.mxu1 %vm368_vm1, %v3918_v49  ;;  %v457_v62 = vld [vmem:[#allocation2 + $0x87] sm:$0xff]  ;;  %v458_v19 = vld [vmem:[#allocation2 + $0x8f] sm:$0xff]  ;;  %3231 = vmatpush3.bf16.msra.mxu0 %v3825_v21  ;;  %v3944_v10 = vpack.c.bf16 %v456_v57, %v455_v56  ;;  %v356_v21 = vmax.f32 %v324_v63, 0.0  ;;  %394 = vst.msk [vmem:[#allocation2 + $0x190] sm:$0xff] %vm368_vm1, %v359_v29  ;;  %v330_v38 = vadd.f32 %v3810_v8, %v291_v30  ;;  %v361_v47 = vmax.f32 %v329_v32, 0.0 }
  0x2a   : > { %3202 = vmatprep.mubr.msk.bf16.mxu0 %vm368_vm1, %v3924_v58  ;;  %v1159_v2 = vld [vmem:[#allocation2 + $0x88] sm:$0xff]  ;;  %v1160_v4 = vld [vmem:[#allocation2 + $0x90] sm:$0xff]  ;;  %3663 = vmatprep.subr.msk.bf16.mxu0 %vm552_vm0, %v3906_v44  ;;  %v3953_v16 = vpack.c.bf16 %v458_v19, %v457_v62  ;;  %v293_v39 = vmul.f32 %v3800_v7, %v254_v26  ;;  %395 = vst.msk [vmem:[#allocation2 + $0x1a8] sm:$0xff] %vm368_vm1, %v360_v34  ;;  %v1958_v29 = vsel %vm552_vm0, %v3906_v44, 0 }
  0x2b   : > { %v1161_v11 = vld [vmem:[#allocation2 + $0xa8] sm:$0xff]  ;;  %v1162_v12 = vld [vmem:[#allocation2 + $0xb0] sm:$0xff]  ;;  %v3957_v22 = vpack.c.bf16 %v1160_v4, %v1159_v2  ;;  %391 = vst.msk [vmem:[#allocation2 + $0x168] sm:$0xff] %vm368_vm1, %v356_v21  ;;  %v331_v50 = vadd.f32 %v3810_v8, %v292_v35  ;;  %v362_v54 = vmax.f32 %v330_v38, 0.0  ;;  %396 = vst.msk [vmem:[#allocation2 + $0x1b0] sm:$0xff] %vm368_vm1, %v361_v47  ;;  %v296_v62 = vmul.f32 %v3800_v7, %v257_v43 }
  0x2c   : > { %v255_v27 = vld [vmem:[%s3805_s8 + $0xe8] sm:$0xff]  ;;  %v3964_v28 = vpack.c.bf16 %v1162_v12, %v1161_v11  ;;  %v256_v31 = vld [vmem:[%s3805_s8 + $0xf0] sm:$0xff]  ;;  %v332_v55 = vadd.f32 %v3810_v8, %v293_v39 }
  0x2d   : > { %v459_v36 = vld [vmem:[#allocation2 + $0xa7] sm:$0xff]  ;;  %v460_v37 = vld [vmem:[#allocation2 + $0xaf] sm:$0xff]  ;;  %v294_v42 = vmul.f32 %v3800_v7, %v255_v27  ;;  %v295_v51 = vmul.f32 %v3800_v7, %v256_v31  ;;  %v363_v61 = vmax.f32 %v331_v50, 0.0  ;;  %397 = vst.msk [vmem:[#allocation2 + $0x1c8] sm:$0xff] %vm368_vm1, %v362_v54  ;;  %v335_v5 = vadd.f32 %v3810_v8, %v296_v62 }
  0x2e   : > { %3067 = vmatmul.mubr.msk.bf16.gmra.mrb[4].mxu1 %vm368_vm1, %v3944_v10  ;;  %v461_v45 = vld [vmem:[#allocation2 + $0xc7] sm:$0xff]  ;;  %v462_v46 = vld [vmem:[#allocation2 + $0xcf] sm:$0xff]  ;;  %v3990_v57 = vpack.c.bf16 %v460_v37, %v459_v36  ;;  %v364_v63 = vmax.f32 %v332_v55, 0.0 }
  0x2f   : > { %3070 = vmatprep.mubr.msk.bf16.mxu1 %vm368_vm1, %v3953_v16  ;;  %v1163_v52 = vld [vmem:[#allocation2 + $0xc8] sm:$0xff]  ;;  %v1164_v53 = vld [vmem:[#allocation2 + $0xd0] sm:$0xff]  ;;  %v333_v56 = vadd.f32 %v3810_v8, %v294_v42  ;;  %v3994_v19 = vpack.c.bf16 %v462_v46, %v461_v45  ;;  %v334_v2 = vadd.f32 %v3810_v8, %v295_v51  ;;  %398 = vst.msk [vmem:[#allocation2 + $0x1d0] sm:$0xff] %vm368_vm1, %v363_v61  ;;  %v367_v9 = vmax.f32 %v335_v5, 0.0 }
  0x30   : > { %3203 = vmatmul.mubr.msk.bf16.gmra.mrb[4].mxu0 %vm368_vm1, %v3957_v22  ;;  %v1165_v59 = vld [vmem:[#allocation2 + $0xe8] sm:$0xff]  ;;  %v1166_v60 = vld [vmem:[#allocation2 + $0xf0] sm:$0xff]  ;;  %v3998_v4 = vpack.c.bf16 %v1164_v53, %v1163_v52  ;;  %399 = vst.msk [vmem:[#allocation2 + $0x1e8] sm:$0xff] %vm368_vm1, %v364_v63  ;;  %v956_v63 = vsel %vm552_vm0, %v3914_v48, 0 }
  0x31   : > { %3206 = vmatprep.mubr.msk.bf16.mxu0 %vm368_vm1, %v3964_v28  ;;  %v365_v0 = vmax.f32 %v333_v56, 0.0  ;;  %v4002_v6 = vpack.c.bf16 %v1166_v60, %v1165_v59  ;;  %v366_v7 = vmax.f32 %v334_v2, 0.0  ;;  %v463_v11 = vld [vmem:[#allocation2 + $0xe7] sm:$0xff]  ;;  %v464_v12 = vld [vmem:[#allocation2 + $0xef] sm:$0xff]  ;;  %402 = vst.msk [vmem:[#allocation2 + $0x210] sm:$0xff] %vm368_vm1, %v367_v9 }
  0x32   : > { %v465_v8 = vld [vmem:[#allocation2 + $0x107] sm:$0xff]  ;;  %v466_v21 = vld [vmem:[#allocation2 + $0x10f] sm:$0xff]  ;;  %v4016_v15 = vpack.c.bf16 %v464_v12, %v463_v11 }
  0x33   : > { %400 = vst.msk [vmem:[#allocation2 + $0x1f0] sm:$0xff] %vm368_vm1, %v365_v0  ;;  %401 = vst.msk [vmem:[#allocation2 + $0x208] sm:$0xff] %vm368_vm1, %v366_v7  ;;  %v1167_v13 = vld [vmem:[#allocation2 + $0x108] sm:$0xff]  ;;  %v1168_v14 = vld [vmem:[#allocation2 + $0x110] sm:$0xff]  ;;  %v4018_v17 = vpack.c.bf16 %v466_v21, %v465_v8 }
  0x34   : > { %v4020_v18 = vpack.c.bf16 %v1168_v14, %v1167_v13  ;;  %v467_v20 = vld [vmem:[#allocation2 + $0x127] sm:$0xff]  ;;  %v468_v23 = vld [vmem:[#allocation2 + $0x12f] sm:$0xff] }
  0x35   : > { %v469_v24 = vld [vmem:[#allocation2 + $0x147] sm:$0xff]  ;;  %v470_v25 = vld [vmem:[#allocation2 + $0x14f] sm:$0xff]  ;;  %v4030_v26 = vpack.c.bf16 %v468_v23, %v467_v20 }
  0x36   : > { %3071 = vmatmul.mubr.msk.bf16.gmra.mrb[8].mxu1 %vm368_vm1, %v3990_v57  ;;  %v4032_v27 = vpack.c.bf16 %v470_v25, %v469_v24  ;;  %v471_v30 = vld [vmem:[#allocation2 + $0x167] sm:$0xff]  ;;  %v472_v31 = vld [vmem:[#allocation2 + $0x16f] sm:$0xff] }
  0x37   : > { %3074 = vmatprep.mubr.msk.bf16.mxu1 %vm368_vm1, %v3994_v19  ;;  %v4043_v32 = vld [vmem:[%s4451_s3 + $0xa] sm:$0x3]  ;;  %v474_v35 = vld [vmem:[#allocation2 + $0x18f] sm:$0xff]  ;;  %v4049_v44 = vpack.c.bf16 %v472_v31, %v471_v30 }
  0x38   : > { %3207 = vmatmul.mubr.msk.bf16.gmra.mrb[8].mxu0 %vm368_vm1, %v3998_v4  ;;  %v473_v34 = vld [vmem:[#allocation2 + $0x187] sm:$0xff]  ;;  %v476_v38 = vld [vmem:[#allocation2 + $0x1af] sm:$0xff] }
  0x39   : > { %3210 = vmatprep.mubr.msk.bf16.mxu0 %vm368_vm1, %v4002_v6  ;;  %v4053_v36 = vpack.c.bf16 %v474_v35, %v473_v34  ;;  %v475_v37 = vld [vmem:[#allocation2 + $0x1a7] sm:$0xff]  ;;  %v478_v42 = vld [vmem:[#allocation2 + $0x1cf] sm:$0xff] }
  0x3a   : > { %v477_v39 = vld [vmem:[#allocation2 + $0x1c7] sm:$0xff]  ;;  %v4063_v43 = vpack.c.bf16 %v476_v38, %v475_v37  ;;  %v480_v47 = vld [vmem:[#allocation2 + $0x1ef] sm:$0xff] }
  0x3b   : > { %v4065_v45 = vpack.c.bf16 %v478_v42, %v477_v39  ;;  %v479_v46 = vld [vmem:[#allocation2 + $0x1e7] sm:$0xff]  ;;  %v1170_v51 = vld [vmem:[#allocation2 + $0x130] sm:$0xff] }
  0x3c   : > { %v1169_v50 = vld [vmem:[#allocation2 + $0x128] sm:$0xff]  ;;  %v4075_v52 = vpack.c.bf16 %v480_v47, %v479_v46  ;;  %v1172_v54 = vld [vmem:[#allocation2 + $0x150] sm:$0xff]  ;;  %v2159_v47 = vsel %vm552_vm0, %v4043_v32, 0 }
  0x3d   : > { %v1171_v53 = vld [vmem:[#allocation2 + $0x148] sm:$0xff]  ;;  %v4077_v55 = vpack.c.bf16 %v1170_v51, %v1169_v50  ;;  %v1174_v60 = vld [vmem:[#allocation2 + $0x170] sm:$0xff] }
  0x3e   : > { %3075 = vmatmul.mubr.msk.bf16.gmra.mrb[12].mxu1 %vm368_vm1, %v4016_v15  ;;  %v4079_v56 = vpack.c.bf16 %v1172_v54, %v1171_v53  ;;  %v1173_v59 = vld [vmem:[#allocation2 + $0x168] sm:$0xff]  ;;  %v1176_v62 = vld [vmem:[#allocation2 + $0x190] sm:$0xff] }
  0x3f   : > { %3078 = vmatprep.mubr.msk.bf16.mxu1 %vm368_vm1, %v4018_v17  ;;  %v1175_v61 = vld [vmem:[#allocation2 + $0x188] sm:$0xff]  ;;  %v4091_v0 = vpack.c.bf16 %v1174_v60, %v1173_v59  ;;  %v1178_v5 = vld [vmem:[#allocation2 + $0x1b0] sm:$0xff] }
  0x40   : > { %3211 = vmatmul.mubr.msk.bf16.gmra.mrb[12].mxu0 %vm368_vm1, %v4020_v18  ;;  %v4093_v2 = vpack.c.bf16 %v1176_v62, %v1175_v61  ;;  %v1177_v48 = vld [vmem:[#allocation2 + $0x1a8] sm:$0xff]  ;;  %v1180_v9 = vld [vmem:[#allocation2 + $0x1d0] sm:$0xff] }
  0x41   : > { %3232 = vmatprep.mubr.msk.bf16.mxu0 %vm368_vm1, %v3898_v41  ;;  %v1179_v7 = vld [vmem:[#allocation2 + $0x1c8] sm:$0xff]  ;;  %v4110_v11 = vpack.c.bf16 %v1178_v5, %v1177_v48  ;;  %v1182_v21 = vld [vmem:[#allocation2 + $0x1f0] sm:$0xff] }
  0x42   : > { %v4112_v12 = vpack.c.bf16 %v1180_v9, %v1179_v7  ;;  %v1181_v8 = vld [vmem:[#allocation2 + $0x1e8] sm:$0xff]  ;;  %v1184_v14 = vld [vmem:[#allocation2 + $0x210] sm:$0xff] }
  0x43   : > { %v1183_v13 = vld [vmem:[#allocation2 + $0x208] sm:$0xff]  ;;  %v4122_v20 = vpack.c.bf16 %v1182_v21, %v1181_v8  ;;  %v1186_v25 = vld [vmem:[#allocation2 + $0x230] sm:$0xff] }
  0x44   : > { %v4124_v23 = vpack.c.bf16 %v1184_v14, %v1183_v13  ;;  %v1185_v24 = vld [vmem:[#allocation2 + $0x228] sm:$0xff]  ;;  %v1854_v30 = vld [vmem:[#allocation2 + $0x11] sm:$0xff] }
  0x45   : > { %v1204_v31 = vpack.c.bf16 %v1186_v25, %v1185_v24  ;;  %v1855_v35 = vld [vmem:[#allocation2 + $0x29] sm:$0xff]  ;;  %v1856_v37 = vld [vmem:[#allocation2 + $0x31] sm:$0xff] }
  0x46   : > { %3079 = vmatmul.mubr.msk.bf16.gmra.mrb[16].mxu1 %vm368_vm1, %v4030_v26  ;;  %v1857_v38 = vld [vmem:[#allocation2 + $0x49] sm:$0xff]  ;;  %v1858_v39 = vld [vmem:[#allocation2 + $0x51] sm:$0xff]  ;;  %v4140_v42 = vpack.c.bf16 %v1856_v37, %v1855_v35 }
  0x47   : > { %3082 = vmatprep.mubr.msk.bf16.mxu1 %vm368_vm1, %v4032_v27  ;;  %v4142_v46 = vpack.c.bf16 %v1858_v39, %v1857_v38  ;;  %v4153_v50 = vld [vmem:[%s4451_s3 + $0x10] sm:$0x3]  ;;  %v481_v9 = vld [vmem:[#allocation2 + $0x207] sm:$0xff] }
  0x48   : > { %3233 = vmatmul.mubr.msk.bf16.vlgmr.msra.gmra.mrb[0].mxu0 %vm368_vm1, %v3924_v58  ;;  %v1859_v51 = vld [vmem:[#allocation2 + $0x69] sm:$0xff]  ;;  %v1860_v53 = vld [vmem:[#allocation2 + $0x71] sm:$0xff] }
  0x49   : > { %3265 = vmatpush3.bf16.msra.mxu0 %v1958_v29  ;;  %3236 = vmatprep.mubr.msk.bf16.mxu0 %vm368_vm1, %v3957_v22  ;;  %v1853_v29 = vld [vmem:[#allocation2 + $0x9] sm:$0xff]  ;;  %v1862_v59 = vld [vmem:[#allocation2 + $0x91] sm:$0xff] }
  0x4a   : > { %3664 = vmatprep.subr.msk.bf16.mxu0 %vm552_vm0, %v4043_v32  ;;  %v1889_v34 = vpack.c.bf16 %v1854_v30, %v1853_v29  ;;  %v1861_v54 = vld [vmem:[#allocation2 + $0x89] sm:$0xff]  ;;  %v4161_v32 = vpack.c.bf16 %v1860_v53, %v1859_v51  ;;  %v1864_v62 = vld [vmem:[#allocation2 + $0xb1] sm:$0xff] }
  0x4b   : > { %v4163_v60 = vpack.c.bf16 %v1862_v59, %v1861_v54  ;;  %v1863_v61 = vld [vmem:[#allocation2 + $0xa9] sm:$0xff]  ;;  %v1866_v48 = vld [vmem:[#allocation2 + $0xd1] sm:$0xff] }
  0x4c   : > { %v4173_v5 = vpack.c.bf16 %v1864_v62, %v1863_v61  ;;  %v482_v8 = vld [vmem:[#allocation2 + $0x20f] sm:$0xff] }
  0x4d   : > { %v1867_v21 = vld [vmem:[#allocation2 + $0xe9] sm:$0xff]  ;;  %v1868_v13 = vld [vmem:[#allocation2 + $0xf1] sm:$0xff]  ;;  %v501_v14 = vpack.c.bf16 %v482_v8, %v481_v9 }
  0x4e   : > { %3083 = vmatmul.mubr.msk.bf16.gmra.mrb[20].mxu1 %vm368_vm1, %v4049_v44  ;;  %v1869_v24 = vld [vmem:[#allocation2 + $0x109] sm:$0xff]  ;;  %v1870_v25 = vld [vmem:[#allocation2 + $0x111] sm:$0xff]  ;;  %v4185_v29 = vpack.c.bf16 %v1868_v13, %v1867_v21 }
  0x4f   : > { %3086 = vmatprep.mubr.msk.bf16.mxu1 %vm368_vm1, %v4053_v36  ;;  %v4187_v30 = vpack.c.bf16 %v1870_v25, %v1869_v24  ;;  %v1873_v35 = vld [vmem:[#allocation2 + $0x149] sm:$0xff]  ;;  %v1874_v37 = vld [vmem:[#allocation2 + $0x151] sm:$0xff] }
  0x50   : > { %3237 = vmatmul.mubr.msk.bf16.gmra.mrb[4].mxu0 %vm368_vm1, %v3964_v28  ;;  %v1877_v51 = vld [vmem:[#allocation2 + $0x189] sm:$0xff]  ;;  %v1878_v53 = vld [vmem:[#allocation2 + $0x191] sm:$0xff] }
  0x51   : > { %3240 = vmatprep.mubr.msk.bf16.mxu0 %vm368_vm1, %v3998_v4  ;;  %v1881_v59 = vld [vmem:[#allocation2 + $0x1c9] sm:$0xff]  ;;  %v1882_v61 = vld [vmem:[#allocation2 + $0x1d1] sm:$0xff] }
  0x56   : > { %3087 = vmatmul.mubr.msk.bf16.gmra.mrb[24].mxu1 %vm368_vm1, %v4063_v43 }
  0x57   : > { %3090 = vmatprep.mubr.msk.bf16.mxu1 %vm368_vm1, %v4065_v45 }
  0x58   : > { %3241 = vmatmul.mubr.msk.bf16.gmra.mrb[8].mxu0 %vm368_vm1, %v4002_v6 }
  0x59   : > { %3244 = vmatprep.mubr.msk.bf16.mxu0 %vm368_vm1, %v4020_v18 }
  0x5e   : > { %3091 = vmatmul.mubr.msk.bf16.gmra.mrb[28].mxu1 %vm368_vm1, %v4075_v52 }
  0x5f   : > { %3096 = vmatprep.mubr.msk.bf16.mxu1 %vm368_vm1, %v3890_v33  ;;  %v4098_v33 = vld [vmem:[%s4451_s3 + $0x2] sm:$0x3] }
  0x60   : > { %3245 = vmatmul.mubr.msk.bf16.gmra.mrb[12].mxu0 %vm368_vm1, %v4077_v55  ;;  %v1256_v38 = vsel %vm552_vm0, %v4098_v33, 0 }
  0x61   : > { %3248 = vmatprep.mubr.msk.bf16.mxu0 %vm368_vm1, %v4079_v56 }
  0x66   : > { %3097 = vmatmul.mubr.msk.bf16.vlgmr.msra.gmra.mrb[0].mxu1 %vm368_vm1, %v3918_v49 }
  0x67   : > { %3129 = vmatpush3.bf16.msra.mxu1 %v956_v63  ;;  %3100 = vmatprep.mubr.msk.bf16.mxu1 %vm368_vm1, %v3944_v10  ;;  %v1865_v63 = vld [vmem:[#allocation2 + $0xc9] sm:$0xff] }
  0x68   : > { %3249 = vmatmul.mubr.msk.bf16.gmra.mrb[16].mxu0 %vm368_vm1, %v4091_v0  ;;  %3659 = vmatprep.subr.msk.bf16.mxu1 %vm552_vm0, %v4098_v33  ;;  %v4175_v7 = vpack.c.bf16 %v1866_v48, %v1865_v63  ;;  %v1876_v33 = vld [vmem:[#allocation2 + $0x171] sm:$0xff]  ;;  %v4226_v63 = vpack.c.bf16 %v1882_v61, %v1881_v59 }
  0x69   : > { %3252 = vmatprep.mubr.msk.bf16.mxu0 %vm368_vm1, %v4093_v2 }
  0x6e   : > { %3101 = vmatmul.mubr.msk.bf16.gmra.mrb[4].mxu1 %vm368_vm1, %v3953_v16 }
  0x6f   : > { %3104 = vmatprep.mubr.msk.bf16.mxu1 %vm368_vm1, %v3990_v57 }
  0x70   : > { %3253 = vmatmul.mubr.msk.bf16.gmra.mrb[20].mxu0 %vm368_vm1, %v4110_v11 }
  0x71   : > { %3256 = vmatprep.mubr.msk.bf16.mxu0 %vm368_vm1, %v4112_v12 }
  0x76   : > { %3105 = vmatmul.mubr.msk.bf16.gmra.mrb[8].mxu1 %vm368_vm1, %v3994_v19 }
  0x77   : > { %3108 = vmatprep.mubr.msk.bf16.mxu1 %vm368_vm1, %v4016_v15 }
  0x78   : > { %3257 = vmatmul.mubr.msk.bf16.gmra.mrb[24].mxu0 %vm368_vm1, %v4122_v20 }
  0x79   : > { %3260 = vmatprep.mubr.msk.bf16.mxu0 %vm368_vm1, %v4124_v23 }
  0x7e   : > { %3109 = vmatmul.mubr.msk.bf16.gmra.mrb[12].mxu1 %vm368_vm1, %v4018_v17 }
  0x7f   : > { %3112 = vmatprep.mubr.msk.bf16.mxu1 %vm368_vm1, %v4030_v26 }
  0x80   : > { %3261 = vmatmul.mubr.msk.bf16.gmra.mrb[28].mxu0 %vm368_vm1, %v1204_v31  ;;  %v1871_v31 = vld [vmem:[#allocation2 + $0x129] sm:$0xff] }
  0x81   : > { %3266 = vmatprep.mubr.msk.bf16.mxu0 %vm368_vm1, %v1889_v34  ;;  %v1872_v34 = vld [vmem:[#allocation2 + $0x131] sm:$0xff] }
  0x82   : > { %v4198_v39 = vpack.c.bf16 %v1872_v34, %v1871_v31 }
  0x86   : > { %3113 = vmatmul.mubr.msk.bf16.gmra.mrb[16].mxu1 %vm368_vm1, %v4032_v27 }
  0x87   : > { %3116 = vmatprep.mubr.msk.bf16.mxu1 %vm368_vm1, %v4049_v44 }
  0x88   : > { %3267 = vmatmul.mubr.msk.bf16.vlgmr.msra.gmra.mrb[0].mxu0 %vm368_vm1, %v4140_v42 }
  0x89   : > { %3299 = vmatpush3.bf16.msra.mxu0 %v2159_v47  ;;  %3270 = vmatprep.mubr.msk.bf16.mxu0 %vm368_vm1, %v4142_v46  ;;  %v4200_v47 = vpack.c.bf16 %v1874_v37, %v1873_v35 }
  0x8a   : > { %3665 = vmatprep.subr.msk.bf16.mxu0 %vm552_vm0, %v4153_v50 }
  0x8e   : > { %3117 = vmatmul.mubr.msk.bf16.gmra.mrb[20].mxu1 %vm368_vm1, %v4053_v36 }
  0x8f   : > { %3120 = vmatprep.mubr.msk.bf16.mxu1 %vm368_vm1, %v4063_v43 }
  0x90   : > { %3271 = vmatmul.mubr.msk.bf16.gmra.mrb[4].mxu0 %vm368_vm1, %v4161_v32 }
  0x91   : > { %3274 = vmatprep.mubr.msk.bf16.mxu0 %vm368_vm1, %v4163_v60 }
  0x96   : > { %3121 = vmatmul.mubr.msk.bf16.gmra.mrb[24].mxu1 %vm368_vm1, %v4065_v45 }
  0x97   : > { %3124 = vmatprep.mubr.msk.bf16.mxu1 %vm368_vm1, %v4075_v52 }
  0x98   : > { %3275 = vmatmul.mubr.msk.bf16.gmra.mrb[8].mxu0 %vm368_vm1, %v4173_v5 }
  0x99   : > { %3278 = vmatprep.mubr.msk.bf16.mxu0 %vm368_vm1, %v4175_v7 }
  0x9e   : > { %3125 = vmatmul.mubr.msk.bf16.gmra.mrb[28].mxu1 %vm368_vm1, %v501_v14 }
  0x9f   : > { %3130 = vmatprep.mubr.msk.bf16.mxu1 %vm368_vm1, %v3918_v49  ;;  %v1875_v49 = vld [vmem:[#allocation2 + $0x169] sm:$0xff] }
  0xa0   : > { %3279 = vmatmul.mubr.msk.bf16.gmra.mrb[12].mxu0 %vm368_vm1, %v4185_v29  ;;  %v4212_v54 = vpack.c.bf16 %v1876_v33, %v1875_v49 }
  0xa1   : > { %3282 = vmatprep.mubr.msk.bf16.mxu0 %vm368_vm1, %v4187_v30 }
  0xa6   : > { %3131 = vmatmul.mubr.msk.bf16.vlgmr.msra.gmra.mrb[0].mxu1 %vm368_vm1, %v3944_v10  ;;  %v4214_v10 = vpack.c.bf16 %v1878_v53, %v1877_v51 }
  0xa7   : > { %3163 = vmatpush3.bf16.msra.mxu1 %v1256_v38  ;;  %3134 = vmatprep.mubr.msk.bf16.mxu1 %vm368_vm1, %v3953_v16  ;;  %v1880_v16 = vld [vmem:[#allocation2 + $0x1b1] sm:$0xff] }
  0xa8   : > { %3283 = vmatmul.mubr.msk.bf16.gmra.mrb[16].mxu0 %vm368_vm1, %v4198_v39  ;;  %3661 = vmatprep.subr.msk.bf16.mxu1 %vm552_vm0, %v3728_v1  ;;  %v1879_v1 = vld [vmem:[#allocation2 + $0x1a9] sm:$0xff] }
  0xa9   : > { %3286 = vmatprep.mubr.msk.bf16.mxu0 %vm368_vm1, %v4200_v47  ;;  %v4224_v62 = vpack.c.bf16 %v1880_v16, %v1879_v1 }
  0xae   : > { %3135 = vmatmul.mubr.msk.bf16.gmra.mrb[4].mxu1 %vm368_vm1, %v3990_v57  ;;  %v1883_v57 = vld [vmem:[#allocation2 + $0x1e9] sm:$0xff] }
  0xaf   : > { %3138 = vmatprep.mubr.msk.bf16.mxu1 %vm368_vm1, %v3994_v19  ;;  %v1884_v19 = vld [vmem:[#allocation2 + $0x1f1] sm:$0xff] }
  0xb0   : > { %3287 = vmatmul.mubr.msk.bf16.gmra.mrb[20].mxu0 %vm368_vm1, %v4212_v54  ;;  %v4236_v48 = vpack.c.bf16 %v1884_v19, %v1883_v57 }
  0xb1   : > { %3290 = vmatprep.mubr.msk.bf16.mxu0 %vm368_vm1, %v4214_v10 }
  0xb6   : > { %3139 = vmatmul.mubr.msk.bf16.gmra.mrb[8].mxu1 %vm368_vm1, %v4016_v15  ;;  %v2360_v15 = vsel %vm552_vm0, %v4153_v50, 0 }
  0xb7   : > { %3142 = vmatprep.mubr.msk.bf16.mxu1 %vm368_vm1, %v4018_v17  ;;  %v483_v17 = vld [vmem:[#allocation2 + $0x227] sm:$0xff] }
  0xb8   : > { %3291 = vmatmul.mubr.msk.bf16.gmra.mrb[24].mxu0 %vm368_vm1, %v4224_v62 }
  0xb9   : > { %3294 = vmatprep.mubr.msk.bf16.mxu0 %vm368_vm1, %v4226_v63 }
  0xbe   : > { %3143 = vmatmul.mubr.msk.bf16.gmra.mrb[12].mxu1 %vm368_vm1, %v4030_v26  ;;  %v484_v26 = vld [vmem:[#allocation2 + $0x22f] sm:$0xff] }
  0xbf   : > { %3146 = vmatprep.mubr.msk.bf16.mxu1 %vm368_vm1, %v4032_v27  ;;  %v1151_v27 = vld [vmem:[#allocation2 + $0x8] sm:$0xff] }
  0xc0   : > { %3295 = vmatmul.mubr.msk.bf16.gmra.mrb[28].mxu0 %vm368_vm1, %v4236_v48 }
  0xc1   : > { %3300 = vmatprep.mubr.msk.bf16.mxu0 %vm368_vm1, %v4140_v42 }
  0xc6   : > { %3147 = vmatmul.mubr.msk.bf16.gmra.mrb[16].mxu1 %vm368_vm1, %v4049_v44  ;;  %v1152_v44 = vld [vmem:[#allocation2 + $0x10] sm:$0xff] }
  0xc7   : > { %3150 = vmatprep.mubr.msk.bf16.mxu1 %vm368_vm1, %v4053_v36  ;;  %v502_v36 = vpack.c.bf16 %v484_v26, %v483_v17 }
  0xc8   : > { %3301 = vmatmul.mubr.msk.bf16.vlgmr.msra.gmra.mrb[0].mxu0 %vm368_vm1, %v4142_v46 }
  0xc9   : > { %3333 = vmatpush3.bf16.msra.mxu0 %v2360_v15  ;;  %3304 = vmatprep.mubr.msk.bf16.mxu0 %vm368_vm1, %v4161_v32 }
  0xce   : > { %3151 = vmatmul.mubr.msk.bf16.gmra.mrb[20].mxu1 %vm368_vm1, %v4063_v43  ;;  %v1187_v43 = vpack.c.bf16 %v1152_v44, %v1151_v27 }
  0xcf   : > { %3154 = vmatprep.mubr.msk.bf16.mxu1 %vm368_vm1, %v4065_v45 }
  0xd0   : > { %3305 = vmatmul.mubr.msk.bf16.gmra.mrb[4].mxu0 %vm368_vm1, %v4163_v60 }
  0xd1   : > { %3308 = vmatprep.mubr.msk.bf16.mxu0 %vm368_vm1, %v4173_v5 }
  0xd6   : > { %3155 = vmatmul.mubr.msk.bf16.gmra.mrb[24].mxu1 %vm368_vm1, %v4075_v52 }
  0xd7   : > { %3158 = vmatprep.mubr.msk.bf16.mxu1 %vm368_vm1, %v501_v14 }
  0xd8   : > { %3309 = vmatmul.mubr.msk.bf16.gmra.mrb[8].mxu0 %vm368_vm1, %v4175_v7 }
  0xd9   : > { %3312 = vmatprep.mubr.msk.bf16.mxu0 %vm368_vm1, %v4185_v29 }
  0xde   : > { %3159 = vmatmul.mubr.msk.bf16.gmra.mrb[28].mxu1 %vm368_vm1, %v502_v36 }
  0xdf   : > { %3164 = vmatprep.mubr.msk.bf16.mxu1 %vm368_vm1, %v1187_v43 }
  0xe0   : > { %3313 = vmatmul.mubr.msk.bf16.gmra.mrb[12].mxu0 %vm368_vm1, %v4187_v30 }
  0xe1   : > { %3316 = vmatprep.mubr.msk.bf16.mxu0 %vm368_vm1, %v4198_v39 }
  0xe6   : > { %3165 = vmatmul.mubr.msk.bf16.vlgmr.msra.gmra.mrb[0].mxu1 %vm368_vm1, %v3896_v40  ;;  %v1886_v40 = vld [vmem:[#allocation2 + $0x211] sm:$0xff] }
  0xe7   : > { %3367 = vmatpush3.bf16.msra.mxu1 %v3736_v3  ;;  %3168 = vmatprep.mubr.msk.bf16.mxu1 %vm368_vm1, %v3898_v41  ;;  %v1885_v3 = vld [vmem:[#allocation2 + $0x209] sm:$0xff] }
  0xe8   : > { %3317 = vmatmul.mubr.msk.bf16.gmra.mrb[16].mxu0 %vm368_vm1, %v4200_v47  ;;  %v1905_v41 = vpack.c.bf16 %v1886_v40, %v1885_v3 }
  0xe9   : > { %3320 = vmatprep.mubr.msk.bf16.mxu0 %vm368_vm1, %v4212_v54 }
  0xee   : > { %3169 = vmatmul.mubr.msk.bf16.gmra.mrb[4].mxu1 %vm368_vm1, %v3924_v58  ;;  %v1887_v58 = vld [vmem:[#allocation2 + $0x229] sm:$0xff] }
  0xef   : > { %3172 = vmatprep.mubr.msk.bf16.mxu1 %vm368_vm1, %v3957_v22  ;;  %v1888_v22 = vld [vmem:[#allocation2 + $0x231] sm:$0xff] }
  0xf0   : > { %3321 = vmatmul.mubr.msk.bf16.gmra.mrb[20].mxu0 %vm368_vm1, %v4214_v10 }
  0xf1   : > { %3324 = vmatprep.mubr.msk.bf16.mxu0 %vm368_vm1, %v4224_v62 }
  0xf6   : > { %3173 = vmatmul.mubr.msk.bf16.gmra.mrb[8].mxu1 %vm368_vm1, %v3964_v28  ;;  %v1906_v28 = vpack.c.bf16 %v1888_v22, %v1887_v58 }
  0xf7   : > { %3176 = vmatprep.mubr.msk.bf16.mxu1 %vm368_vm1, %v3998_v4 }
  0xf8   : > { %3325 = vmatmul.mubr.msk.bf16.gmra.mrb[24].mxu0 %vm368_vm1, %v4226_v63 }
  0xf9   : > { %3328 = vmatprep.mubr.msk.bf16.mxu0 %vm368_vm1, %v4236_v48 }
  0xfe   : > { %3177 = vmatmul.mubr.msk.bf16.gmra.mrb[12].mxu1 %vm368_vm1, %v4002_v6 }
  0xff   : > { %3180 = vmatprep.mubr.msk.bf16.mxu1 %vm368_vm1, %v4020_v18 }
 0x100   : > { %3329 = vmatmul.mubr.msk.bf16.gmra.mrb[28].mxu0 %vm368_vm1, %v1905_v41 }
 0x101   : > { %3334 = vmatprep.mubr.msk.bf16.mxu0 %vm368_vm1, %v4142_v46 }
 0x106   : > { %3181 = vmatmul.mubr.msk.bf16.gmra.mrb[16].mxu1 %vm368_vm1, %v4077_v55 }
 0x107   : > { %3184 = vmatprep.mubr.msk.bf16.mxu1 %vm368_vm1, %v4079_v56 }
 0x108   : > { %3335 = vmatmul.mubr.msk.bf16.vlgmr.msra.gmra.mrb[0].mxu0 %vm368_vm1, %v4161_v32 }
 0x109   : > { %3338 = vmatprep.mubr.msk.bf16.mxu0 %vm368_vm1, %v4163_v60 }
 0x10e   : > { %3185 = vmatmul.mubr.msk.bf16.gmra.mrb[20].mxu1 %vm368_vm1, %v4091_v0 }
 0x10f   : > { %3188 = vmatprep.mubr.msk.bf16.mxu1 %vm368_vm1, %v4093_v2 }
 0x110   : > { %3339 = vmatmul.mubr.msk.bf16.gmra.mrb[4].mxu0 %vm368_vm1, %v4173_v5 }
 0x111   : > { %3342 = vmatprep.mubr.msk.bf16.mxu0 %vm368_vm1, %v4175_v7 }
 0x116   : > { %3189 = vmatmul.mubr.msk.bf16.gmra.mrb[24].mxu1 %vm368_vm1, %v4110_v11 }
 0x117   : > { %3192 = vmatprep.mubr.msk.bf16.mxu1 %vm368_vm1, %v4112_v12 }
 0x118   : > { %3343 = vmatmul.mubr.msk.bf16.gmra.mrb[8].mxu0 %vm368_vm1, %v4185_v29 }
 0x119   : > { %3346 = vmatprep.mubr.msk.bf16.mxu0 %vm368_vm1, %v4187_v30 }
 0x11e   : > { %3193 = vmatmul.mubr.msk.bf16.gmra.mrb[28].mxu1 %vm368_vm1, %v4122_v20 }
 0x11f   : > { %3214 = vmatprep.mubr.msk.bf16.mxu1 %vm368_vm1, %v4077_v55 }
 0x120   : > { %3347 = vmatmul.mubr.msk.bf16.gmra.mrb[12].mxu0 %vm368_vm1, %v4198_v39 }
 0x121   : > { %3350 = vmatprep.mubr.msk.bf16.mxu0 %vm368_vm1, %v4200_v47 }
 0x126   : > { %3215 = vmatmul.mubr.msk.bf16.vlgmr.msra.gmra.mrb[16].mxu1 %vm368_vm1, %v4079_v56 }
 0x127   : > { %3218 = vmatprep.mubr.msk.bf16.mxu1 %vm368_vm1, %v4091_v0 }
 0x128   : > { %3351 = vmatmul.mubr.msk.bf16.gmra.mrb[16].mxu0 %vm368_vm1, %v4212_v54 }
 0x129   : > { %3354 = vmatprep.mubr.msk.bf16.mxu0 %vm368_vm1, %v4214_v10 }
 0x12e   : > { %3219 = vmatmul.mubr.msk.bf16.gmra.mrb[20].mxu1 %vm368_vm1, %v4093_v2 }
 0x12f   : > { %3222 = vmatprep.mubr.msk.bf16.mxu1 %vm368_vm1, %v4110_v11 }
 0x130   : > { %3355 = vmatmul.mubr.msk.bf16.gmra.mrb[20].mxu0 %vm368_vm1, %v4224_v62 }
 0x131   : > { %3358 = vmatprep.mubr.msk.bf16.mxu0 %vm368_vm1, %v4226_v63 }
 0x136   : > { %3223 = vmatmul.mubr.msk.bf16.gmra.mrb[24].mxu1 %vm368_vm1, %v4112_v12 }
 0x137   : > { %3226 = vmatprep.mubr.msk.bf16.mxu1 %vm368_vm1, %v4122_v20 }
 0x138   : > { %3359 = vmatmul.mubr.msk.bf16.gmra.mrb[24].mxu0 %vm368_vm1, %v4236_v48 }
 0x139   : > { %3362 = vmatprep.mubr.msk.bf16.mxu0 %vm368_vm1, %v1905_v41 }
 0x13e   : > { %3227 = vmatmul.mubr.msk.bf16.gmra.mrb[28].mxu1 %vm368_vm1, %v4124_v23  ;;  %v4372_v23 = vld [vmem:[%s4452_s4] ss:$0 sm:$0xff] }
 0x140   : > { %3363 = vmatmul.mubr.msk.bf16.gmra.mrb[28].mxu0 %vm368_vm1, %v1906_v28 }
 0x1b9   : > { %v3166_v4 = vpop.f32.mrb[0].mxu1 }
 0x1ba   : > { %v1292_v6 = vpop.f32.mrb[1].mxu1  ;;  %v3368_v60 = vadd.f32 %v3166_v4, %v4372_v23 }
 0x1bb   : > { %v3167_v18 = vpop.f32.mrb[2].mxu1  ;;  %v3370_v5 = vadd.f32 %v4372_v23, %v1292_v6 }
 0x1bc   : > { %v1295_v45 = vpop.f32.mrb[3].mxu1  ;;  %v3372_v9 = vadd.f32 %v3167_v18, %v4372_v23 }
 0x1bd   : > { %v3374_v13 = vadd.f32 %v4372_v23, %v1295_v45 }
 0x1c1   : > { %v3170_v52 = vpop.f32.mrb[4].mxu1 }
 0x1c2   : > { %v1308_v55 = vpop.f32.mrb[5].mxu1  ;;  %v3376_v37 = vadd.f32 %v3170_v52, %v4372_v23 }
 0x1c3   : > { %v3171_v56 = vpop.f32.mrb[6].mxu1  ;;  %v3378_v38 = vadd.f32 %v4372_v23, %v1308_v55 }
 0x1c4   : > { %v1311_v0 = vpop.f32.mrb[7].mxu1  ;;  %v3380_v49 = vadd.f32 %v3171_v56, %v4372_v23 }
 0x1c5   : > { %v3382_v53 = vadd.f32 %v4372_v23, %v1311_v0 }
 0x1c9   : > { %v3174_v2 = vpop.f32.mrb[8].mxu1 }
 0x1ca   : > { %v1324_v11 = vpop.f32.mrb[9].mxu1  ;;  %v3384_v57 = vadd.f32 %v3174_v2, %v4372_v23 }
 0x1cb   : > { %v3175_v12 = vpop.f32.mrb[10].mxu1  ;;  %v3386_v19 = vadd.f32 %v4372_v23, %v1324_v11 }
 0x1cc   : > { %v1327_v20 = vpop.f32.mrb[11].mxu1  ;;  %v3388_v17 = vadd.f32 %v3175_v12, %v4372_v23 }
 0x1cd   : > { %v3390_v44 = vadd.f32 %v4372_v23, %v1327_v20 }
 0x1d1   : > { %v3178_v42 = vpop.f32.mrb[12].mxu1 }
 0x1d2   : > { %v1340_v46 = vpop.f32.mrb[13].mxu1  ;;  %v3392_v4 = vadd.f32 %v3178_v42, %v4372_v23 }
 0x1d3   : > { %v3179_v50 = vpop.f32.mrb[14].mxu1  ;;  %v3394_v6 = vadd.f32 %v4372_v23, %v1340_v46 }
 0x1d4   : > { %v4367_v32 = vpop.f32.mrb[15].mxu1  ;;  %v3396_v52 = vadd.f32 %v3179_v50, %v4372_v23 }
 0x1d5   : > { %v3398_v0 = vadd.f32 %v4372_v23, %v4367_v32 }
 0x1db   : > { %v3336_v7 = vpop.f32.mrb[0].mxu0 }
 0x1dc   : > { %v3369_v8 = vadd.f32 %v3368_v60, %v3336_v7  ;;  %v2396_v21 = vpop.f32.mrb[1].mxu0 }
 0x1dd   : > { %v3371_v14 = vadd.f32 %v3370_v5, %v2396_v21  ;;  %v3337_v24 = vpop.f32.mrb[2].mxu0 }
 0x1de   : > { %v3373_v25 = vadd.f32 %v3372_v9, %v3337_v24  ;;  %v2399_v29 = vpop.f32.mrb[3].mxu0 }
 0x1df   : > { %v2555_v30 = vmax.f32 %v3371_v14, %v3369_v8  ;;  %v3375_v31 = vadd.f32 %v3374_v13, %v2399_v29 }
 0x1e1   : > { %v2891_v34 = vpack.c.bf16 %v2555_v30, %v2555_v30  ;;  %v2556_v35 = vmax.f32 %v3375_v31, %v3373_v25 }
 0x1e3   : > { %2636 = vst.msk [vmem:[%s4382_s28] sm:$0xf] %vm2635_vm3, %v2891_v34  ;;  %v2892_v39 = vpack.c.bf16 %v2556_v35, %v2556_v35  ;;  %v3340_v47 = vpop.f32.mrb[4].mxu0 }
 0x1e4   : > { %v3377_v33 = vadd.f32 %v3376_v37, %v3340_v47  ;;  %v2412_v51 = vpop.f32.mrb[5].mxu0 }
 0x1e5   : > { %2637 = vst.msk [vmem:[%s4382_s28 + $0x4] sm:$0xf] %vm2635_vm3, %v2892_v39  ;;  %v3379_v54 = vadd.f32 %v3378_v38, %v2412_v51  ;;  %v3341_v10 = vpop.f32.mrb[6].mxu0 }
 0x1e6   : > { %v3381_v1 = vadd.f32 %v3380_v49, %v3341_v10  ;;  %v2415_v16 = vpop.f32.mrb[7].mxu0 }
 0x1e7   : > { %v2557_v59 = vmax.f32 %v3379_v54, %v3377_v33  ;;  %v3383_v61 = vadd.f32 %v3382_v53, %v2415_v16 }
 0x1e9   : > { %v2893_v62 = vpack.c.bf16 %v2557_v59, %v2557_v59  ;;  %v2558_v63 = vmax.f32 %v3383_v61, %v3381_v1 }
 0x1eb   : > { %2638 = vst.msk [vmem:[%s4382_s28 + $0x8] sm:$0xf] %vm2635_vm3, %v2893_v62  ;;  %v2894_v48 = vpack.c.bf16 %v2558_v63, %v2558_v63  ;;  %v3344_v15 = vpop.f32.mrb[8].mxu0 }
 0x1ec   : > { %v3385_v26 = vadd.f32 %v3384_v57, %v3344_v15  ;;  %v2428_v27 = vpop.f32.mrb[9].mxu0 }
 0x1ed   : > { %2639 = vst.msk [vmem:[%s4382_s28 + $0xc] sm:$0xf] %vm2635_vm3, %v2894_v48  ;;  %v3387_v36 = vadd.f32 %v3386_v19, %v2428_v27  ;;  %v3345_v43 = vpop.f32.mrb[10].mxu0 }
 0x1ee   : > { %v3389_v3 = vadd.f32 %v3388_v17, %v3345_v43  ;;  %v2431_v40 = vpop.f32.mrb[11].mxu0 }
 0x1ef   : > { %v2559_v41 = vmax.f32 %v3387_v36, %v3385_v26  ;;  %v3391_v58 = vadd.f32 %v3390_v44, %v2431_v40 }
 0x1f1   : > { %v2895_v22 = vpack.c.bf16 %v2559_v41, %v2559_v41  ;;  %v2560_v28 = vmax.f32 %v3391_v58, %v3389_v3 }
 0x1f3   : > { %2640 = vst.msk [vmem:[%s4382_s28 + $0x10] sm:$0xf] %vm2635_vm3, %v2895_v22  ;;  %v2896_v18 = vpack.c.bf16 %v2560_v28, %v2560_v28  ;;  %v3348_v45 = vpop.f32.mrb[12].mxu0 }
 0x1f4   : > { %v3393_v55 = vadd.f32 %v3392_v4, %v3348_v45  ;;  %v2444_v56 = vpop.f32.mrb[13].mxu0 }
 0x1f5   : > { %2641 = vst.msk [vmem:[%s4382_s28 + $0x14] sm:$0xf] %vm2635_vm3, %v2896_v18  ;;  %v3395_v2 = vadd.f32 %v3394_v6, %v2444_v56  ;;  %v3349_v11 = vpop.f32.mrb[14].mxu0 }
 0x1f6   : > { %v3397_v12 = vadd.f32 %v3396_v52, %v3349_v11  ;;  %v2447_v20 = vpop.f32.mrb[15].mxu0 }
 0x1f7   : > { %v2561_v42 = vmax.f32 %v3395_v2, %v3393_v55  ;;  %v3399_v46 = vadd.f32 %v3398_v0, %v2447_v20 }
 0x1f9   : > { %v2897_v60 = vpack.c.bf16 %v2561_v42, %v2561_v42  ;;  %v2562_v5 = vmax.f32 %v3399_v46, %v3397_v12  ;;  %v3216_v7 = vpop.f32.mrb[16].mxu1 }
 0x1fa   : > { %v3400_v50 = vadd.f32 %v3216_v7, %v4372_v23  ;;  %v1557_v9 = vpop.f32.mrb[17].mxu1 }
 0x1fb   : > { %2642 = vst.msk [vmem:[%s4382_s28 + $0x18] sm:$0xf] %vm2635_vm3, %v2897_v60  ;;  %v2898_v8 = vpack.c.bf16 %v2562_v5, %v2562_v5  ;;  %v3402_v32 = vadd.f32 %v4372_v23, %v1557_v9  ;;  %v3352_v21 = vpop.f32.mrb[16].mxu0  ;;  %v3217_v13 = vpop.f32.mrb[18].mxu1 }
 0x1fc   : > { %v3401_v14 = vadd.f32 %v3400_v50, %v3352_v21  ;;  %v3404_v24 = vadd.f32 %v3217_v13, %v4372_v23  ;;  %v2460_v25 = vpop.f32.mrb[17].mxu0  ;;  %v1560_v29 = vpop.f32.mrb[19].mxu1 }
 0x1fd   : > { %2643 = vst.msk [vmem:[%s4382_s28 + $0x1c] sm:$0xf] %vm2635_vm3, %v2898_v8  ;;  %v3403_v30 = vadd.f32 %v3402_v32, %v2460_v25  ;;  %v3406_v31 = vadd.f32 %v4372_v23, %v1560_v29  ;;  %v3353_v34 = vpop.f32.mrb[18].mxu0 }
 0x1fe   : > { %v3405_v35 = vadd.f32 %v3404_v24, %v3353_v34  ;;  %v2463_v37 = vpop.f32.mrb[19].mxu0 }
 0x1ff   : > { %v2563_v38 = vmax.f32 %v3403_v30, %v3401_v14  ;;  %v3407_v39 = vadd.f32 %v3406_v31, %v2463_v37 }
 0x201   : > { %v2899_v47 = vpack.c.bf16 %v2563_v38, %v2563_v38  ;;  %v2564_v49 = vmax.f32 %v3407_v39, %v3405_v35  ;;  %v3220_v33 = vpop.f32.mrb[20].mxu1 }
 0x202   : > { %v3408_v51 = vadd.f32 %v3220_v33, %v4372_v23  ;;  %v1573_v53 = vpop.f32.mrb[21].mxu1 }
 0x203   : > { %2644 = vst.msk [vmem:[%s4382_s28 + $0x20] sm:$0xf] %vm2635_vm3, %v2899_v47  ;;  %v2900_v54 = vpack.c.bf16 %v2564_v49, %v2564_v49  ;;  %v3410_v10 = vadd.f32 %v4372_v23, %v1573_v53  ;;  %v3356_v1 = vpop.f32.mrb[20].mxu0  ;;  %v3221_v16 = vpop.f32.mrb[22].mxu1 }
 0x204   : > { %v3409_v59 = vadd.f32 %v3408_v51, %v3356_v1  ;;  %v3412_v61 = vadd.f32 %v3221_v16, %v4372_v23  ;;  %v2476_v62 = vpop.f32.mrb[21].mxu0  ;;  %v1576_v63 = vpop.f32.mrb[23].mxu1 }
 0x205   : > { %2645 = vst.msk [vmem:[%s4382_s28 + $0x24] sm:$0xf] %vm2635_vm3, %v2900_v54  ;;  %v3411_v57 = vadd.f32 %v3410_v10, %v2476_v62  ;;  %v3414_v19 = vadd.f32 %v4372_v23, %v1576_v63  ;;  %v3357_v48 = vpop.f32.mrb[22].mxu0 }
 0x206   : > { %v3413_v15 = vadd.f32 %v3412_v61, %v3357_v48  ;;  %v2479_v17 = vpop.f32.mrb[23].mxu0 }
 0x207   : > { %v2565_v26 = vmax.f32 %v3411_v57, %v3409_v59  ;;  %v3415_v27 = vadd.f32 %v3414_v19, %v2479_v17 }
 0x209   : > { %v2901_v44 = vpack.c.bf16 %v2565_v26, %v2565_v26  ;;  %v2566_v36 = vmax.f32 %v3415_v27, %v3413_v15  ;;  %v3224_v43 = vpop.f32.mrb[24].mxu1 }
 0x20a   : > { %v3416_v3 = vadd.f32 %v3224_v43, %v4372_v23  ;;  %v1589_v40 = vpop.f32.mrb[25].mxu1 }
 0x20b   : > { %2646 = vst.msk [vmem:[%s4382_s28 + $0x28] sm:$0xf] %vm2635_vm3, %v2901_v44  ;;  %v2902_v41 = vpack.c.bf16 %v2566_v36, %v2566_v36  ;;  %v3418_v58 = vadd.f32 %v4372_v23, %v1589_v40  ;;  %v3360_v22 = vpop.f32.mrb[24].mxu0  ;;  %v3225_v28 = vpop.f32.mrb[26].mxu1 }
 0x20c   : > { %v3417_v4 = vadd.f32 %v3416_v3, %v3360_v22  ;;  %v3420_v6 = vadd.f32 %v3225_v28, %v4372_v23  ;;  %v2492_v18 = vpop.f32.mrb[25].mxu0  ;;  %v1592_v45 = vpop.f32.mrb[27].mxu1 }
 0x20d   : > { %2647 = vst.msk [vmem:[%s4382_s28 + $0x2c] sm:$0xf] %vm2635_vm3, %v2902_v41  ;;  %v3419_v52 = vadd.f32 %v3418_v58, %v2492_v18  ;;  %v3422_v55 = vadd.f32 %v4372_v23, %v1592_v45  ;;  %v3361_v56 = vpop.f32.mrb[26].mxu0 }
 0x20e   : > { %v3421_v0 = vadd.f32 %v3420_v6, %v3361_v56  ;;  %v2495_v2 = vpop.f32.mrb[27].mxu0 }
 0x20f   : > { %v2567_v11 = vmax.f32 %v3419_v52, %v3417_v4  ;;  %v3423_v12 = vadd.f32 %v3422_v55, %v2495_v2 }
 0x211   : > { %v2903_v20 = vpack.c.bf16 %v2567_v11, %v2567_v11  ;;  %v2568_v42 = vmax.f32 %v3423_v12, %v3421_v0  ;;  %v3228_v46 = vpop.f32.mrb[28].mxu1 }
 0x212   : > { %v3424_v60 = vadd.f32 %v3228_v46, %v4372_v23  ;;  %v1605_v5 = vpop.f32.mrb[29].mxu1 }
 0x213   : > { %2648 = vst.msk [vmem:[%s4382_s28 + $0x30] sm:$0xf] %vm2635_vm3, %v2903_v20  ;;  %v2904_v7 = vpack.c.bf16 %v2568_v42, %v2568_v42  ;;  %v3426_v50 = vadd.f32 %v4372_v23, %v1605_v5  ;;  %v3364_v9 = vpop.f32.mrb[28].mxu0  ;;  %v3229_v8 = vpop.f32.mrb[30].mxu1 }
 0x214   : > { %v3425_v32 = vadd.f32 %v3424_v60, %v3364_v9  ;;  %v3428_v21 = vadd.f32 %v3229_v8, %v4372_v23  ;;  %v2508_v13 = vpop.f32.mrb[29].mxu0  ;;  %v1608_v14 = vpop.f32.mrb[31].mxu1 }
 0x215   : > { %2649 = vst.msk [vmem:[%s4382_s28 + $0x34] sm:$0xf] %vm2635_vm3, %v2904_v7  ;;  %v3427_v24 = vadd.f32 %v3426_v50, %v2508_v13  ;;  %v3430_v25 = vadd.f32 %v4372_v23, %v1608_v14  ;;  %v3365_v29 = vpop.f32.mrb[30].mxu0 }
 0x216   : > { %v3429_v30 = vadd.f32 %v3428_v21, %v3365_v29  ;;  %v2511_v31 = vpop.f32.mrb[31].mxu0 }
 0x217   : > { %v2569_v34 = vmax.f32 %v3427_v24, %v3425_v32  ;;  %v3431_v35 = vadd.f32 %v3430_v25, %v2511_v31 }
 0x219   : > { %v2905_v37 = vpack.c.bf16 %v2569_v34, %v2569_v34  ;;  %v2570_v38 = vmax.f32 %v3431_v35, %v3429_v30 }
 0x21b   : > { %2650 = vst.msk [vmem:[%s4382_s28 + $0x38] sm:$0xf] %vm2635_vm3, %v2905_v37  ;;  %v2906_v39 = vpack.c.bf16 %v2570_v38, %v2570_v38 }
 0x21d   : > { %2651 = vst.msk [vmem:[%s4382_s28 + $0x3c] sm:$0xf] %vm2635_vm3, %v2906_v39 }
 0x21e PF: > { %s15_s18 = sadd.s32 1, %s3681_s18  }
 0x21f   : > { %p12_p4 = scmp.ge.s32.totalorder %s15_s18, 4  }
 0x221   :  { %14 = sbr.rel (!%p12_p4) target bundleno = 1 (0x1), region = 78 }

// kernel: attention_block.3
= control target key start
LH: loop header
LB: loop body
LE: loop exit
PB: predicated region body
PF: predicated region fallthrough
CT: control target
= control target key end

     0   :  { %s3249_s13 = smov 0   ;;  %s3656_s0 = inlined_call_operand.vmem [shape: bf16[2,8,8,8], index: 0, kind: input, shape index: {}]   ;;  %s3657_s1 = inlined_call_operand.vmem [shape: f32[2,8,8,8], index: 1, kind: input, shape index: {}]   ;;  %s3658_s2 = inlined_call_operand.vmem [shape: f32[1,1,8], index: 2, kind: input, shape index: {}]   ;;  %s3659_s3 = inlined_call_operand.vmem [shape: f32[1,1,8], index: 3, kind: input, shape index: {}]   ;;  %s3660_s4 = inlined_call_operand.vmem [shape: bf16[9,8,8], index: 4, kind: input, shape index: {}]   ;;  %s3661_s5 = inlined_call_operand.vmem [shape: f32[1,8], index: 5, kind: input, shape index: {}]   ;;  %s3662_s6 = inlined_call_operand.vmem [shape: f32[1,1,8], index: 6, kind: input, shape index: {}]   ;;  %s3663_s7 = inlined_call_operand.vmem [shape: f32[1,1,8], index: 7, kind: input, shape index: {}]   ;;  %s3664_s8 = inlined_call_operand.vmem [shape: bf16[9,8,8], index: 8, kind: input, shape index: {}]   ;;  %s3665_s9 = inlined_call_operand.vmem [shape: f32[1,8], index: 9, kind: input, shape index: {}]   ;;  %s3666_s10 = inlined_call_operand.vmem [shape: f32[2,8,8,8], index: 10, kind: output, shape index: {}]  }
   0x1 LB: > { %s2507_s14 = sadd.s32 4294967295, %s3191_s13   ;;  %p2511_p0 = scmp.ge.s32.totalorder %s3191_s13, 1  ;;  %s3191_s13 = sphi %s3249_s13, %s20_s13  }
   0x2   : > { %p322_p1 = scmp.lt.s32.totalorder %s3191_s13, 3 }
   0x4   : > { %p323_p2 = pnand %p2511_p0, %p322_p1 }
   0x5   : > { %v486_v0 = vld [vmem:[%s3660_s4] sm:$0xf] (!%p323_p2)  ;;  %vm519_vm0 = vcmask (!%p323_p2), 1043456   ;;  %p365_p3 = scmp.lt.s32.totalorder (!%p323_p2), %s2507_s14, 1  ;;  %vm427_vm1 = vcmask (!%p323_p2), 64512   ;;  %vm438_vm2 = vcmask (!%p323_p2), 57344  }
   0x6   : > { %326 = sbr.rel (%p323_p2) target bundleno = 753 (0x2f1), region = 60  ;;  %3158 = vmatprep.subr.msk.bf16.mxu0 (!%p323_p2), %vm519_vm0, %v486_v0  ;;  %v521_v1 = vsel (!%p323_p2), %vm519_vm0, %v486_v0, 0  ;;  %v3193_v2 = vmov (!%p323_p2), 0.0   ;;  %v3311_v3 = vld [vmem:[%s3660_s4 + $0xc] sm:$0xf] (!%p323_p2) }
   0x7   : > { %2835 = vmatpush3.bf16.msra.mxu0 (!%p323_p2), %v521_v1  ;;  %428 = vst.msk [vmem:[#allocation2 + $0x8] sm:$0xff] (!%p323_p2), %vm427_vm1, %v3193_v2  ;;  %437 = vst.msk [vmem:[#allocation2 + $0xe0] sm:$0xff] (!%p323_p2), %vm427_vm1, %v3193_v2  ;;  %v2518_v4 = vld [vmem:[%s3658_s2] ss:$0 sm:$0xff] (!%p323_p2)  ;;  %v617_v50 = vsel (!%p323_p2), %vm519_vm0, %v3311_v3, 0 }
   0x8   : > { %439 = vst.msk [vmem:[#allocation2 + $0x7] sm:$0x1] (!%p323_p2), %vm438_vm2, %v3193_v2  ;;  %440 = vst.msk [vmem:[#allocation2 + $0x1f] sm:$0x1] (!%p323_p2), %vm438_vm2, %v3193_v2  ;;  %3159 = vmatprep.subr.msk.bf16.mxu0 (!%p323_p2), %vm519_vm0, %v3311_v3  ;;  %v2519_v5 = vld [vmem:[%s3659_s3] ss:$0 sm:$0xff] (!%p323_p2) }
   0x9   : > { %441 = vst.msk [vmem:[#allocation2 + $0x37] sm:$0x1] (!%p323_p2), %vm438_vm2, %v3193_v2  ;;  %442 = vst.msk [vmem:[#allocation2 + $0x4f] sm:$0x1] (!%p323_p2), %vm438_vm2, %v3193_v2  ;;  %v2538_v53 = vld [vmem:[%s3660_s4 + $0x18] sm:$0xf] (!%p323_p2) }
   0xa   : > { %443 = vst.msk [vmem:[#allocation2 + $0x67] sm:$0x1] (!%p323_p2), %vm438_vm2, %v3193_v2  ;;  %444 = vst.msk [vmem:[#allocation2 + $0x7f] sm:$0x1] (!%p323_p2), %vm438_vm2, %v3193_v2 }
   0xb   : > { %445 = vst.msk [vmem:[#allocation2 + $0x97] sm:$0x1] (!%p323_p2), %vm438_vm2, %v3193_v2  ;;  %446 = vst.msk [vmem:[#allocation2 + $0xaf] sm:$0x1] (!%p323_p2), %vm438_vm2, %v3193_v2 }
   0xc   : > { %447 = vst.msk [vmem:[#allocation2 + $0xc7] sm:$0x1] (!%p323_p2), %vm438_vm2, %v3193_v2  ;;  %448 = vst.msk [vmem:[#allocation2 + $0xdf] sm:$0x1] (!%p323_p2), %vm438_vm2, %v3193_v2 }
   0xd   : > { %s3668_s14 = smov (!%p365_p3, %s2507_s14), 1  ;;  %449 = vst.msk [vmem:[#allocation2 + $0x10] sm:$0x1] %vm438_vm2, %v3193_v2  ;;  %450 = vst.msk [vmem:[#allocation2 + $0x28] sm:$0x1] %vm438_vm2, %v3193_v2 }
   0xe   : > { %451 = vst.msk [vmem:[#allocation2 + $0x40] sm:$0x1] %vm438_vm2, %v3193_v2  ;;  %452 = vst.msk [vmem:[#allocation2 + $0x58] sm:$0x1] %vm438_vm2, %v3193_v2  ;;  %s2669_s19 = sshll.u32 %s3668_s14, 6  ;;  %v3357_v30 = vld [vmem:[#allocation2 + $0x8] sm:$0xff] }
   0xf   : > { %453 = vst.msk [vmem:[#allocation2 + $0x70] sm:$0x1] %vm438_vm2, %v3193_v2  ;;  %454 = vst.msk [vmem:[#allocation2 + $0x88] sm:$0x1] %vm438_vm2, %v3193_v2  ;;  %s374_s24 = scalar_lea.vmem %s3657_s1, %s2669_s19  ;;  %v466_v21 = vld [vmem:[#allocation2 + $0x7] sm:$0xff]  ;;  %s2668_s28 = sshll.u32 %s3668_s14, 5 }
  0x10   : > { %455 = vst.msk [vmem:[#allocation2 + $0xa0] sm:$0x1] %vm438_vm2, %v3193_v2  ;;  %456 = vst.msk [vmem:[#allocation2 + $0xb8] sm:$0x1] %vm438_vm2, %v3193_v2  ;;  %v3327_v6 = vld [vmem:[%s374_s24] sm:$0xff]  ;;  %v3329_v7 = vld [vmem:[%s374_s24 + $0x8] sm:$0xff]  ;;  %s369_s11 = scalar_lea.vmem %s3656_s0, %s2668_s28  ;;  %s379_s22 = scalar_lea.vmem %s3666_s10, %s2669_s19 }
  0x11   : > { %457 = vst.msk [vmem:[#allocation2 + $0xd0] sm:$0x1] %vm438_vm2, %v3193_v2  ;;  %458 = vst.msk [vmem:[#allocation2 + $0xe8] sm:$0x1] %vm438_vm2, %v3193_v2  ;;  %v3331_v8 = vld [vmem:[%s374_s24 + $0x10] sm:$0xff]  ;;  %v396_v9 = vmul.f32 %v2518_v4, %v3327_v6  ;;  %v397_v10 = vmul.f32 %v2518_v4, %v3329_v7  ;;  %v3336_v12 = vld [vmem:[%s374_s24 + $0x18] sm:$0xff] }
  0x12   : > { %v398_v11 = vmul.f32 %v2518_v4, %v3331_v8  ;;  %v3338_v13 = vld [vmem:[%s374_s24 + $0x20] sm:$0xff]  ;;  %v3340_v14 = vld [vmem:[%s374_s24 + $0x28] sm:$0xff]  ;;  %v399_v15 = vmul.f32 %v2518_v4, %v3336_v12  ;;  %v3344_v17 = vld [vmem:[%s374_s24 + $0x30] sm:$0xff]  ;;  %1468 = vst.msk [vmem:[#allocation2 + $0x7] sm:$0x1] %vm438_vm2, %v3193_v2 }
  0x13   : > { %v400_v16 = vmul.f32 %v2518_v4, %v3338_v13  ;;  %v401_v18 = vmul.f32 %v2518_v4, %v3340_v14  ;;  %v3347_v19 = vld [vmem:[%s374_s24 + $0x38] sm:$0xff]  ;;  %v411_v20 = vadd.f32 %v2519_v5, %v396_v9  ;;  %v412_v22 = vadd.f32 %v2519_v5, %v397_v10  ;;  %v3424_v0 = vld [vmem:[#allocation2 + $0xe0] sm:$0xff] }
  0x14   : > { %v413_v23 = vadd.f32 %v2519_v5, %v398_v11  ;;  %v402_v24 = vmul.f32 %v2518_v4, %v3344_v17  ;;  %v3350_v25 = vld [vmem:[#allocation2 + $0xdf] sm:$0xff]  ;;  %v414_v26 = vadd.f32 %v2519_v5, %v399_v15  ;;  %v403_v29 = vmul.f32 %v2518_v4, %v3347_v19  ;;  %v3359_v31 = vld [vmem:[#allocation2 + $0x9] sm:$0xff] }
  0x15   : > { %v415_v27 = vadd.f32 %v2519_v5, %v400_v16  ;;  %v416_v28 = vadd.f32 %v2519_v5, %v401_v18  ;;  %1477 = vst.msk [vmem:[#allocation2 + $0xdf] sm:$0x1] %vm438_vm2, %v3193_v2  ;;  %v419_v32 = vmax.f32 %v411_v20, 0.0  ;;  %v420_v33 = vmax.f32 %v412_v22, 0.0  ;;  %1478 = vst.msk [vmem:[#allocation2 + $0x10] sm:$0x1] %vm438_vm2, %v3193_v2 }
  0x16   : > { %v421_v34 = vmax.f32 %v413_v23, 0.0  ;;  %v417_v35 = vadd.f32 %v2519_v5, %v402_v24  ;;  %1458 = vst.msk [vmem:[#allocation2 + $0x8] sm:$0xff] %vm427_vm1, %v3193_v2  ;;  %v422_v36 = vmax.f32 %v414_v26, 0.0  ;;  %v418_v39 = vadd.f32 %v2519_v5, %v403_v29  ;;  %v2544_v10 = vld [vmem:[%s3660_s4 + $0x4] sm:$0xf] }
  0x17   : > { %v423_v37 = vmax.f32 %v415_v27, 0.0  ;;  %v424_v38 = vmax.f32 %v416_v28, 0.0  ;;  %429 = vst.msk [vmem:[#allocation2 + $0x20] sm:$0xff] %vm427_vm1, %v419_v32  ;;  %430 = vst.msk [vmem:[#allocation2 + $0x38] sm:$0xff] %vm427_vm1, %v420_v33  ;;  %v701_v9 = vsel %vm519_vm0, %v2538_v53, 0  ;;  %v831_v11 = vsel %vm519_vm0, %v2544_v10, 0 }
  0x18   : > { %431 = vst.msk [vmem:[#allocation2 + $0x50] sm:$0xff] %vm427_vm1, %v421_v34  ;;  %v425_v40 = vmax.f32 %v417_v35, 0.0  ;;  %432 = vst.msk [vmem:[#allocation2 + $0x68] sm:$0xff] %vm427_vm1, %v422_v36  ;;  %v426_v41 = vmax.f32 %v418_v39, 0.0  ;;  %v3432_v1 = vld [vmem:[#allocation2 + $0xe1] sm:$0xff] }
  0x19   : > { %433 = vst.msk [vmem:[#allocation2 + $0x80] sm:$0xff] %vm427_vm1, %v423_v37  ;;  %434 = vst.msk [vmem:[#allocation2 + $0x98] sm:$0xff] %vm427_vm1, %v424_v38  ;;  %v2553_v15 = vld [vmem:[%s3660_s4 + $0x10] sm:$0xf]  ;;  %v2562_v29 = vld [vmem:[%s3660_s4 + $0x1c] sm:$0xf] }
  0x1a   : > { %435 = vst.msk [vmem:[#allocation2 + $0xb0] sm:$0xff] %vm427_vm1, %v425_v40  ;;  %436 = vst.msk [vmem:[#allocation2 + $0xc8] sm:$0xff] %vm427_vm1, %v426_v41  ;;  %v927_v28 = vsel %vm519_vm0, %v2553_v15, 0  ;;  %v1011_v36 = vsel %vm519_vm0, %v2562_v29, 0  ;;  %v2568_v37 = vld [vmem:[%s3660_s4 + $0x8] sm:$0xf] }
  0x1b   : > { %1467 = vst.msk [vmem:[#allocation2 + $0xe0] sm:$0xff] %vm427_vm1, %v3193_v2  ;;  %v1141_v40 = vsel %vm519_vm0, %v2568_v37, 0  ;;  %v2577_v41 = vld [vmem:[%s3660_s4 + $0x14] sm:$0xf] }
  0x1c   : > { %1487 = vst.msk [vmem:[#allocation2 + $0xe8] sm:$0x1] %vm438_vm2, %v3193_v2 }
  0x1e   : > { %v467_v42 = vld [vmem:[#allocation2 + $0x1f] sm:$0xff]  ;;  %v468_v43 = vld [vmem:[#allocation2 + $0x37] sm:$0xff] }
  0x1f   : > { %v469_v44 = vld [vmem:[#allocation2 + $0x4f] sm:$0xff]  ;;  %v2671_v45 = vpack.c.bf16 %v467_v42, %v466_v21  ;;  %1469 = vst.msk [vmem:[#allocation2 + $0x1f] sm:$0x1] %vm438_vm2, %v3193_v2  ;;  %1470 = vst.msk [vmem:[#allocation2 + $0x37] sm:$0x1] %vm438_vm2, %v3193_v2  ;;  %v470_v47 = vld [vmem:[#allocation2 + $0x67] sm:$0xff]  ;;  %v2675_v3 = vpack.c.bf16 %v468_v43, %v467_v42 }
  0x20   : > { %v2672_v46 = vpack.c.bf16 %v469_v44, %v468_v43  ;;  %1471 = vst.msk [vmem:[#allocation2 + $0x4f] sm:$0x1] %vm438_vm2, %v3193_v2  ;;  %v471_v48 = vld [vmem:[#allocation2 + $0x7f] sm:$0xff]  ;;  %v472_v49 = vld [vmem:[#allocation2 + $0x97] sm:$0xff]  ;;  %1472 = vst.msk [vmem:[#allocation2 + $0x67] sm:$0x1] %vm438_vm2, %v3193_v2  ;;  %v2676_v4 = vpack.c.bf16 %v470_v47, %v469_v44 }
  0x21   : > { %v2673_v51 = vpack.c.bf16 %v471_v48, %v470_v47  ;;  %1473 = vst.msk [vmem:[#allocation2 + $0x7f] sm:$0x1] %vm438_vm2, %v3193_v2  ;;  %v473_v52 = vld [vmem:[#allocation2 + $0xaf] sm:$0xff]  ;;  %1474 = vst.msk [vmem:[#allocation2 + $0x97] sm:$0x1] %vm438_vm2, %v3193_v2  ;;  %2836 = vmatprep.mubr.msk.bf16.mxu0 %vm427_vm1, %v2671_v45  ;;  %v474_v54 = vld [vmem:[#allocation2 + $0xc7] sm:$0xff]  ;;  %v2677_v5 = vpack.c.bf16 %v472_v49, %v471_v48 }
  0x22   : > { %1475 = vst.msk [vmem:[#allocation2 + $0xaf] sm:$0x1] %vm438_vm2, %v3193_v2  ;;  %2837 = vmatmul.mubr.msk.bf16.vlgmr.msra.gmra.mrb[0].mxu0 %vm427_vm1, %v2672_v46  ;;  %1476 = vst.msk [vmem:[#allocation2 + $0xc7] sm:$0x1] %vm438_vm2, %v3193_v2  ;;  %v3397_v55 = vld [vmem:[#allocation2 + $0x21] sm:$0xff]  ;;  %v3399_v56 = vld [vmem:[#allocation2 + $0x39] sm:$0xff]  ;;  %v2674_v63 = vpack.c.bf16 %v473_v52, %v472_v49  ;;  %v2679_v18 = vpack.c.bf16 %v3350_v25, %v474_v54 }
  0x23   : > { %2845 = vmatpush3.bf16.msra.mxu0 %v617_v50  ;;  %2840 = vmatprep.mubr.msk.bf16.mxu0 %vm427_vm1, %v2673_v51  ;;  %1479 = vst.msk [vmem:[#allocation2 + $0x28] sm:$0x1] %vm438_vm2, %v3193_v2  ;;  %v3404_v57 = vld [vmem:[#allocation2 + $0x51] sm:$0xff]  ;;  %1480 = vst.msk [vmem:[#allocation2 + $0x40] sm:$0x1] %vm438_vm2, %v3193_v2  ;;  %v3408_v58 = vld [vmem:[#allocation2 + $0x69] sm:$0xff]  ;;  %v2689_v43 = vpack.c.bf16 %v3397_v55, %v3359_v31  ;;  %v2693_v48 = vpack.c.bf16 %v3399_v56, %v3397_v55 }
  0x24   : > { %3160 = vmatprep.subr.msk.bf16.mxu0 %vm519_vm0, %v2538_v53  ;;  %v3410_v59 = vld [vmem:[#allocation2 + $0x81] sm:$0xff]  ;;  %1481 = vst.msk [vmem:[#allocation2 + $0x58] sm:$0x1] %vm438_vm2, %v3193_v2  ;;  %1482 = vst.msk [vmem:[#allocation2 + $0x70] sm:$0x1] %vm438_vm2, %v3193_v2  ;;  %v3418_v60 = vld [vmem:[#allocation2 + $0x99] sm:$0xff]  ;;  %v2690_v44 = vpack.c.bf16 %v3404_v57, %v3399_v56  ;;  %v2694_v49 = vpack.c.bf16 %v3408_v58, %v3404_v57 }
  0x25   : > { %1483 = vst.msk [vmem:[#allocation2 + $0x88] sm:$0x1] %vm438_vm2, %v3193_v2  ;;  %v3420_v61 = vld [vmem:[#allocation2 + $0xb1] sm:$0xff]  ;;  %v3422_v62 = vld [vmem:[#allocation2 + $0xc9] sm:$0xff]  ;;  %1484 = vst.msk [vmem:[#allocation2 + $0xa0] sm:$0x1] %vm438_vm2, %v3193_v2  ;;  %v2691_v45 = vpack.c.bf16 %v3410_v59, %v3408_v58  ;;  %v2695_v50 = vpack.c.bf16 %v3418_v60, %v3410_v59 }
  0x26   : > { %1485 = vst.msk [vmem:[#allocation2 + $0xb8] sm:$0x1] %vm438_vm2, %v3193_v2  ;;  %1486 = vst.msk [vmem:[#allocation2 + $0xd0] sm:$0x1] %vm438_vm2, %v3193_v2  ;;  %v2678_v2 = vpack.c.bf16 %v474_v54, %v473_v52  ;;  %v777_v16 = vld [vmem:[#allocation2 + $0x20] sm:$0xff]  ;;  %v778_v21 = vld [vmem:[#allocation2 + $0x38] sm:$0xff]  ;;  %v2692_v31 = vpack.c.bf16 %v3420_v61, %v3418_v60  ;;  %v2696_v52 = vpack.c.bf16 %v3422_v62, %v3420_v61 }
  0x27   : > { %v2680_v20 = vpack.c.bf16 %v777_v16, %v3357_v30  ;;  %v779_v22 = vld [vmem:[#allocation2 + $0x50] sm:$0xff]  ;;  %v780_v23 = vld [vmem:[#allocation2 + $0x68] sm:$0xff]  ;;  %v781_v24 = vld [vmem:[#allocation2 + $0x80] sm:$0xff]  ;;  %v2684_v33 = vpack.c.bf16 %v778_v21, %v777_v16  ;;  %v2697_v53 = vpack.c.bf16 %v3432_v1, %v3422_v62 }
  0x28   : > { %v2681_v26 = vpack.c.bf16 %v779_v22, %v778_v21  ;;  %v2682_v27 = vpack.c.bf16 %v781_v24, %v780_v23  ;;  %v782_v25 = vld [vmem:[#allocation2 + $0x98] sm:$0xff]  ;;  %v783_v30 = vld [vmem:[#allocation2 + $0xb0] sm:$0xff]  ;;  %v2685_v34 = vpack.c.bf16 %v780_v23, %v779_v22  ;;  %v784_v38 = vld [vmem:[#allocation2 + $0xc8] sm:$0xff] }
  0x29   : > { %v2683_v32 = vpack.c.bf16 %v783_v30, %v782_v25  ;;  %v2686_v35 = vpack.c.bf16 %v782_v25, %v781_v24  ;;  %v2687_v39 = vpack.c.bf16 %v784_v38, %v783_v30  ;;  %v2688_v42 = vpack.c.bf16 %v3424_v0, %v784_v38  ;;  %v2586_v47 = vld [vmem:[%s3660_s4 + $0x20] sm:$0xf]  ;;  %v3531_v56 = vld [vmem:[%s3664_s8 + $0xc] sm:$0xf]  ;;  %v2742_v23 = vld [vmem:[%s369_s11 + $0x10] sm:$0xff]  }
  0x2a   : > { %2841 = vmatmul.mubr.msk.bf16.gmra.mrb[4].mxu0 %vm427_vm1, %v2674_v63  ;;  %v1515_v54 = vld [vmem:[%s3664_s8] sm:$0xf]  ;;  %v2741_v57 = vld [vmem:[%s369_s11 + $0x8] sm:$0xff]  }
  0x2b   : > { %2846 = vmatprep.mubr.msk.bf16.mxu0 %vm427_vm1, %v2675_v3  ;;  %3167 = vmatprep.subr.msk.bf16.mxu1 %vm519_vm0, %v1515_v54  ;;  %v1549_v55 = vsel %vm519_vm0, %v1515_v54, 0  ;;  %v2726_v58 = vld [vmem:[%s369_s11] sm:$0xff]   ;;  %v2731_v60 = vunpack.c.l.bf16 %v2741_v57  ;;  %v2732_v1 = vunpack.c.h.bf16 %v2741_v57 }
  0x2c   : > { %2925 = vmatpush3.bf16.msra.mxu1 %v1549_v55  ;;  %v2520_v59 = vld [vmem:[%s3661_s5] ss:$0 sm:$0xff]  ;;  %v2727_v62 = vunpack.c.l.bf16 %v2726_v58 }
  0x2d   : > { %3168 = vmatprep.subr.msk.bf16.mxu1 %vm519_vm0, %v3531_v56  ;;  %v2592_v3 = vld [vmem:[%s3662_s6] ss:$0 sm:$0xff] }
  0x32   : > { %2847 = vmatmul.mubr.msk.bf16.vlgmr.msra.gmra.mrb[0].mxu0 %vm427_vm1, %v2676_v4 }
  0x33   : > { %2855 = vmatpush3.bf16.msra.mxu0 %v701_v9  ;;  %2850 = vmatprep.mubr.msk.bf16.mxu0 %vm427_vm1, %v2677_v5  ;;  %v2728_v9 = vunpack.c.h.bf16 %v2726_v58 }
  0x34   : > { %3161 = vmatprep.subr.msk.bf16.mxu0 %vm519_vm0, %v2544_v10 }
  0x3a   : > { %2851 = vmatmul.mubr.msk.bf16.gmra.mrb[4].mxu0 %vm427_vm1, %v2678_v2 }
  0x3b   : > { %2856 = vmatprep.mubr.msk.bf16.mxu0 %vm427_vm1, %v2672_v46  ;;  %v1237_v46 = vsel %vm519_vm0, %v2577_v41, 0 }
  0x42   : > { %2857 = vmatmul.mubr.msk.bf16.vlgmr.msra.gmra.mrb[0].mxu0 %vm427_vm1, %v2673_v51  ;;  %v1321_v51 = vsel %vm519_vm0, %v2586_v47, 0 }
  0x43   : > { %2865 = vmatpush3.bf16.msra.mxu0 %v831_v11  ;;  %2860 = vmatprep.mubr.msk.bf16.mxu0 %vm427_vm1, %v2674_v63 }
  0x44   : > { %3162 = vmatprep.subr.msk.bf16.mxu0 %vm519_vm0, %v2553_v15  ;;  %v2593_v15 = vld [vmem:[%s3663_s7] ss:$0 sm:$0xff] }
  0x4a   : > { %2861 = vmatmul.mubr.msk.bf16.gmra.mrb[4].mxu0 %vm427_vm1, %v2679_v18 }
  0x4b   : > { %2866 = vmatprep.mubr.msk.bf16.mxu0 %vm427_vm1, %v2680_v20  ;;  %v2743_v20 = vld [vmem:[%s369_s11 + $0x18] sm:$0xff]  }
  0x4c   : > { %v2740_v38 = vunpack.c.h.bf16 %v2743_v20 }
  0x52   : > { %2867 = vmatmul.mubr.msk.bf16.vlgmr.msra.gmra.mrb[0].mxu0 %vm427_vm1, %v2681_v26 }
  0x53   : > { %2875 = vmatpush3.bf16.msra.mxu0 %v927_v28  ;;  %2870 = vmatprep.mubr.msk.bf16.mxu0 %vm427_vm1, %v2682_v27 }
  0x54   : > { %3163 = vmatprep.subr.msk.bf16.mxu0 %vm519_vm0, %v2562_v29  ;;  %v2739_v29 = vunpack.c.l.bf16 %v2743_v20 }
  0x5a   : > { %2871 = vmatmul.mubr.msk.bf16.gmra.mrb[4].mxu0 %vm427_vm1, %v2683_v32 }
  0x5b   : > { %2876 = vmatprep.mubr.msk.bf16.mxu0 %vm427_vm1, %v2684_v33  ;;  %v2735_v33 = vunpack.c.l.bf16 %v2742_v23 }
  0x62   : > { %2877 = vmatmul.mubr.msk.bf16.vlgmr.msra.gmra.mrb[0].mxu0 %vm427_vm1, %v2685_v34 }
  0x63   : > { %2885 = vmatpush3.bf16.msra.mxu0 %v1011_v36  ;;  %2880 = vmatprep.mubr.msk.bf16.mxu0 %vm427_vm1, %v2686_v35 }
  0x64   : > { %3164 = vmatprep.subr.msk.bf16.mxu0 %vm519_vm0, %v2568_v37 }
  0x6a   : > { %2881 = vmatmul.mubr.msk.bf16.gmra.mrb[4].mxu0 %vm427_vm1, %v2687_v39 }
  0x6b   : > { %2886 = vmatprep.mubr.msk.bf16.mxu0 %vm427_vm1, %v2681_v26 }
  0x72   : > { %2887 = vmatmul.mubr.msk.bf16.vlgmr.msra.gmra.mrb[0].mxu0 %vm427_vm1, %v2682_v27 }
  0x73   : > { %2895 = vmatpush3.bf16.msra.mxu0 %v1141_v40  ;;  %2890 = vmatprep.mubr.msk.bf16.mxu0 %vm427_vm1, %v2683_v32 }
  0x74   : > { %3165 = vmatprep.subr.msk.bf16.mxu0 %vm519_vm0, %v2577_v41 }
  0x7a   : > { %2891 = vmatmul.mubr.msk.bf16.gmra.mrb[4].mxu0 %vm427_vm1, %v2688_v42 }
  0x7b   : > { %2896 = vmatprep.mubr.msk.bf16.mxu0 %vm427_vm1, %v2689_v43  ;;  %v2736_v43 = vunpack.c.h.bf16 %v2742_v23 }
  0x82   : > { %2897 = vmatmul.mubr.msk.bf16.vlgmr.msra.gmra.mrb[0].mxu0 %vm427_vm1, %v2690_v44 }
  0x83   : > { %2905 = vmatpush3.bf16.msra.mxu0 %v1237_v46  ;;  %2900 = vmatprep.mubr.msk.bf16.mxu0 %vm427_vm1, %v2691_v45 }
  0x84   : > { %3166 = vmatprep.subr.msk.bf16.mxu0 %vm519_vm0, %v2586_v47 }
  0x8a   : > { %2901 = vmatmul.mubr.msk.bf16.gmra.mrb[4].mxu0 %vm427_vm1, %v2692_v31 }
  0x8b   : > { %2906 = vmatprep.mubr.msk.bf16.mxu0 %vm427_vm1, %v2693_v48 }
  0x92   : > { %2907 = vmatmul.mubr.msk.bf16.vlgmr.msra.gmra.mrb[0].mxu0 %vm427_vm1, %v2694_v49 }
  0x93   : > { %2915 = vmatpush3.bf16.msra.mxu0 %v1321_v51  ;;  %2910 = vmatprep.mubr.msk.bf16.mxu0 %vm427_vm1, %v2695_v50 }
  0x9a   : > { %2911 = vmatmul.mubr.msk.bf16.gmra.mrb[4].mxu0 %vm427_vm1, %v2696_v52 }
  0x9b   : > { %2916 = vmatprep.mubr.msk.bf16.mxu0 %vm427_vm1, %v2690_v44 }
  0xa2   : > { %2917 = vmatmul.mubr.msk.bf16.vlgmr.msra.gmra.mrb[0].mxu0 %vm427_vm1, %v2691_v45 }
  0xa3   : > { %2920 = vmatprep.mubr.msk.bf16.mxu0 %vm427_vm1, %v2692_v31 }
  0xaa   : > { %2921 = vmatmul.mubr.msk.bf16.gmra.mrb[4].mxu0 %vm427_vm1, %v2697_v53 }
 0x175   : > { %v2918_v61 = vpop.f32.mrb[0].mxu0 }
 0x176   : > { %v3014_v63 = vadd.f32 %v2918_v61, %v2520_v59  ;;  %v1357_v0 = vpop.f32.mrb[1].mxu0 }
 0x177   : > { %v3015_v4 = vadd.f32 %v2520_v59, %v1357_v0  ;;  %v2919_v5 = vpop.f32.mrb[2].mxu0 }
 0x178   : > { %v1414_v10 = vadd.f32 %v3014_v63, %v2731_v60  ;;  %v3016_v2 = vadd.f32 %v2919_v5, %v2520_v59  ;;  %v1360_v11 = vpop.f32.mrb[3].mxu0 }
 0x179   : > { %v1412_v16 = vadd.f32 %v3015_v4, %v2727_v62  ;;  %v3017_v18 = vadd.f32 %v2520_v59, %v1360_v11  ;;  %v1495_v62 = vld [vmem:[#allocation2 + $0x7] sm:$0xff]  ;;  %v2612_v11 = vld [vmem:[%s3664_s8 + $0x18] sm:$0xf] }
 0x17a   : > { %v1429_v21 = vmul.f32 %v2592_v3, %v1414_v10  ;;  %v1415_v22 = vadd.f32 %v3016_v2, %v2732_v1  ;;  %v1645_v2 = vsel %vm519_vm0, %v3531_v56, 0 }
 0x17b   : > { %v1427_v24 = vmul.f32 %v2592_v3, %v1412_v16  ;;  %v1413_v26 = vadd.f32 %v3017_v18, %v2728_v9 }
 0x17c   : > { %v1444_v27 = vadd.f32 %v2593_v15, %v1429_v21  ;;  %v1430_v28 = vmul.f32 %v2592_v3, %v1415_v22 }
 0x17d   : > { %v1442_v25 = vadd.f32 %v2593_v15, %v1427_v24  ;;  %v1428_v30 = vmul.f32 %v2592_v3, %v1413_v26  ;;  %v2922_v32 = vpop.f32.mrb[4].mxu0  ;;  %v1729_v24 = vsel %vm519_vm0, %v2612_v11, 0 }
 0x17e   : > { %v1452_v34 = vmax.f32 %v1444_v27, 0.0  ;;  %v1445_v35 = vadd.f32 %v2593_v15, %v1430_v28  ;;  %v3018_v36 = vadd.f32 %v2922_v32, %v2520_v59  ;;  %v1373_v37 = vpop.f32.mrb[5].mxu0  ;;  %v2618_v27 = vld [vmem:[%s3664_s8 + $0x4] sm:$0xf] }
 0x17f   : > { %v1450_v39 = vmax.f32 %v1442_v25, 0.0  ;;  %v1443_v40 = vadd.f32 %v2593_v15, %v1428_v30  ;;  %v3019_v41 = vadd.f32 %v2520_v59, %v1373_v37  ;;  %v2923_v42 = vpop.f32.mrb[6].mxu0  ;;  %v1859_v25 = vsel %vm519_vm0, %v2618_v27, 0  ;;  %v2627_v30 = vld [vmem:[%s3664_s8 + $0x10] sm:$0xf]  ;;  %v1504_v32 = vld [vmem:[#allocation2 + $0xdf] sm:$0xff] }
 0x180   : > { %1461 = vst.msk [vmem:[#allocation2 + $0x50] sm:$0xff] %vm427_vm1, %v1452_v34  ;;  %v1453_v44 = vmax.f32 %v1445_v35, 0.0  ;;  %v1418_v45 = vadd.f32 %v3018_v36, %v2739_v29  ;;  %v3020_v46 = vadd.f32 %v2923_v42, %v2520_v59  ;;  %v1376_v47 = vpop.f32.mrb[7].mxu0 }
 0x181   : > { %1459 = vst.msk [vmem:[#allocation2 + $0x20] sm:$0xff] %vm427_vm1, %v1450_v39  ;;  %v1451_v31 = vmax.f32 %v1443_v40, 0.0  ;;  %v1416_v48 = vadd.f32 %v3019_v41, %v2735_v33  ;;  %v3021_v49 = vadd.f32 %v2520_v59, %v1376_v47  ;;  %v1804_v33 = vld [vmem:[#allocation2 + $0x8] sm:$0xff]  ;;  %v1955_v41 = vsel %vm519_vm0, %v2627_v30, 0 }
 0x182   : > { %1462 = vst.msk [vmem:[#allocation2 + $0x68] sm:$0xff] %vm427_vm1, %v1453_v44  ;;  %v1433_v50 = vmul.f32 %v2592_v3, %v1418_v45  ;;  %v1419_v51 = vadd.f32 %v3020_v46, %v2740_v38  ;;  %v2636_v44 = vld [vmem:[%s3664_s8 + $0x1c] sm:$0xf] }
 0x183   : > { %1460 = vst.msk [vmem:[#allocation2 + $0x38] sm:$0xff] %vm427_vm1, %v1451_v31  ;;  %v1431_v52 = vmul.f32 %v2592_v3, %v1416_v48  ;;  %v1417_v53 = vadd.f32 %v3021_v49, %v2736_v43  ;;  %v2039_v49 = vsel %vm519_vm0, %v2636_v44, 0 }
 0x184   : > { %v1448_v54 = vadd.f32 %v2593_v15, %v1433_v50  ;;  %v1434_v55 = vmul.f32 %v2592_v3, %v1419_v51  ;;  %v2642_v51 = vld [vmem:[%s3664_s8 + $0x8] sm:$0xf] }
 0x185   : > { %v1446_v57 = vadd.f32 %v2593_v15, %v1431_v52  ;;  %v1432_v58 = vmul.f32 %v2592_v3, %v1417_v53 }
 0x186   : > { %v1456_v60 = vmax.f32 %v1448_v54, 0.0  ;;  %v1449_v61 = vadd.f32 %v2593_v15, %v1434_v55  ;;  %v2169_v54 = vsel %vm519_vm0, %v2642_v51, 0  ;;  %v2651_v55 = vld [vmem:[%s3664_s8 + $0x14] sm:$0xf] }
 0x187   : > { %v1454_v63 = vmax.f32 %v1446_v57, 0.0  ;;  %v1447_v0 = vadd.f32 %v2593_v15, %v1432_v58  ;;  %v1498_v10 = vld [vmem:[#allocation2 + $0x4f] sm:$0xff]  ;;  %v1813_v57 = vld [vmem:[#allocation2 + $0xe0] sm:$0xff] }
 0x188   : > { %1465 = vst.msk [vmem:[#allocation2 + $0xb0] sm:$0xff] %vm427_vm1, %v1456_v60  ;;  %v1457_v59 = vmax.f32 %v1449_v61, 0.0  ;;  %v1496_v1 = vld [vmem:[#allocation2 + $0x1f] sm:$0xff]  ;;  %v1807_v39 = vld [vmem:[#allocation2 + $0x50] sm:$0xff] }
 0x189   : > { %1463 = vst.msk [vmem:[#allocation2 + $0x80] sm:$0xff] %vm427_vm1, %v1454_v63  ;;  %v1455_v4 = vmax.f32 %v1447_v0, 0.0  ;;  %v2698_v5 = vpack.c.bf16 %v1496_v1, %v1495_v62  ;;  %v1499_v15 = vld [vmem:[#allocation2 + $0x67] sm:$0xff] }
 0x18a   : > { %1466 = vst.msk [vmem:[#allocation2 + $0xc8] sm:$0xff] %vm427_vm1, %v1457_v59  ;;  %v1497_v9 = vld [vmem:[#allocation2 + $0x37] sm:$0xff]  ;;  %v2703_v56 = vpack.c.bf16 %v1499_v15, %v1498_v10  ;;  %v1805_v34 = vld [vmem:[#allocation2 + $0x20] sm:$0xff]  ;;  %v1808_v42 = vld [vmem:[#allocation2 + $0x68] sm:$0xff] }
 0x18b   : > { %1464 = vst.msk [vmem:[#allocation2 + $0x98] sm:$0xff] %vm427_vm1, %v1455_v4  ;;  %v2699_v3 = vpack.c.bf16 %v1498_v10, %v1497_v9  ;;  %2926 = vmatprep.mubr.msk.bf16.mxu1 %vm427_vm1, %v2698_v5  ;;  %v2702_v23 = vpack.c.bf16 %v1497_v9, %v1496_v1  ;;  %v2707_v36 = vpack.c.bf16 %v1805_v34, %v1804_v33  ;;  %v1806_v37 = vld [vmem:[#allocation2 + $0x38] sm:$0xff]  ;;  %v2114_v58 = vld [vmem:[#allocation2 + $0x9] sm:$0xff]  ;;  %v2115_v60 = vld [vmem:[#allocation2 + $0x21] sm:$0xff]  ;;  %v2265_v4 = vsel %vm519_vm0, %v2651_v55, 0 }
 0x18c   : > { %v2708_v40 = vpack.c.bf16 %v1807_v39, %v1806_v37  ;;  %v2711_v31 = vpack.c.bf16 %v1806_v37, %v1805_v34  ;;  %v2712_v48 = vpack.c.bf16 %v1808_v42, %v1807_v39  ;;  %v2716_v62 = vpack.c.bf16 %v2115_v60, %v2114_v58  ;;  %v2116_v63 = vld [vmem:[#allocation2 + $0x39] sm:$0xff]  ;;  %v2117_v59 = vld [vmem:[#allocation2 + $0x51] sm:$0xff]  ;;  %v2118_v5 = vld [vmem:[#allocation2 + $0x69] sm:$0xff] }
 0x18d   : > { %2927 = vmatmul.mubr.msk.bf16.vlgmr.msra.gmra.mrb[0].mxu1 %vm427_vm1, %v2699_v3  ;;  %v2717_v1 = vpack.c.bf16 %v2117_v59, %v2116_v63  ;;  %v2660_v10 = vld [vmem:[%s3664_s8 + $0x20] sm:$0xf] }
 0x18e   : > { %2935 = vmatpush3.bf16.msra.mxu1 %v1645_v2 }
 0x18f   : > { %3169 = vmatprep.subr.msk.bf16.mxu1 %vm519_vm0, %v2612_v11  ;;  %v1502_v21 = vld [vmem:[#allocation2 + $0xaf] sm:$0xff] }
 0x190   : > { %v1500_v16 = vld [vmem:[#allocation2 + $0x7f] sm:$0xff]  ;;  %v1811_v46 = vld [vmem:[#allocation2 + $0xb0] sm:$0xff] }
 0x191   : > { %v2700_v18 = vpack.c.bf16 %v1500_v16, %v1499_v15  ;;  %v1503_v28 = vld [vmem:[#allocation2 + $0xc7] sm:$0xff]  ;;  %v2121_v2 = vld [vmem:[#allocation2 + $0xb1] sm:$0xff]  ;;  %v2720_v15 = vpack.c.bf16 %v2116_v63, %v2115_v60 }
 0x192   : > { %v1501_v20 = vld [vmem:[#allocation2 + $0x97] sm:$0xff]  ;;  %v2705_v29 = vpack.c.bf16 %v1503_v28, %v1502_v21  ;;  %v2706_v35 = vpack.c.bf16 %v1504_v32, %v1503_v28  ;;  %v1809_v38 = vld [vmem:[#allocation2 + $0x80] sm:$0xff]  ;;  %v1812_v52 = vld [vmem:[#allocation2 + $0xc8] sm:$0xff] }
 0x193   : > { %2930 = vmatprep.mubr.msk.bf16.mxu1 %vm427_vm1, %v2700_v18  ;;  %v2701_v22 = vpack.c.bf16 %v1502_v21, %v1501_v20  ;;  %v2704_v26 = vpack.c.bf16 %v1501_v20, %v1500_v16  ;;  %v2709_v43 = vpack.c.bf16 %v1809_v38, %v1808_v42  ;;  %v1810_v45 = vld [vmem:[#allocation2 + $0x98] sm:$0xff]  ;;  %v2714_v53 = vpack.c.bf16 %v1812_v52, %v1811_v46  ;;  %v2119_v0 = vld [vmem:[#allocation2 + $0x81] sm:$0xff]  ;;  %v2122_v21 = vld [vmem:[#allocation2 + $0xc9] sm:$0xff] }
 0x194   : > { %v2710_v47 = vpack.c.bf16 %v1811_v46, %v1810_v45  ;;  %v2713_v50 = vpack.c.bf16 %v1810_v45, %v1809_v38  ;;  %v2715_v61 = vpack.c.bf16 %v1813_v57, %v1812_v52  ;;  %v2718_v9 = vpack.c.bf16 %v2119_v0, %v2118_v5 }
 0x195   : > { %2931 = vmatmul.mubr.msk.bf16.gmra.mrb[4].mxu1 %vm427_vm1, %v2701_v22  ;;  %v2721_v16 = vpack.c.bf16 %v2118_v5, %v2117_v59 }
 0x196   : > { %2936 = vmatprep.mubr.msk.bf16.mxu1 %vm427_vm1, %v2702_v23  ;;  %v2123_v23 = vld [vmem:[#allocation2 + $0xe1] sm:$0xff] }
 0x19d   : > { %2937 = vmatmul.mubr.msk.bf16.vlgmr.msra.gmra.mrb[0].mxu1 %vm427_vm1, %v2703_v56  ;;  %v2724_v56 = vpack.c.bf16 %v2123_v23, %v2122_v21 }
 0x19e   : > { %2945 = vmatpush3.bf16.msra.mxu1 %v1729_v24  ;;  %2940 = vmatprep.mubr.msk.bf16.mxu1 %vm427_vm1, %v2704_v26  ;;  %v2594_v24 = vld [vmem:[%s3665_s9] ss:$0 sm:$0xff] }
 0x19f   : > { %3170 = vmatprep.subr.msk.bf16.mxu1 %vm519_vm0, %v2618_v27 }
 0x1a5   : > { %2941 = vmatmul.mubr.msk.bf16.gmra.mrb[4].mxu1 %vm427_vm1, %v2705_v29 }
 0x1a6   : > { %2946 = vmatprep.mubr.msk.bf16.mxu1 %vm427_vm1, %v2699_v3  ;;  %v2120_v3 = vld [vmem:[#allocation2 + $0x99] sm:$0xff] }
 0x1a7   : > { %v2719_v11 = vpack.c.bf16 %v2121_v2, %v2120_v3  ;;  %v2722_v20 = vpack.c.bf16 %v2120_v3, %v2119_v0 }
 0x1ad   : > { %2947 = vmatmul.mubr.msk.bf16.vlgmr.msra.gmra.mrb[0].mxu1 %vm427_vm1, %v2700_v18  ;;  %v2349_v18 = vsel %vm519_vm0, %v2660_v10, 0 }
 0x1ae   : > { %2955 = vmatpush3.bf16.msra.mxu1 %v1859_v25  ;;  %2950 = vmatprep.mubr.msk.bf16.mxu1 %vm427_vm1, %v2701_v22  ;;  %v2723_v22 = vpack.c.bf16 %v2122_v21, %v2121_v2 }
 0x1af   : > { %3171 = vmatprep.subr.msk.bf16.mxu1 %vm519_vm0, %v2627_v30 }
 0x1b5   : > { %2951 = vmatmul.mubr.msk.bf16.gmra.mrb[4].mxu1 %vm427_vm1, %v2706_v35 }
 0x1b6   : > { %2956 = vmatprep.mubr.msk.bf16.mxu1 %vm427_vm1, %v2707_v36 }
 0x1bd   : > { %2957 = vmatmul.mubr.msk.bf16.vlgmr.msra.gmra.mrb[0].mxu1 %vm427_vm1, %v2708_v40 }
 0x1be   : > { %2965 = vmatpush3.bf16.msra.mxu1 %v1955_v41  ;;  %2960 = vmatprep.mubr.msk.bf16.mxu1 %vm427_vm1, %v2709_v43 }
 0x1bf   : > { %3172 = vmatprep.subr.msk.bf16.mxu1 %vm519_vm0, %v2636_v44 }
 0x1c5   : > { %2961 = vmatmul.mubr.msk.bf16.gmra.mrb[4].mxu1 %vm427_vm1, %v2710_v47 }
 0x1c6   : > { %2966 = vmatprep.mubr.msk.bf16.mxu1 %vm427_vm1, %v2711_v31 }
 0x1cd   : > { %2967 = vmatmul.mubr.msk.bf16.vlgmr.msra.gmra.mrb[0].mxu1 %vm427_vm1, %v2712_v48 }
 0x1ce   : > { %2975 = vmatpush3.bf16.msra.mxu1 %v2039_v49  ;;  %2970 = vmatprep.mubr.msk.bf16.mxu1 %vm427_vm1, %v2713_v50 }
 0x1cf   : > { %3173 = vmatprep.subr.msk.bf16.mxu1 %vm519_vm0, %v2642_v51 }
 0x1d5   : > { %2971 = vmatmul.mubr.msk.bf16.gmra.mrb[4].mxu1 %vm427_vm1, %v2714_v53 }
 0x1d6   : > { %2976 = vmatprep.mubr.msk.bf16.mxu1 %vm427_vm1, %v2708_v40 }
 0x1dd   : > { %2977 = vmatmul.mubr.msk.bf16.vlgmr.msra.gmra.mrb[0].mxu1 %vm427_vm1, %v2709_v43 }
 0x1de   : > { %2985 = vmatpush3.bf16.msra.mxu1 %v2169_v54  ;;  %2980 = vmatprep.mubr.msk.bf16.mxu1 %vm427_vm1, %v2710_v47 }
 0x1df   : > { %3174 = vmatprep.subr.msk.bf16.mxu1 %vm519_vm0, %v2651_v55 }
 0x1e5   : > { %2981 = vmatmul.mubr.msk.bf16.gmra.mrb[4].mxu1 %vm427_vm1, %v2715_v61 }
 0x1e6   : > { %2986 = vmatprep.mubr.msk.bf16.mxu1 %vm427_vm1, %v2716_v62 }
 0x1ed   : > { %2987 = vmatmul.mubr.msk.bf16.vlgmr.msra.gmra.mrb[0].mxu1 %vm427_vm1, %v2717_v1 }
 0x1ee   : > { %2995 = vmatpush3.bf16.msra.mxu1 %v2265_v4  ;;  %2990 = vmatprep.mubr.msk.bf16.mxu1 %vm427_vm1, %v2718_v9 }
 0x1ef   : > { %3175 = vmatprep.subr.msk.bf16.mxu1 %vm519_vm0, %v2660_v10 }
 0x1f5   : > { %2991 = vmatmul.mubr.msk.bf16.gmra.mrb[4].mxu1 %vm427_vm1, %v2719_v11 }
 0x1f6   : > { %2996 = vmatprep.mubr.msk.bf16.mxu1 %vm427_vm1, %v2720_v15 }
 0x1fd   : > { %2997 = vmatmul.mubr.msk.bf16.vlgmr.msra.gmra.mrb[0].mxu1 %vm427_vm1, %v2721_v16 }
 0x1fe   : > { %3005 = vmatpush3.bf16.msra.mxu1 %v2349_v18  ;;  %3000 = vmatprep.mubr.msk.bf16.mxu1 %vm427_vm1, %v2722_v20 }
 0x205   : > { %3001 = vmatmul.mubr.msk.bf16.gmra.mrb[4].mxu1 %vm427_vm1, %v2723_v22 }
 0x206   : > { %3006 = vmatprep.mubr.msk.bf16.mxu1 %vm427_vm1, %v2717_v1 }
 0x20d   : > { %3007 = vmatmul.mubr.msk.bf16.vlgmr.msra.gmra.mrb[0].mxu1 %vm427_vm1, %v2718_v9 }
 0x20e   : > { %3010 = vmatprep.mubr.msk.bf16.mxu1 %vm427_vm1, %v2719_v11 }
 0x215   : > { %3011 = vmatmul.mubr.msk.bf16.gmra.mrb[4].mxu1 %vm427_vm1, %v2724_v56 }
 0x2e0   : > { %v3008_v26 = vpop.f32.mrb[0].mxu1 }
 0x2e1   : > { %v3022_v27 = vadd.f32 %v3008_v26, %v2594_v24  ;;  %v2385_v28 = vpop.f32.mrb[1].mxu1 }
 0x2e2   : > { %v3023_v29 = vadd.f32 %v2594_v24, %v2385_v28  ;;  %v3009_v25 = vpop.f32.mrb[2].mxu1 }
 0x2e3   : > { %v2426_v30 = vmul.f32 %v3022_v27, %v3331_v8  ;;  %v3024_v32 = vadd.f32 %v3009_v25, %v2594_v24  ;;  %v2388_v33 = vpop.f32.mrb[3].mxu1 }
 0x2e4   : > { %v2424_v34 = vmul.f32 %v3023_v29, %v3327_v6  ;;  %v3025_v35 = vadd.f32 %v2594_v24, %v2388_v33 }
 0x2e5   : > { %2434 = vst.msk [vmem:[%s379_s22 + $0x10] sm:$0xff] %vm427_vm1, %v2426_v30  ;;  %v2427_v36 = vmul.f32 %v3024_v32, %v3336_v12 }
 0x2e6   : > { %2432 = vst.msk [vmem:[%s379_s22] sm:$0xff] %vm427_vm1, %v2424_v34  ;;  %v2425_v37 = vmul.f32 %v3025_v35, %v3329_v7 }
 0x2e7   : > { %2435 = vst.msk [vmem:[%s379_s22 + $0x18] sm:$0xff] %vm427_vm1, %v2427_v36 }
 0x2e8   : > { %2433 = vst.msk [vmem:[%s379_s22 + $0x8] sm:$0xff] %vm427_vm1, %v2425_v37  ;;  %v3012_v38 = vpop.f32.mrb[4].mxu1 }
 0x2e9   : > { %v3026_v39 = vadd.f32 %v3012_v38, %v2594_v24  ;;  %v2401_v8 = vpop.f32.mrb[5].mxu1 }
 0x2ea   : > { %v3027_v40 = vadd.f32 %v2594_v24, %v2401_v8  ;;  %v3013_v41 = vpop.f32.mrb[6].mxu1 }
 0x2eb   : > { %v2430_v6 = vmul.f32 %v3026_v39, %v3344_v17  ;;  %v3028_v42 = vadd.f32 %v3013_v41, %v2594_v24  ;;  %v2404_v43 = vpop.f32.mrb[7].mxu1 }
 0x2ec   : > { %v2428_v44 = vmul.f32 %v3027_v40, %v3338_v13  ;;  %v3029_v12 = vadd.f32 %v2594_v24, %v2404_v43 }
 0x2ed   : > { %2438 = vst.msk [vmem:[%s379_s22 + $0x30] sm:$0xff] %vm427_vm1, %v2430_v6  ;;  %v2431_v7 = vmul.f32 %v3028_v42, %v3347_v19 }
 0x2ee   : > { %2436 = vst.msk [vmem:[%s379_s22 + $0x20] sm:$0xff] %vm427_vm1, %v2428_v44  ;;  %v2429_v45 = vmul.f32 %v3029_v12, %v3340_v14 }
 0x2ef   : > { %2439 = vst.msk [vmem:[%s379_s22 + $0x38] sm:$0xff] %vm427_vm1, %v2431_v7 }
 0x2f0   : > { %2437 = vst.msk [vmem:[%s379_s22 + $0x28] sm:$0xff] %vm427_vm1, %v2429_v45 }
 0x2f1 PF: > { %s20_s13 = sadd.s32 1, %s3191_s13  }
 0x2f2   : > { %p17_p4 = scmp.ge.s32.totalorder %s20_s13, 4  }
 0x2f4   :  { %19 = sbr.rel (!%p17_p4) target bundleno = 1 (0x1), region = 109 }

</bundles_post_ra>
